<compile_context>
chip_gen: v7x
topology: tpu7x:2x2x1
jax: 0.10.0
libtpu: 0.0.40
codegen_flags: <defaults>
</compile_context>

<pallas_src>
import jax
import jax.numpy as jnp
from jax import lax
from jax.experimental import pallas as pl
from jax.experimental.pallas import tpu as pltpu


# ----------------------------------------------------------------------------
# Pallas kernel: full WN forward for one batch element, NCL (C, T) layout.
# ----------------------------------------------------------------------------
def _make_wn_kernel(n_layers, kernel_size, dilations, C, T, use_roll=True):
    half_k = kernel_size // 2

    def kernel(x_ref, m_ref, *args):
        # args = [w_in, b_in, w_rs, b_rs] * n_layers, out_ref
        out_ref = args[-1]
        wrefs = args[:-1]

        x = x_ref[0].astype(jnp.float32)                       # (C, T)
        # Hoist the mask broadcast out of the layer loop (no CSE for
        # broadcast_in_dim) -- one (C, T) f32 mask reused everywhere.
        mask = jnp.broadcast_to(m_ref[0].astype(jnp.float32), (C, T))
        output = jnp.zeros((C, T), jnp.float32)                # skip accum

        for i in range(n_layers):
            d = dilations[i]
            last = i == n_layers - 1

            w_in = wrefs[4 * i][...]         # (2C, K*C) bf16
            b_in = wrefs[4 * i + 1][...]     # (2C, 1)   f32
            w_rs = wrefs[4 * i + 2][...]     # (R, C)    bf16
            b_rs = wrefs[4 * i + 3][...]     # (R, 1)    f32

            # K dilated taps. Roll path: XLU lane rotations; the wrapper
            # guarantees (T - T_orig) >= half_k * d, so any circular wrap
            # lands in zero lane-padding / masked lanes -> identical to the
            # reference zero "same" padding.
            if use_roll:
                taps = []
                for j in range(kernel_size):
                    off = (j - half_k) * d                       # static
                    if off == 0:
                        taps.append(x)
                    else:
                        taps.append(pltpu.roll(x, shift=(-off) % T, axis=1))
            else:  # fallback: pad + slice (always supported)
                pad = half_k * d
                xp = jnp.pad(x, ((0, 0), (pad, pad)))
                taps = [xp[:, j * d: j * d + T] for j in range(kernel_size)]
            xs = jnp.concatenate(taps, axis=0).astype(jnp.bfloat16)  # (K*C, T)

            # ONE fused gate+filter matmul; the split at row C is a free
            # 8-aligned sublane slice.
            y = jnp.dot(w_in, xs, preferred_element_type=jnp.float32) + b_in
            gate, filt = y[:C], y[C:]

            # sigmoid(g)*tanh(f) == 0.5*(1 + tanh(0.5*g)) * tanh(f)
            # -> 2 EUP tanh ops instead of exp + reciprocal + tanh.
            acts = (0.5 * (1.0 + jnp.tanh(0.5 * gate))) * jnp.tanh(filt)
            acts_b = acts.astype(jnp.bfloat16)
            # Dropout(p=0) is the identity.

            # ONE fused res+skip 1x1-conv matmul.
            rs = jnp.dot(w_rs, acts_b, preferred_element_type=jnp.float32) + b_rs
            if not last:
                x = (x + rs[:C]) * mask
                output = output + rs[C:]
            else:
                output = output + rs

        out_ref[0] = (output * mask).astype(out_ref.dtype)

    return kernel


# ----------------------------------------------------------------------------
# Wrapper: lane-dense padding + pallas_call (NCL compute, no transposes).
# ----------------------------------------------------------------------------
def wn_forward_pallas(x_ncl, mask_ncl, layer_params, kernel_size, dilation_rate):
    """x_ncl: (B, C, T) f32,  mask_ncl: (B, 1, T) f32."""
    assert kernel_size % 2 == 1, "WN requires odd kernel_size (matches torch module)"
    B, C, T = x_ncl.shape
    n_layers = len(layer_params)
    dilations = tuple(dilation_rate ** i for i in range(n_layers))

    # Lane-dense T: pad to a multiple of 128, with at least half_k*max_dilation
    # extra zeros so in-kernel lane rotations never wrap into valid data.
    max_halo = (kernel_size // 2) * dilations[-1]
    T_pad = -(-(T + max_halo) // 128) * 128
    x_p = jnp.pad(x_ncl, ((0, 0), (0, 0), (0, T_pad - T)))
    m_p = jnp.pad(mask_ncl, ((0, 0), (0, 0), (0, T_pad - T)))

    flat_weights = []
    for p in layer_params:
        flat_weights += [p["w_in_stk"], p["b_in_col"], p["w_rs_2d"], p["b_rs_col"]]

    # Generation-aware VMEM cap (v7x: 64 MiB physical -> ~54 MiB; v5e/v6e:
    # 128 MiB -> ~108 MiB).
    try:
        vmem_cap = int(pltpu.get_tpu_info().vmem_capacity_bytes)
    except Exception:
        vmem_cap = 64 << 20
    cap = max(min(int(0.85 * vmem_cap), vmem_cap - (8 << 20)), 32 << 20)

    nbytes = lambda a: a.size * a.dtype.itemsize
    weight_bytes = sum(nbytes(w) for w in flat_weights)
    block_bytes = (2 * C + 1) * T_pad * 4                   # x / out / mask blocks
    inter_bytes = (kernel_size + 10) * C * T_pad * 4        # taps + f32 temporaries

    def build(weights_buffered, use_roll):
        kernel = _make_wn_kernel(n_layers, kernel_size, dilations, C, T_pad,
                                 use_roll=use_roll)

        def weight_spec(arr):
            nd = arr.ndim
            if weights_buffered:
                # Grid-invariant block -> single-buffered residency.
                return pl.BlockSpec(arr.shape, lambda b, _nd=nd: (0,) * _nd,
                                    pipeline_mode=pl.Buffered(1))
            return pl.BlockSpec(arr.shape, lambda b, _nd=nd: (0,) * _nd)

        in_specs = [
            pl.BlockSpec((1, C, T_pad), lambda b: (b, 0, 0)),   # x
            pl.BlockSpec((1, 1, T_pad), lambda b: (b, 0, 0)),   # mask
        ] + [weight_spec(w) for w in flat_weights]

        wfac = 1 if weights_buffered else 2
        needed = wfac * weight_bytes + 2 * block_bytes + inter_bytes + (4 << 20)
        vmem_limit = int(min(max(needed, 32 << 20), cap))

        return pl.pallas_call(
            kernel,
            out_shape=jax.ShapeDtypeStruct((B, C, T_pad), x_ncl.dtype),
            grid=(B,),
            in_specs=in_specs,
            out_specs=pl.BlockSpec((1, C, T_pad), lambda b: (b, 0, 0)),
            compiler_params=pltpu.CompilerParams(
                dimension_semantics=("parallel",),
                vmem_limit_bytes=vmem_limit,
            ),
        )

    # Prefer Buffered(1) weights + roll-based taps; degrade gracefully if an
    # option is unsupported by the installed jax/Mosaic version.
    last_err = None
    for weights_buffered, use_roll in ((True, True), (False, True), (False, False)):
        try:
            out_p = build(weights_buffered, use_roll)(x_p, m_p, *flat_weights)
            return out_p[:, :, :T]
        except Exception as e:   # noqa: BLE001 - fall back to a safer config
            last_err = e
    raise last_err


# ----------------------------------------------------------------------------
# Deterministic parameter construction (weight-norm resolved here).
# ----------------------------------------------------------------------------
def make_wn_params(key, hidden_channels, kernel_size, n_layers):
    C = hidden_channels
    K = kernel_size
    params = []
    for i in range(n_layers):
        key, k1, k2, k3, k4, k5, k6 = jax.random.split(key, 7)
        R = 2 * C if i < n_layers - 1 else C

        # in_layer: Conv1d(C, 2C, K) with weight norm (torch OIK layout).
        v_in = jax.random.normal(k1, (2 * C, C, K), jnp.float32) * 0.1
        g_in = jax.random.uniform(k2, (2 * C, 1, 1), jnp.float32, 0.5, 1.5)
        b_in = jax.random.normal(k3, (2 * C,), jnp.float32) * 0.1
        norm_in = jnp.sqrt(jnp.sum(v_in * v_in, axis=(1, 2), keepdims=True))
        w_in = g_in * v_in / norm_in                  # (2C, C, K)

        # res_skip_layer: Conv1d(C, R, 1) with weight norm.
        v_rs = jax.random.normal(k4, (R, C, 1), jnp.float32) * 0.1
        g_rs = jax.random.uniform(k5, (R, 1, 1), jnp.float32, 0.5, 1.5)
        b_rs = jax.random.normal(k6, (R,), jnp.float32) * 0.1
        norm_rs = jnp.sqrt(jnp.sum(v_rs * v_rs, axis=(1, 2), keepdims=True))
        w_rs = g_rs * v_rs / norm_rs                  # (R, C, 1)

        # Kernel layout: taps stacked along the contraction dim
        #   w_in_stk[o, j*C + i] = w_in[o, i, j]        (FULL 2C slab, unsplit)
        # MXU operands pre-cast to bf16; biases stay f32 column vectors.
        w_in_stk = jnp.transpose(w_in, (0, 2, 1)).reshape(2 * C, K * C)

        params.append(dict(
            # torch layout (for the XLA reference check)
            w_in=w_in, b_in=b_in, w_rs=w_rs, b_rs=b_rs,
            # kernel layout
            w_in_stk=w_in_stk.astype(jnp.bfloat16),
            b_in_col=b_in[:, None],
            w_rs_2d=w_rs[:, :, 0].astype(jnp.bfloat16),
            b_rs_col=b_rs[:, None],
        ))
    return params


# ----------------------------------------------------------------------------
# Plain-JAX (XLA conv, f32) reference, mimicking the PyTorch forward exactly.
# ----------------------------------------------------------------------------
def wn_forward_ref(x, x_mask, layer_params, kernel_size, dilation_rate):
    B, C, T = x.shape
    n_layers = len(layer_params)
    output = jnp.zeros_like(x)
    for i, p in enumerate(layer_params):
        d = dilation_rate ** i
        pad = (kernel_size * d - d) // 2
        x_in = lax.conv_general_dilated(
            x, p["w_in"], window_strides=(1,), padding=[(pad, pad)],
            rhs_dilation=(d,), dimension_numbers=("NCH", "OIH", "NCH"),
        ) + p["b_in"][None, :, None]
        x1, x2 = x_in[:, :C, :], x_in[:, C:, :]
        acts = jax.nn.sigmoid(x1) * jnp.tanh(x2)
        rs = lax.conv_general_dilated(
            acts, p["w_rs"], window_strides=(1,), padding=[(0, 0)],
            dimension_numbers=("NCH", "OIH", "NCH"),
        ) + p["b_rs"][None, :, None]
        if i < n_layers - 1:
            x = (x + rs[:, :C, :]) * x_mask
            output = output + rs[:, C:, :]
        else:
            output = output + rs
    return output * x_mask


if __name__ == "__main__":
    # Small shapes consistent with the module.
    B, C, T = 2, 32, 48
    kernel_size, dilation_rate, n_layers = 3, 2, 3

    key = jax.random.PRNGKey(0)
    key, kx = jax.random.split(key)
    params = make_wn_params(key, C, kernel_size, n_layers)

    x = jax.random.normal(kx, (B, C, T), jnp.float32)
    # Mask: second sequence is padded (last 16 frames masked out).
    lengths = jnp.array([T, T - 16], jnp.int32)
    t_idx = jnp.arange(T)[None, None, :]
    x_mask = (t_idx < lengths[:, None, None]).astype(jnp.float32)  # (B, 1, T)

    out = wn_forward_pallas(x, x_mask, params, kernel_size, dilation_rate)
    out = jax.block_until_ready(out)

    ref = wn_forward_ref(x, x_mask, params, kernel_size, dilation_rate)
    assert out.shape == (B, C, T)
    # bf16 MXU operands (f32 accumulation) vs pure-f32 reference => relaxed tol.
    max_err = float(jnp.max(jnp.abs(out - ref)))
    assert jnp.allclose(out, ref, rtol=5e-2, atol=5e-2), max_err
    print("KERNEL_OK")
</pallas_src>

<mosaic_0001>
module attributes {stable_mosaic.version = 11 : i64} {
  func.func @kernel(%arg0: i32, %arg1: memref<1x32x128xf32, #tpu.memory_space<vmem>>, %arg2: memref<1x1x128xf32, #tpu.memory_space<vmem>>, %arg3: memref<64x96xbf16, #tpu.memory_space<vmem>>, %arg4: memref<64x1xf32, #tpu.memory_space<vmem>>, %arg5: memref<64x32xbf16, #tpu.memory_space<vmem>>, %arg6: memref<64x1xf32, #tpu.memory_space<vmem>>, %arg7: memref<64x96xbf16, #tpu.memory_space<vmem>>, %arg8: memref<64x1xf32, #tpu.memory_space<vmem>>, %arg9: memref<64x32xbf16, #tpu.memory_space<vmem>>, %arg10: memref<64x1xf32, #tpu.memory_space<vmem>>, %arg11: memref<64x96xbf16, #tpu.memory_space<vmem>>, %arg12: memref<64x1xf32, #tpu.memory_space<vmem>>, %arg13: memref<32x32xbf16, #tpu.memory_space<vmem>>, %arg14: memref<32x1xf32, #tpu.memory_space<vmem>>, %arg15: memref<1x32x128xf32, #tpu.memory_space<vmem>>) attributes {dimension_semantics = [#tpu.dimension_semantics<parallel>], iteration_bounds = array<i64: 2>, scalar_prefetch = 0 : i64, scratch_operands = 0 : i64, tpu.core_type = #tpu.core_type<tc>, window_params = [{transform_indices = @transform_0, window_bounds = array<i64: 1, 32, 128>}, {transform_indices = @transform_1, window_bounds = array<i64: 1, 1, 128>}, {pipeline_mode = #tpu.pipeline_mode<synchronous>, transform_indices = @transform_2, window_bounds = array<i64: 64, 96>}, {pipeline_mode = #tpu.pipeline_mode<synchronous>, transform_indices = @transform_3, window_bounds = array<i64: 64, 1>}, {pipeline_mode = #tpu.pipeline_mode<synchronous>, transform_indices = @transform_4, window_bounds = array<i64: 64, 32>}, {pipeline_mode = #tpu.pipeline_mode<synchronous>, transform_indices = @transform_5, window_bounds = array<i64: 64, 1>}, {pipeline_mode = #tpu.pipeline_mode<synchronous>, transform_indices = @transform_6, window_bounds = array<i64: 64, 96>}, {pipeline_mode = #tpu.pipeline_mode<synchronous>, transform_indices = @transform_7, window_bounds = array<i64: 64, 1>}, {pipeline_mode = #tpu.pipeline_mode<synchronous>, transform_indices = @transform_8, window_bounds = array<i64: 64, 32>}, {pipeline_mode = #tpu.pipeline_mode<synchronous>, transform_indices = @transform_9, window_bounds = array<i64: 64, 1>}, {pipeline_mode = #tpu.pipeline_mode<synchronous>, transform_indices = @transform_10, window_bounds = array<i64: 64, 96>}, {pipeline_mode = #tpu.pipeline_mode<synchronous>, transform_indices = @transform_11, window_bounds = array<i64: 64, 1>}, {pipeline_mode = #tpu.pipeline_mode<synchronous>, transform_indices = @transform_12, window_bounds = array<i64: 32, 32>}, {pipeline_mode = #tpu.pipeline_mode<synchronous>, transform_indices = @transform_13, window_bounds = array<i64: 32, 1>}, {transform_indices = @transform_14, window_bounds = array<i64: 1, 32, 128>}]} {
    %c0 = arith.constant 0 : index
    %c0_0 = arith.constant 0 : index
    %c0_1 = arith.constant 0 : index
    %0 = vector.load %arg1[%c0, %c0_0, %c0_1] : memref<1x32x128xf32, #tpu.memory_space<vmem>>, vector<1x32x128xf32>
    %1 = vector.shape_cast %0 : vector<1x32x128xf32> to vector<32x128xf32>
    %c0_2 = arith.constant 0 : index
    %c0_3 = arith.constant 0 : index
    %c0_4 = arith.constant 0 : index
    %2 = vector.load %arg2[%c0_2, %c0_3, %c0_4] : memref<1x1x128xf32, #tpu.memory_space<vmem>>, vector<1x1x128xf32>
    %3 = vector.shape_cast %2 : vector<1x1x128xf32> to vector<1x128xf32>
    %4 = vector.shape_cast %3 : vector<1x128xf32> to vector<1x128xf32>
    %5 = vector.broadcast %4 : vector<1x128xf32> to vector<32x128xf32>
    %cst = arith.constant 0.000000e+00 : f32
    %6 = vector.broadcast %cst : f32 to vector<32x128xf32>
    %c0_5 = arith.constant 0 : index
    %c0_6 = arith.constant 0 : index
    %7 = vector.load %arg3[%c0_5, %c0_6] : memref<64x96xbf16, #tpu.memory_space<vmem>>, vector<64x96xbf16>
    %c0_7 = arith.constant 0 : index
    %c0_8 = arith.constant 0 : index
    %8 = vector.load %arg4[%c0_7, %c0_8] : memref<64x1xf32, #tpu.memory_space<vmem>>, vector<64x1xf32>
    %c0_9 = arith.constant 0 : index
    %c0_10 = arith.constant 0 : index
    %9 = vector.load %arg5[%c0_9, %c0_10] : memref<64x32xbf16, #tpu.memory_space<vmem>>, vector<64x32xbf16>
    %c0_11 = arith.constant 0 : index
    %c0_12 = arith.constant 0 : index
    %10 = vector.load %arg6[%c0_11, %c0_12] : memref<64x1xf32, #tpu.memory_space<vmem>>, vector<64x1xf32>
    %c1_i32 = arith.constant 1 : i32
    %11 = tpu.dynamic_rotate %1 by %c1_i32 dim 1 : vector<32x128xf32>, i32 -> vector<32x128xf32>
    %c127_i32 = arith.constant 127 : i32
    %12 = tpu.dynamic_rotate %1 by %c127_i32 dim 1 : vector<32x128xf32>, i32 -> vector<32x128xf32>
    %13 = tpu.concatenate %11, %1, %12 in 0 : vector<32x128xf32>, vector<32x128xf32>, vector<32x128xf32> -> vector<96x128xf32>
    %14 = arith.truncf %13 : vector<96x128xf32> to vector<96x128xbf16>
    %cst_13 = arith.constant dense<0.000000e+00> : vector<64x128xf32>
    %15 = tpu.matmul %7, %14, %cst_13 {dimension_numbers = #tpu.dot_dimension_numbers<[1], [0], [0], [1], [0, 0, 1, 1], [], []>} : vector<64x96xbf16>, vector<96x128xbf16>, vector<64x128xf32> -> vector<64x128xf32>
    %16 = vector.broadcast %8 : vector<64x1xf32> to vector<64x128xf32>
    %17 = arith.addf %15, %16 : vector<64x128xf32>
    %18 = vector.extract_strided_slice %17 {offsets = [0, 0], sizes = [32, 128], strides = [1, 1]} : vector<64x128xf32> to vector<32x128xf32>
    %19 = vector.extract_strided_slice %17 {offsets = [32, 0], sizes = [32, 128], strides = [1, 1]} : vector<64x128xf32> to vector<32x128xf32>
    %cst_14 = arith.constant 5.000000e-01 : f32
    %20 = vector.broadcast %cst_14 : f32 to vector<32x128xf32>
    %21 = arith.mulf %20, %18 : vector<32x128xf32>
    %22 = math.tanh %21 : vector<32x128xf32>
    %cst_15 = arith.constant 1.000000e+00 : f32
    %23 = vector.broadcast %cst_15 : f32 to vector<32x128xf32>
    %24 = arith.addf %23, %22 : vector<32x128xf32>
    %cst_16 = arith.constant 5.000000e-01 : f32
    %25 = vector.broadcast %cst_16 : f32 to vector<32x128xf32>
    %26 = arith.mulf %25, %24 : vector<32x128xf32>
    %27 = math.tanh %19 : vector<32x128xf32>
    %28 = arith.mulf %26, %27 : vector<32x128xf32>
    %29 = arith.truncf %28 : vector<32x128xf32> to vector<32x128xbf16>
    %cst_17 = arith.constant dense<0.000000e+00> : vector<64x128xf32>
    %30 = tpu.matmul %9, %29, %cst_17 {dimension_numbers = #tpu.dot_dimension_numbers<[1], [0], [0], [1], [0, 0, 1, 1], [], []>} : vector<64x32xbf16>, vector<32x128xbf16>, vector<64x128xf32> -> vector<64x128xf32>
    %31 = vector.broadcast %10 : vector<64x1xf32> to vector<64x128xf32>
    %32 = arith.addf %30, %31 : vector<64x128xf32>
    %33 = vector.extract_strided_slice %32 {offsets = [0, 0], sizes = [32, 128], strides = [1, 1]} : vector<64x128xf32> to vector<32x128xf32>
    %34 = arith.addf %1, %33 : vector<32x128xf32>
    %35 = arith.mulf %34, %5 : vector<32x128xf32>
    %36 = vector.extract_strided_slice %32 {offsets = [32, 0], sizes = [32, 128], strides = [1, 1]} : vector<64x128xf32> to vector<32x128xf32>
    %37 = arith.addf %6, %36 : vector<32x128xf32>
    %c0_18 = arith.constant 0 : index
    %c0_19 = arith.constant 0 : index
    %38 = vector.load %arg7[%c0_18, %c0_19] : memref<64x96xbf16, #tpu.memory_space<vmem>>, vector<64x96xbf16>
    %c0_20 = arith.constant 0 : index
    %c0_21 = arith.constant 0 : index
    %39 = vector.load %arg8[%c0_20, %c0_21] : memref<64x1xf32, #tpu.memory_space<vmem>>, vector<64x1xf32>
    %c0_22 = arith.constant 0 : index
    %c0_23 = arith.constant 0 : index
    %40 = vector.load %arg9[%c0_22, %c0_23] : memref<64x32xbf16, #tpu.memory_space<vmem>>, vector<64x32xbf16>
    %c0_24 = arith.constant 0 : index
    %c0_25 = arith.constant 0 : index
    %41 = vector.load %arg10[%c0_24, %c0_25] : memref<64x1xf32, #tpu.memory_space<vmem>>, vector<64x1xf32>
    %c2_i32 = arith.constant 2 : i32
    %42 = tpu.dynamic_rotate %35 by %c2_i32 dim 1 : vector<32x128xf32>, i32 -> vector<32x128xf32>
    %c126_i32 = arith.constant 126 : i32
    %43 = tpu.dynamic_rotate %35 by %c126_i32 dim 1 : vector<32x128xf32>, i32 -> vector<32x128xf32>
    %44 = tpu.concatenate %42, %35, %43 in 0 : vector<32x128xf32>, vector<32x128xf32>, vector<32x128xf32> -> vector<96x128xf32>
    %45 = arith.truncf %44 : vector<96x128xf32> to vector<96x128xbf16>
    %cst_26 = arith.constant dense<0.000000e+00> : vector<64x128xf32>
    %46 = tpu.matmul %38, %45, %cst_26 {dimension_numbers = #tpu.dot_dimension_numbers<[1], [0], [0], [1], [0, 0, 1, 1], [], []>} : vector<64x96xbf16>, vector<96x128xbf16>, vector<64x128xf32> -> vector<64x128xf32>
    %47 = vector.broadcast %39 : vector<64x1xf32> to vector<64x128xf32>
    %48 = arith.addf %46, %47 : vector<64x128xf32>
    %49 = vector.extract_strided_slice %48 {offsets = [0, 0], sizes = [32, 128], strides = [1, 1]} : vector<64x128xf32> to vector<32x128xf32>
    %50 = vector.extract_strided_slice %48 {offsets = [32, 0], sizes = [32, 128], strides = [1, 1]} : vector<64x128xf32> to vector<32x128xf32>
    %cst_27 = arith.constant 5.000000e-01 : f32
    %51 = vector.broadcast %cst_27 : f32 to vector<32x128xf32>
    %52 = arith.mulf %51, %49 : vector<32x128xf32>
    %53 = math.tanh %52 : vector<32x128xf32>
    %cst_28 = arith.constant 1.000000e+00 : f32
    %54 = vector.broadcast %cst_28 : f32 to vector<32x128xf32>
    %55 = arith.addf %54, %53 : vector<32x128xf32>
    %cst_29 = arith.constant 5.000000e-01 : f32
    %56 = vector.broadcast %cst_29 : f32 to vector<32x128xf32>
    %57 = arith.mulf %56, %55 : vector<32x128xf32>
    %58 = math.tanh %50 : vector<32x128xf32>
    %59 = arith.mulf %57, %58 : vector<32x128xf32>
    %60 = arith.truncf %59 : vector<32x128xf32> to vector<32x128xbf16>
    %cst_30 = arith.constant dense<0.000000e+00> : vector<64x128xf32>
    %61 = tpu.matmul %40, %60, %cst_30 {dimension_numbers = #tpu.dot_dimension_numbers<[1], [0], [0], [1], [0, 0, 1, 1], [], []>} : vector<64x32xbf16>, vector<32x128xbf16>, vector<64x128xf32> -> vector<64x128xf32>
    %62 = vector.broadcast %41 : vector<64x1xf32> to vector<64x128xf32>
    %63 = arith.addf %61, %62 : vector<64x128xf32>
    %64 = vector.extract_strided_slice %63 {offsets = [0, 0], sizes = [32, 128], strides = [1, 1]} : vector<64x128xf32> to vector<32x128xf32>
    %65 = arith.addf %35, %64 : vector<32x128xf32>
    %66 = arith.mulf %65, %5 : vector<32x128xf32>
    %67 = vector.extract_strided_slice %63 {offsets = [32, 0], sizes = [32, 128], strides = [1, 1]} : vector<64x128xf32> to vector<32x128xf32>
    %68 = arith.addf %37, %67 : vector<32x128xf32>
    %c0_31 = arith.constant 0 : index
    %c0_32 = arith.constant 0 : index
    %69 = vector.load %arg11[%c0_31, %c0_32] : memref<64x96xbf16, #tpu.memory_space<vmem>>, vector<64x96xbf16>
    %c0_33 = arith.constant 0 : index
    %c0_34 = arith.constant 0 : index
    %70 = vector.load %arg12[%c0_33, %c0_34] : memref<64x1xf32, #tpu.memory_space<vmem>>, vector<64x1xf32>
    %c0_35 = arith.constant 0 : index
    %c0_36 = arith.constant 0 : index
    %71 = vector.load %arg13[%c0_35, %c0_36] : memref<32x32xbf16, #tpu.memory_space<vmem>>, vector<32x32xbf16>
    %c0_37 = arith.constant 0 : index
    %c0_38 = arith.constant 0 : index
    %72 = vector.load %arg14[%c0_37, %c0_38] : memref<32x1xf32, #tpu.memory_space<vmem>>, vector<32x1xf32>
    %c4_i32 = arith.constant 4 : i32
    %73 = tpu.dynamic_rotate %66 by %c4_i32 dim 1 : vector<32x128xf32>, i32 -> vector<32x128xf32>
    %c124_i32 = arith.constant 124 : i32
    %74 = tpu.dynamic_rotate %66 by %c124_i32 dim 1 : vector<32x128xf32>, i32 -> vector<32x128xf32>
    %75 = tpu.concatenate %73, %66, %74 in 0 : vector<32x128xf32>, vector<32x128xf32>, vector<32x128xf32> -> vector<96x128xf32>
    %76 = arith.truncf %75 : vector<96x128xf32> to vector<96x128xbf16>
    %cst_39 = arith.constant dense<0.000000e+00> : vector<64x128xf32>
    %77 = tpu.matmul %69, %76, %cst_39 {dimension_numbers = #tpu.dot_dimension_numbers<[1], [0], [0], [1], [0, 0, 1, 1], [], []>} : vector<64x96xbf16>, vector<96x128xbf16>, vector<64x128xf32> -> vector<64x128xf32>
    %78 = vector.broadcast %70 : vector<64x1xf32> to vector<64x128xf32>
    %79 = arith.addf %77, %78 : vector<64x128xf32>
    %80 = vector.extract_strided_slice %79 {offsets = [0, 0], sizes = [32, 128], strides = [1, 1]} : vector<64x128xf32> to vector<32x128xf32>
    %81 = vector.extract_strided_slice %79 {offsets = [32, 0], sizes = [32, 128], strides = [1, 1]} : vector<64x128xf32> to vector<32x128xf32>
    %cst_40 = arith.constant 5.000000e-01 : f32
    %82 = vector.broadcast %cst_40 : f32 to vector<32x128xf32>
    %83 = arith.mulf %82, %80 : vector<32x128xf32>
    %84 = math.tanh %83 : vector<32x128xf32>
    %cst_41 = arith.constant 1.000000e+00 : f32
    %85 = vector.broadcast %cst_41 : f32 to vector<32x128xf32>
    %86 = arith.addf %85, %84 : vector<32x128xf32>
    %cst_42 = arith.constant 5.000000e-01 : f32
    %87 = vector.broadcast %cst_42 : f32 to vector<32x128xf32>
    %88 = arith.mulf %87, %86 : vector<32x128xf32>
    %89 = math.tanh %81 : vector<32x128xf32>
    %90 = arith.mulf %88, %89 : vector<32x128xf32>
    %91 = arith.truncf %90 : vector<32x128xf32> to vector<32x128xbf16>
    %cst_43 = arith.constant dense<0.000000e+00> : vector<32x128xf32>
    %92 = tpu.matmul %71, %91, %cst_43 {dimension_numbers = #tpu.dot_dimension_numbers<[1], [0], [0], [1], [0, 0, 1, 1], [], []>} : vector<32x32xbf16>, vector<32x128xbf16>, vector<32x128xf32> -> vector<32x128xf32>
    %93 = vector.broadcast %72 : vector<32x1xf32> to vector<32x128xf32>
    %94 = arith.addf %92, %93 : vector<32x128xf32>
    %95 = arith.addf %68, %94 : vector<32x128xf32>
    %96 = arith.mulf %95, %5 : vector<32x128xf32>
    %c0_44 = arith.constant 0 : index
    %c0_45 = arith.constant 0 : index
    %c0_46 = arith.constant 0 : index
    %97 = vector.load %arg15[%c0_44, %c0_45, %c0_46] : memref<1x32x128xf32, #tpu.memory_space<vmem>>, vector<1x32x128xf32>
    %98 = vector.shape_cast %97 : vector<1x32x128xf32> to vector<32x128xf32>
    %99 = vector.shape_cast %96 : vector<32x128xf32> to vector<1x32x128xf32>
    tpu.vector_store %arg15[%c0_44, %c0_45, %c0_46], %99 {strides = array<i32>} : memref<1x32x128xf32, #tpu.memory_space<vmem>>, vector<1x32x128xf32>,
    return
  }
  func.func @transform_0(%arg0: i32) -> (i32, i32, i32) {
    %c0_i32 = arith.constant 0 : i32
    %c0_i32_0 = arith.constant 0 : i32
    %c0_i32_1 = arith.constant 0 : i32
    return %arg0, %c0_i32, %c0_i32_0 : i32, i32, i32
  }
  func.func @transform_1(%arg0: i32) -> (i32, i32, i32) {
    %c0_i32 = arith.constant 0 : i32
    %c0_i32_0 = arith.constant 0 : i32
    %c0_i32_1 = arith.constant 0 : i32
    return %arg0, %c0_i32, %c0_i32_0 : i32, i32, i32
  }
  func.func @transform_2(%arg0: i32) -> (i32, i32) {
    %c0_i32 = arith.constant 0 : i32
    %c0_i32_0 = arith.constant 0 : i32
    %c0_i32_1 = arith.constant 0 : i32
    return %c0_i32, %c0_i32_0 : i32, i32
  }
  func.func @transform_3(%arg0: i32) -> (i32, i32) {
    %c0_i32 = arith.constant 0 : i32
    %c0_i32_0 = arith.constant 0 : i32
    %c0_i32_1 = arith.constant 0 : i32
    return %c0_i32, %c0_i32_0 : i32, i32
  }
  func.func @transform_4(%arg0: i32) -> (i32, i32) {
    %c0_i32 = arith.constant 0 : i32
    %c0_i32_0 = arith.constant 0 : i32
    %c0_i32_1 = arith.constant 0 : i32
    return %c0_i32, %c0_i32_0 : i32, i32
  }
  func.func @transform_5(%arg0: i32) -> (i32, i32) {
    %c0_i32 = arith.constant 0 : i32
    %c0_i32_0 = arith.constant 0 : i32
    %c0_i32_1 = arith.constant 0 : i32
    return %c0_i32, %c0_i32_0 : i32, i32
  }
  func.func @transform_6(%arg0: i32) -> (i32, i32) {
    %c0_i32 = arith.constant 0 : i32
    %c0_i32_0 = arith.constant 0 : i32
    %c0_i32_1 = arith.constant 0 : i32
    return %c0_i32, %c0_i32_0 : i32, i32
  }
  func.func @transform_7(%arg0: i32) -> (i32, i32) {
    %c0_i32 = arith.constant 0 : i32
    %c0_i32_0 = arith.constant 0 : i32
    %c0_i32_1 = arith.constant 0 : i32
    return %c0_i32, %c0_i32_0 : i32, i32
  }
  func.func @transform_8(%arg0: i32) -> (i32, i32) {
    %c0_i32 = arith.constant 0 : i32
    %c0_i32_0 = arith.constant 0 : i32
    %c0_i32_1 = arith.constant 0 : i32
    return %c0_i32, %c0_i32_0 : i32, i32
  }
  func.func @transform_9(%arg0: i32) -> (i32, i32) {
    %c0_i32 = arith.constant 0 : i32
    %c0_i32_0 = arith.constant 0 : i32
    %c0_i32_1 = arith.constant 0 : i32
    return %c0_i32, %c0_i32_0 : i32, i32
  }
  func.func @transform_10(%arg0: i32) -> (i32, i32) {
    %c0_i32 = arith.constant 0 : i32
    %c0_i32_0 = arith.constant 0 : i32
    %c0_i32_1 = arith.constant 0 : i32
    return %c0_i32, %c0_i32_0 : i32, i32
  }
  func.func @transform_11(%arg0: i32) -> (i32, i32) {
    %c0_i32 = arith.constant 0 : i32
    %c0_i32_0 = arith.constant 0 : i32
    %c0_i32_1 = arith.constant 0 : i32
    return %c0_i32, %c0_i32_0 : i32, i32
  }
  func.func @transform_12(%arg0: i32) -> (i32, i32) {
    %c0_i32 = arith.constant 0 : i32
    %c0_i32_0 = arith.constant 0 : i32
    %c0_i32_1 = arith.constant 0 : i32
    return %c0_i32, %c0_i32_0 : i32, i32
  }
  func.func @transform_13(%arg0: i32) -> (i32, i32) {
    %c0_i32 = arith.constant 0 : i32
    %c0_i32_0 = arith.constant 0 : i32
    %c0_i32_1 = arith.constant 0 : i32
    return %c0_i32, %c0_i32_0 : i32, i32
  }
  func.func @transform_14(%arg0: i32) -> (i32, i32, i32) {
    %c0_i32 = arith.constant 0 : i32
    %c0_i32_0 = arith.constant 0 : i32
    %c0_i32_1 = arith.constant 0 : i32
    return %arg0, %c0_i32, %c0_i32_0 : i32, i32, i32
  }
}

module attributes {stable_mosaic.version = 11 : i64} {
  func.func @kernel(%arg0: i32, %arg1: memref<1x32x128xf32, #tpu.memory_space<vmem>>, %arg2: memref<1x1x128xf32, #tpu.memory_space<vmem>>, %arg3: memref<64x96xbf16, #tpu.memory_space<vmem>>, %arg4: memref<64x1xf32, #tpu.memory_space<vmem>>, %arg5: memref<64x32xbf16, #tpu.memory_space<vmem>>, %arg6: memref<64x1xf32, #tpu.memory_space<vmem>>, %arg7: memref<64x96xbf16, #tpu.memory_space<vmem>>, %arg8: memref<64x1xf32, #tpu.memory_space<vmem>>, %arg9: memref<64x32xbf16, #tpu.memory_space<vmem>>, %arg10: memref<64x1xf32, #tpu.memory_space<vmem>>, %arg11: memref<64x96xbf16, #tpu.memory_space<vmem>>, %arg12: memref<64x1xf32, #tpu.memory_space<vmem>>, %arg13: memref<32x32xbf16, #tpu.memory_space<vmem>>, %arg14: memref<32x1xf32, #tpu.memory_space<vmem>>, %arg15: memref<1x32x128xf32, #tpu.memory_space<vmem>>) attributes {dimension_semantics = [#tpu.dimension_semantics<parallel>], iteration_bounds = array<i64: 2>, scalar_prefetch = 0 : i64, scratch_operands = 0 : i64, tpu.core_type = #tpu.core_type<tc>, window_params = [{transform_indices = @transform_0, window_bounds = array<i64: 1, 32, 128>}, {transform_indices = @transform_1, window_bounds = array<i64: 1, 1, 128>}, {pipeline_mode = #tpu.pipeline_mode<synchronous>, transform_indices = @transform_2, window_bounds = array<i64: 64, 96>}, {pipeline_mode = #tpu.pipeline_mode<synchronous>, transform_indices = @transform_3, window_bounds = array<i64: 64, 1>}, {pipeline_mode = #tpu.pipeline_mode<synchronous>, transform_indices = @transform_4, window_bounds = array<i64: 64, 32>}, {pipeline_mode = #tpu.pipeline_mode<synchronous>, transform_indices = @transform_5, window_bounds = array<i64: 64, 1>}, {pipeline_mode = #tpu.pipeline_mode<synchronous>, transform_indices = @transform_6, window_bounds = array<i64: 64, 96>}, {pipeline_mode = #tpu.pipeline_mode<synchronous>, transform_indices = @transform_7, window_bounds = array<i64: 64, 1>}, {pipeline_mode = #tpu.pipeline_mode<synchronous>, transform_indices = @transform_8, window_bounds = array<i64: 64, 32>}, {pipeline_mode = #tpu.pipeline_mode<synchronous>, transform_indices = @transform_9, window_bounds = array<i64: 64, 1>}, {pipeline_mode = #tpu.pipeline_mode<synchronous>, transform_indices = @transform_10, window_bounds = array<i64: 64, 96>}, {pipeline_mode = #tpu.pipeline_mode<synchronous>, transform_indices = @transform_11, window_bounds = array<i64: 64, 1>}, {pipeline_mode = #tpu.pipeline_mode<synchronous>, transform_indices = @transform_12, window_bounds = array<i64: 32, 32>}, {pipeline_mode = #tpu.pipeline_mode<synchronous>, transform_indices = @transform_13, window_bounds = array<i64: 32, 1>}, {transform_indices = @transform_14, window_bounds = array<i64: 1, 32, 128>}]} {
    %c0 = arith.constant 0 : index
    %c0_0 = arith.constant 0 : index
    %c0_1 = arith.constant 0 : index
    %0 = vector.load %arg1[%c0, %c0_0, %c0_1] : memref<1x32x128xf32, #tpu.memory_space<vmem>>, vector<1x32x128xf32>
    %1 = vector.shape_cast %0 : vector<1x32x128xf32> to vector<32x128xf32>
    %c0_2 = arith.constant 0 : index
    %c0_3 = arith.constant 0 : index
    %c0_4 = arith.constant 0 : index
    %2 = vector.load %arg2[%c0_2, %c0_3, %c0_4] : memref<1x1x128xf32, #tpu.memory_space<vmem>>, vector<1x1x128xf32>
    %3 = vector.shape_cast %2 : vector<1x1x128xf32> to vector<1x128xf32>
    %4 = vector.shape_cast %3 : vector<1x128xf32> to vector<1x128xf32>
    %5 = vector.broadcast %4 : vector<1x128xf32> to vector<32x128xf32>
    %cst = arith.constant 0.000000e+00 : f32
    %6 = vector.broadcast %cst : f32 to vector<32x128xf32>
    %c0_5 = arith.constant 0 : index
    %c0_6 = arith.constant 0 : index
    %7 = vector.load %arg3[%c0_5, %c0_6] : memref<64x96xbf16, #tpu.memory_space<vmem>>, vector<64x96xbf16>
    %c0_7 = arith.constant 0 : index
    %c0_8 = arith.constant 0 : index
    %8 = vector.load %arg4[%c0_7, %c0_8] : memref<64x1xf32, #tpu.memory_space<vmem>>, vector<64x1xf32>
    %c0_9 = arith.constant 0 : index
    %c0_10 = arith.constant 0 : index
    %9 = vector.load %arg5[%c0_9, %c0_10] : memref<64x32xbf16, #tpu.memory_space<vmem>>, vector<64x32xbf16>
    %c0_11 = arith.constant 0 : index
    %c0_12 = arith.constant 0 : index
    %10 = vector.load %arg6[%c0_11, %c0_12] : memref<64x1xf32, #tpu.memory_space<vmem>>, vector<64x1xf32>
    %c1_i32 = arith.constant 1 : i32
    %11 = tpu.dynamic_rotate %1 by %c1_i32 dim 1 : vector<32x128xf32>, i32 -> vector<32x128xf32>
    %c127_i32 = arith.constant 127 : i32
    %12 = tpu.dynamic_rotate %1 by %c127_i32 dim 1 : vector<32x128xf32>, i32 -> vector<32x128xf32>
    %13 = tpu.concatenate %11, %1, %12 in 0 : vector<32x128xf32>, vector<32x128xf32>, vector<32x128xf32> -> vector<96x128xf32>
    %14 = arith.truncf %13 : vector<96x128xf32> to vector<96x128xbf16>
    %cst_13 = arith.constant dense<0.000000e+00> : vector<64x128xf32>
    %15 = tpu.matmul %7, %14, %cst_13 {dimension_numbers = #tpu.dot_dimension_numbers<[1], [0], [0], [1], [0, 0, 1, 1], [], []>} : vector<64x96xbf16>, vector<96x128xbf16>, vector<64x128xf32> -> vector<64x128xf32>
    %16 = vector.broadcast %8 : vector<64x1xf32> to vector<64x128xf32>
    %17 = arith.addf %15, %16 : vector<64x128xf32>
    %18 = vector.extract_strided_slice %17 {offsets = [0, 0], sizes = [32, 128], strides = [1, 1]} : vector<64x128xf32> to vector<32x128xf32>
    %19 = vector.extract_strided_slice %17 {offsets = [32, 0], sizes = [32, 128], strides = [1, 1]} : vector<64x128xf32> to vector<32x128xf32>
    %cst_14 = arith.constant 5.000000e-01 : f32
    %20 = vector.broadcast %cst_14 : f32 to vector<32x128xf32>
    %21 = arith.mulf %20, %18 : vector<32x128xf32>
    %22 = math.tanh %21 : vector<32x128xf32>
    %cst_15 = arith.constant 1.000000e+00 : f32
    %23 = vector.broadcast %cst_15 : f32 to vector<32x128xf32>
    %24 = arith.addf %23, %22 : vector<32x128xf32>
    %cst_16 = arith.constant 5.000000e-01 : f32
    %25 = vector.broadcast %cst_16 : f32 to vector<32x128xf32>
    %26 = arith.mulf %25, %24 : vector<32x128xf32>
    %27 = math.tanh %19 : vector<32x128xf32>
    %28 = arith.mulf %26, %27 : vector<32x128xf32>
    %29 = arith.truncf %28 : vector<32x128xf32> to vector<32x128xbf16>
    %cst_17 = arith.constant dense<0.000000e+00> : vector<64x128xf32>
    %30 = tpu.matmul %9, %29, %cst_17 {dimension_numbers = #tpu.dot_dimension_numbers<[1], [0], [0], [1], [0, 0, 1, 1], [], []>} : vector<64x32xbf16>, vector<32x128xbf16>, vector<64x128xf32> -> vector<64x128xf32>
    %31 = vector.broadcast %10 : vector<64x1xf32> to vector<64x128xf32>
    %32 = arith.addf %30, %31 : vector<64x128xf32>
    %33 = vector.extract_strided_slice %32 {offsets = [0, 0], sizes = [32, 128], strides = [1, 1]} : vector<64x128xf32> to vector<32x128xf32>
    %34 = arith.addf %1, %33 : vector<32x128xf32>
    %35 = arith.mulf %34, %5 : vector<32x128xf32>
    %36 = vector.extract_strided_slice %32 {offsets = [32, 0], sizes = [32, 128], strides = [1, 1]} : vector<64x128xf32> to vector<32x128xf32>
    %37 = arith.addf %6, %36 : vector<32x128xf32>
    %c0_18 = arith.constant 0 : index
    %c0_19 = arith.constant 0 : index
    %38 = vector.load %arg7[%c0_18, %c0_19] : memref<64x96xbf16, #tpu.memory_space<vmem>>, vector<64x96xbf16>
    %c0_20 = arith.constant 0 : index
    %c0_21 = arith.constant 0 : index
    %39 = vector.load %arg8[%c0_20, %c0_21] : memref<64x1xf32, #tpu.memory_space<vmem>>, vector<64x1xf32>
    %c0_22 = arith.constant 0 : index
    %c0_23 = arith.constant 0 : index
    %40 = vector.load %arg9[%c0_22, %c0_23] : memref<64x32xbf16, #tpu.memory_space<vmem>>, vector<64x32xbf16>
    %c0_24 = arith.constant 0 : index
    %c0_25 = arith.constant 0 : index
    %41 = vector.load %arg10[%c0_24, %c0_25] : memref<64x1xf32, #tpu.memory_space<vmem>>, vector<64x1xf32>
    %c2_i32 = arith.constant 2 : i32
    %42 = tpu.dynamic_rotate %35 by %c2_i32 dim 1 : vector<32x128xf32>, i32 -> vector<32x128xf32>
    %c126_i32 = arith.constant 126 : i32
    %43 = tpu.dynamic_rotate %35 by %c126_i32 dim 1 : vector<32x128xf32>, i32 -> vector<32x128xf32>
    %44 = tpu.concatenate %42, %35, %43 in 0 : vector<32x128xf32>, vector<32x128xf32>, vector<32x128xf32> -> vector<96x128xf32>
    %45 = arith.truncf %44 : vector<96x128xf32> to vector<96x128xbf16>
    %cst_26 = arith.constant dense<0.000000e+00> : vector<64x128xf32>
    %46 = tpu.matmul %38, %45, %cst_26 {dimension_numbers = #tpu.dot_dimension_numbers<[1], [0], [0], [1], [0, 0, 1, 1], [], []>} : vector<64x96xbf16>, vector<96x128xbf16>, vector<64x128xf32> -> vector<64x128xf32>
    %47 = vector.broadcast %39 : vector<64x1xf32> to vector<64x128xf32>
    %48 = arith.addf %46, %47 : vector<64x128xf32>
    %49 = vector.extract_strided_slice %48 {offsets = [0, 0], sizes = [32, 128], strides = [1, 1]} : vector<64x128xf32> to vector<32x128xf32>
    %50 = vector.extract_strided_slice %48 {offsets = [32, 0], sizes = [32, 128], strides = [1, 1]} : vector<64x128xf32> to vector<32x128xf32>
    %cst_27 = arith.constant 5.000000e-01 : f32
    %51 = vector.broadcast %cst_27 : f32 to vector<32x128xf32>
    %52 = arith.mulf %51, %49 : vector<32x128xf32>
    %53 = math.tanh %52 : vector<32x128xf32>
    %cst_28 = arith.constant 1.000000e+00 : f32
    %54 = vector.broadcast %cst_28 : f32 to vector<32x128xf32>
    %55 = arith.addf %54, %53 : vector<32x128xf32>
    %cst_29 = arith.constant 5.000000e-01 : f32
    %56 = vector.broadcast %cst_29 : f32 to vector<32x128xf32>
    %57 = arith.mulf %56, %55 : vector<32x128xf32>
    %58 = math.tanh %50 : vector<32x128xf32>
    %59 = arith.mulf %57, %58 : vector<32x128xf32>
    %60 = arith.truncf %59 : vector<32x128xf32> to vector<32x128xbf16>
    %cst_30 = arith.constant dense<0.000000e+00> : vector<64x128xf32>
    %61 = tpu.matmul %40, %60, %cst_30 {dimension_numbers = #tpu.dot_dimension_numbers<[1], [0], [0], [1], [0, 0, 1, 1], [], []>} : vector<64x32xbf16>, vector<32x128xbf16>, vector<64x128xf32> -> vector<64x128xf32>
    %62 = vector.broadcast %41 : vector<64x1xf32> to vector<64x128xf32>
    %63 = arith.addf %61, %62 : vector<64x128xf32>
    %64 = vector.extract_strided_slice %63 {offsets = [0, 0], sizes = [32, 128], strides = [1, 1]} : vector<64x128xf32> to vector<32x128xf32>
    %65 = arith.addf %35, %64 : vector<32x128xf32>
    %66 = arith.mulf %65, %5 : vector<32x128xf32>
    %67 = vector.extract_strided_slice %63 {offsets = [32, 0], sizes = [32, 128], strides = [1, 1]} : vector<64x128xf32> to vector<32x128xf32>
    %68 = arith.addf %37, %67 : vector<32x128xf32>
    %c0_31 = arith.constant 0 : index
    %c0_32 = arith.constant 0 : index
    %69 = vector.load %arg11[%c0_31, %c0_32] : memref<64x96xbf16, #tpu.memory_space<vmem>>, vector<64x96xbf16>
    %c0_33 = arith.constant 0 : index
    %c0_34 = arith.constant 0 : index
    %70 = vector.load %arg12[%c0_33, %c0_34] : memref<64x1xf32, #tpu.memory_space<vmem>>, vector<64x1xf32>
    %c0_35 = arith.constant 0 : index
    %c0_36 = arith.constant 0 : index
    %71 = vector.load %arg13[%c0_35, %c0_36] : memref<32x32xbf16, #tpu.memory_space<vmem>>, vector<32x32xbf16>
    %c0_37 = arith.constant 0 : index
    %c0_38 = arith.constant 0 : index
    %72 = vector.load %arg14[%c0_37, %c0_38] : memref<32x1xf32, #tpu.memory_space<vmem>>, vector<32x1xf32>
    %c4_i32 = arith.constant 4 : i32
    %73 = tpu.dynamic_rotate %66 by %c4_i32 dim 1 : vector<32x128xf32>, i32 -> vector<32x128xf32>
    %c124_i32 = arith.constant 124 : i32
    %74 = tpu.dynamic_rotate %66 by %c124_i32 dim 1 : vector<32x128xf32>, i32 -> vector<32x128xf32>
    %75 = tpu.concatenate %73, %66, %74 in 0 : vector<32x128xf32>, vector<32x128xf32>, vector<32x128xf32> -> vector<96x128xf32>
    %76 = arith.truncf %75 : vector<96x128xf32> to vector<96x128xbf16>
    %cst_39 = arith.constant dense<0.000000e+00> : vector<64x128xf32>
    %77 = tpu.matmul %69, %76, %cst_39 {dimension_numbers = #tpu.dot_dimension_numbers<[1], [0], [0], [1], [0, 0, 1, 1], [], []>} : vector<64x96xbf16>, vector<96x128xbf16>, vector<64x128xf32> -> vector<64x128xf32>
    %78 = vector.broadcast %70 : vector<64x1xf32> to vector<64x128xf32>
    %79 = arith.addf %77, %78 : vector<64x128xf32>
    %80 = vector.extract_strided_slice %79 {offsets = [0, 0], sizes = [32, 128], strides = [1, 1]} : vector<64x128xf32> to vector<32x128xf32>
    %81 = vector.extract_strided_slice %79 {offsets = [32, 0], sizes = [32, 128], strides = [1, 1]} : vector<64x128xf32> to vector<32x128xf32>
    %cst_40 = arith.constant 5.000000e-01 : f32
    %82 = vector.broadcast %cst_40 : f32 to vector<32x128xf32>
    %83 = arith.mulf %82, %80 : vector<32x128xf32>
    %84 = math.tanh %83 : vector<32x128xf32>
    %cst_41 = arith.constant 1.000000e+00 : f32
    %85 = vector.broadcast %cst_41 : f32 to vector<32x128xf32>
    %86 = arith.addf %85, %84 : vector<32x128xf32>
    %cst_42 = arith.constant 5.000000e-01 : f32
    %87 = vector.broadcast %cst_42 : f32 to vector<32x128xf32>
    %88 = arith.mulf %87, %86 : vector<32x128xf32>
    %89 = math.tanh %81 : vector<32x128xf32>
    %90 = arith.mulf %88, %89 : vector<32x128xf32>
    %91 = arith.truncf %90 : vector<32x128xf32> to vector<32x128xbf16>
    %cst_43 = arith.constant dense<0.000000e+00> : vector<32x128xf32>
    %92 = tpu.matmul %71, %91, %cst_43 {dimension_numbers = #tpu.dot_dimension_numbers<[1], [0], [0], [1], [0, 0, 1, 1], [], []>} : vector<32x32xbf16>, vector<32x128xbf16>, vector<32x128xf32> -> vector<32x128xf32>
    %93 = vector.broadcast %72 : vector<32x1xf32> to vector<32x128xf32>
    %94 = arith.addf %92, %93 : vector<32x128xf32>
    %95 = arith.addf %68, %94 : vector<32x128xf32>
    %96 = arith.mulf %95, %5 : vector<32x128xf32>
    %c0_44 = arith.constant 0 : index
    %c0_45 = arith.constant 0 : index
    %c0_46 = arith.constant 0 : index
    %97 = vector.load %arg15[%c0_44, %c0_45, %c0_46] : memref<1x32x128xf32, #tpu.memory_space<vmem>>, vector<1x32x128xf32>
    %98 = vector.shape_cast %97 : vector<1x32x128xf32> to vector<32x128xf32>
    %99 = vector.shape_cast %96 : vector<32x128xf32> to vector<1x32x128xf32>
    tpu.vector_store %arg15[%c0_44, %c0_45, %c0_46], %99 {strides = array<i32>} : memref<1x32x128xf32, #tpu.memory_space<vmem>>, vector<1x32x128xf32>,
    return
  }
  func.func @transform_0(%arg0: i32) -> (i32, i32, i32) {
    %c0_i32 = arith.constant 0 : i32
    %c0_i32_0 = arith.constant 0 : i32
    %c0_i32_1 = arith.constant 0 : i32
    return %arg0, %c0_i32, %c0_i32_0 : i32, i32, i32
  }
  func.func @transform_1(%arg0: i32) -> (i32, i32, i32) {
    %c0_i32 = arith.constant 0 : i32
    %c0_i32_0 = arith.constant 0 : i32
    %c0_i32_1 = arith.constant 0 : i32
    return %arg0, %c0_i32, %c0_i32_0 : i32, i32, i32
  }
  func.func @transform_2(%arg0: i32) -> (i32, i32) {
    %c0_i32 = arith.constant 0 : i32
    %c0_i32_0 = arith.constant 0 : i32
    %c0_i32_1 = arith.constant 0 : i32
    return %c0_i32, %c0_i32_0 : i32, i32
  }
  func.func @transform_3(%arg0: i32) -> (i32, i32) {
    %c0_i32 = arith.constant 0 : i32
    %c0_i32_0 = arith.constant 0 : i32
    %c0_i32_1 = arith.constant 0 : i32
    return %c0_i32, %c0_i32_0 : i32, i32
  }
  func.func @transform_4(%arg0: i32) -> (i32, i32) {
    %c0_i32 = arith.constant 0 : i32
    %c0_i32_0 = arith.constant 0 : i32
    %c0_i32_1 = arith.constant 0 : i32
    return %c0_i32, %c0_i32_0 : i32, i32
  }
  func.func @transform_5(%arg0: i32) -> (i32, i32) {
    %c0_i32 = arith.constant 0 : i32
    %c0_i32_0 = arith.constant 0 : i32
    %c0_i32_1 = arith.constant 0 : i32
    return %c0_i32, %c0_i32_0 : i32, i32
  }
  func.func @transform_6(%arg0: i32) -> (i32, i32) {
    %c0_i32 = arith.constant 0 : i32
    %c0_i32_0 = arith.constant 0 : i32
    %c0_i32_1 = arith.constant 0 : i32
    return %c0_i32, %c0_i32_0 : i32, i32
  }
  func.func @transform_7(%arg0: i32) -> (i32, i32) {
    %c0_i32 = arith.constant 0 : i32
    %c0_i32_0 = arith.constant 0 : i32
    %c0_i32_1 = arith.constant 0 : i32
    return %c0_i32, %c0_i32_0 : i32, i32
  }
  func.func @transform_8(%arg0: i32) -> (i32, i32) {
    %c0_i32 = arith.constant 0 : i32
    %c0_i32_0 = arith.constant 0 : i32
    %c0_i32_1 = arith.constant 0 : i32
    return %c0_i32, %c0_i32_0 : i32, i32
  }
  func.func @transform_9(%arg0: i32) -> (i32, i32) {
    %c0_i32 = arith.constant 0 : i32
    %c0_i32_0 = arith.constant 0 : i32
    %c0_i32_1 = arith.constant 0 : i32
    return %c0_i32, %c0_i32_0 : i32, i32
  }
  func.func @transform_10(%arg0: i32) -> (i32, i32) {
    %c0_i32 = arith.constant 0 : i32
    %c0_i32_0 = arith.constant 0 : i32
    %c0_i32_1 = arith.constant 0 : i32
    return %c0_i32, %c0_i32_0 : i32, i32
  }
  func.func @transform_11(%arg0: i32) -> (i32, i32) {
    %c0_i32 = arith.constant 0 : i32
    %c0_i32_0 = arith.constant 0 : i32
    %c0_i32_1 = arith.constant 0 : i32
    return %c0_i32, %c0_i32_0 : i32, i32
  }
  func.func @transform_12(%arg0: i32) -> (i32, i32) {
    %c0_i32 = arith.constant 0 : i32
    %c0_i32_0 = arith.constant 0 : i32
    %c0_i32_1 = arith.constant 0 : i32
    return %c0_i32, %c0_i32_0 : i32, i32
  }
  func.func @transform_13(%arg0: i32) -> (i32, i32) {
    %c0_i32 = arith.constant 0 : i32
    %c0_i32_0 = arith.constant 0 : i32
    %c0_i32_1 = arith.constant 0 : i32
    return %c0_i32, %c0_i32_0 : i32, i32
  }
  func.func @transform_14(%arg0: i32) -> (i32, i32, i32) {
    %c0_i32 = arith.constant 0 : i32
    %c0_i32_0 = arith.constant 0 : i32
    %c0_i32_1 = arith.constant 0 : i32
    return %arg0, %c0_i32, %c0_i32_0 : i32, i32, i32
  }
}

module attributes {stable_mosaic.version = 11 : i64} {
  func.func @kernel(%arg0: i32, %arg1: memref<1x32x128xf32, #tpu.memory_space<vmem>>, %arg2: memref<1x1x128xf32, #tpu.memory_space<vmem>>, %arg3: memref<64x96xbf16, #tpu.memory_space<vmem>>, %arg4: memref<64x1xf32, #tpu.memory_space<vmem>>, %arg5: memref<64x32xbf16, #tpu.memory_space<vmem>>, %arg6: memref<64x1xf32, #tpu.memory_space<vmem>>, %arg7: memref<64x96xbf16, #tpu.memory_space<vmem>>, %arg8: memref<64x1xf32, #tpu.memory_space<vmem>>, %arg9: memref<64x32xbf16, #tpu.memory_space<vmem>>, %arg10: memref<64x1xf32, #tpu.memory_space<vmem>>, %arg11: memref<64x96xbf16, #tpu.memory_space<vmem>>, %arg12: memref<64x1xf32, #tpu.memory_space<vmem>>, %arg13: memref<32x32xbf16, #tpu.memory_space<vmem>>, %arg14: memref<32x1xf32, #tpu.memory_space<vmem>>, %arg15: memref<1x32x128xf32, #tpu.memory_space<vmem>>) attributes {dimension_semantics = [#tpu.dimension_semantics<parallel>], iteration_bounds = array<i64: 2>, scalar_prefetch = 0 : i64, scratch_operands = 0 : i64, tpu.core_type = #tpu.core_type<tc>, window_params = [{transform_indices = @transform_0, window_bounds = array<i64: 1, 32, 128>}, {transform_indices = @transform_1, window_bounds = array<i64: 1, 1, 128>}, {pipeline_mode = #tpu.pipeline_mode<synchronous>, transform_indices = @transform_2, window_bounds = array<i64: 64, 96>}, {pipeline_mode = #tpu.pipeline_mode<synchronous>, transform_indices = @transform_3, window_bounds = array<i64: 64, 1>}, {pipeline_mode = #tpu.pipeline_mode<synchronous>, transform_indices = @transform_4, window_bounds = array<i64: 64, 32>}, {pipeline_mode = #tpu.pipeline_mode<synchronous>, transform_indices = @transform_5, window_bounds = array<i64: 64, 1>}, {pipeline_mode = #tpu.pipeline_mode<synchronous>, transform_indices = @transform_6, window_bounds = array<i64: 64, 96>}, {pipeline_mode = #tpu.pipeline_mode<synchronous>, transform_indices = @transform_7, window_bounds = array<i64: 64, 1>}, {pipeline_mode = #tpu.pipeline_mode<synchronous>, transform_indices = @transform_8, window_bounds = array<i64: 64, 32>}, {pipeline_mode = #tpu.pipeline_mode<synchronous>, transform_indices = @transform_9, window_bounds = array<i64: 64, 1>}, {pipeline_mode = #tpu.pipeline_mode<synchronous>, transform_indices = @transform_10, window_bounds = array<i64: 64, 96>}, {pipeline_mode = #tpu.pipeline_mode<synchronous>, transform_indices = @transform_11, window_bounds = array<i64: 64, 1>}, {pipeline_mode = #tpu.pipeline_mode<synchronous>, transform_indices = @transform_12, window_bounds = array<i64: 32, 32>}, {pipeline_mode = #tpu.pipeline_mode<synchronous>, transform_indices = @transform_13, window_bounds = array<i64: 32, 1>}, {transform_indices = @transform_14, window_bounds = array<i64: 1, 32, 128>}]} {
    %c0 = arith.constant 0 : index
    %c0_0 = arith.constant 0 : index
    %c0_1 = arith.constant 0 : index
    %0 = vector.load %arg1[%c0, %c0_0, %c0_1] : memref<1x32x128xf32, #tpu.memory_space<vmem>>, vector<1x32x128xf32>
    %1 = vector.shape_cast %0 : vector<1x32x128xf32> to vector<32x128xf32>
    %c0_2 = arith.constant 0 : index
    %c0_3 = arith.constant 0 : index
    %c0_4 = arith.constant 0 : index
    %2 = vector.load %arg2[%c0_2, %c0_3, %c0_4] : memref<1x1x128xf32, #tpu.memory_space<vmem>>, vector<1x1x128xf32>
    %3 = vector.shape_cast %2 : vector<1x1x128xf32> to vector<1x128xf32>
    %4 = vector.shape_cast %3 : vector<1x128xf32> to vector<1x128xf32>
    %5 = vector.broadcast %4 : vector<1x128xf32> to vector<32x128xf32>
    %cst = arith.constant 0.000000e+00 : f32
    %6 = vector.broadcast %cst : f32 to vector<32x128xf32>
    %c0_5 = arith.constant 0 : index
    %c0_6 = arith.constant 0 : index
    %7 = vector.load %arg3[%c0_5, %c0_6] : memref<64x96xbf16, #tpu.memory_space<vmem>>, vector<64x96xbf16>
    %c0_7 = arith.constant 0 : index
    %c0_8 = arith.constant 0 : index
    %8 = vector.load %arg4[%c0_7, %c0_8] : memref<64x1xf32, #tpu.memory_space<vmem>>, vector<64x1xf32>
    %c0_9 = arith.constant 0 : index
    %c0_10 = arith.constant 0 : index
    %9 = vector.load %arg5[%c0_9, %c0_10] : memref<64x32xbf16, #tpu.memory_space<vmem>>, vector<64x32xbf16>
    %c0_11 = arith.constant 0 : index
    %c0_12 = arith.constant 0 : index
    %10 = vector.load %arg6[%c0_11, %c0_12] : memref<64x1xf32, #tpu.memory_space<vmem>>, vector<64x1xf32>
    %c0_i32 = arith.constant 0 : i32
    %11 = arith.sitofp %c0_i32 : i32 to f32
    %12 = vector.broadcast %11 : f32 to vector<32x1xf32>
    %13 = tpu.concatenate %12, %1 in 1 : vector<32x1xf32>, vector<32x128xf32> -> vector<32x129xf32>
    %14 = vector.broadcast %11 : f32 to vector<32x1xf32>
    %15 = tpu.concatenate %13, %14 in 1 : vector<32x129xf32>, vector<32x1xf32> -> vector<32x130xf32>
    %16 = vector.extract_strided_slice %15 {offsets = [0, 0], sizes = [32, 128], strides = [1, 1]} : vector<32x130xf32> to vector<32x128xf32>
    %17 = vector.extract_strided_slice %15 {offsets = [0, 1], sizes = [32, 128], strides = [1, 1]} : vector<32x130xf32> to vector<32x128xf32>
    %18 = vector.extract_strided_slice %15 {offsets = [0, 2], sizes = [32, 128], strides = [1, 1]} : vector<32x130xf32> to vector<32x128xf32>
    %19 = tpu.concatenate %16, %17, %18 in 0 : vector<32x128xf32>, vector<32x128xf32>, vector<32x128xf32> -> vector<96x128xf32>
    %20 = arith.truncf %19 : vector<96x128xf32> to vector<96x128xbf16>
    %cst_13 = arith.constant dense<0.000000e+00> : vector<64x128xf32>
    %21 = tpu.matmul %7, %20, %cst_13 {dimension_numbers = #tpu.dot_dimension_numbers<[1], [0], [0], [1], [0, 0, 1, 1], [], []>} : vector<64x96xbf16>, vector<96x128xbf16>, vector<64x128xf32> -> vector<64x128xf32>
    %22 = vector.broadcast %8 : vector<64x1xf32> to vector<64x128xf32>
    %23 = arith.addf %21, %22 : vector<64x128xf32>
    %24 = vector.extract_strided_slice %23 {offsets = [0, 0], sizes = [32, 128], strides = [1, 1]} : vector<64x128xf32> to vector<32x128xf32>
    %25 = vector.extract_strided_slice %23 {offsets = [32, 0], sizes = [32, 128], strides = [1, 1]} : vector<64x128xf32> to vector<32x128xf32>
    %cst_14 = arith.constant 5.000000e-01 : f32
    %26 = vector.broadcast %cst_14 : f32 to vector<32x128xf32>
    %27 = arith.mulf %26, %24 : vector<32x128xf32>
    %28 = math.tanh %27 : vector<32x128xf32>
    %cst_15 = arith.constant 1.000000e+00 : f32
    %29 = vector.broadcast %cst_15 : f32 to vector<32x128xf32>
    %30 = arith.addf %29, %28 : vector<32x128xf32>
    %cst_16 = arith.constant 5.000000e-01 : f32
    %31 = vector.broadcast %cst_16 : f32 to vector<32x128xf32>
    %32 = arith.mulf %31, %30 : vector<32x128xf32>
    %33 = math.tanh %25 : vector<32x128xf32>
    %34 = arith.mulf %32, %33 : vector<32x128xf32>
    %35 = arith.truncf %34 : vector<32x128xf32> to vector<32x128xbf16>
    %cst_17 = arith.constant dense<0.000000e+00> : vector<64x128xf32>
    %36 = tpu.matmul %9, %35, %cst_17 {dimension_numbers = #tpu.dot_dimension_numbers<[1], [0], [0], [1], [0, 0, 1, 1], [], []>} : vector<64x32xbf16>, vector<32x128xbf16>, vector<64x128xf32> -> vector<64x128xf32>
    %37 = vector.broadcast %10 : vector<64x1xf32> to vector<64x128xf32>
    %38 = arith.addf %36, %37 : vector<64x128xf32>
    %39 = vector.extract_strided_slice %38 {offsets = [0, 0], sizes = [32, 128], strides = [1, 1]} : vector<64x128xf32> to vector<32x128xf32>
    %40 = arith.addf %1, %39 : vector<32x128xf32>
    %41 = arith.mulf %40, %5 : vector<32x128xf32>
    %42 = vector.extract_strided_slice %38 {offsets = [32, 0], sizes = [32, 128], strides = [1, 1]} : vector<64x128xf32> to vector<32x128xf32>
    %43 = arith.addf %6, %42 : vector<32x128xf32>
    %c0_18 = arith.constant 0 : index
    %c0_19 = arith.constant 0 : index
    %44 = vector.load %arg7[%c0_18, %c0_19] : memref<64x96xbf16, #tpu.memory_space<vmem>>, vector<64x96xbf16>
    %c0_20 = arith.constant 0 : index
    %c0_21 = arith.constant 0 : index
    %45 = vector.load %arg8[%c0_20, %c0_21] : memref<64x1xf32, #tpu.memory_space<vmem>>, vector<64x1xf32>
    %c0_22 = arith.constant 0 : index
    %c0_23 = arith.constant 0 : index
    %46 = vector.load %arg9[%c0_22, %c0_23] : memref<64x32xbf16, #tpu.memory_space<vmem>>, vector<64x32xbf16>
    %c0_24 = arith.constant 0 : index
    %c0_25 = arith.constant 0 : index
    %47 = vector.load %arg10[%c0_24, %c0_25] : memref<64x1xf32, #tpu.memory_space<vmem>>, vector<64x1xf32>
    %c0_i32_26 = arith.constant 0 : i32
    %48 = arith.sitofp %c0_i32_26 : i32 to f32
    %49 = vector.broadcast %48 : f32 to vector<32x2xf32>
    %50 = tpu.concatenate %49, %41 in 1 : vector<32x2xf32>, vector<32x128xf32> -> vector<32x130xf32>
    %51 = vector.broadcast %48 : f32 to vector<32x2xf32>
    %52 = tpu.concatenate %50, %51 in 1 : vector<32x130xf32>, vector<32x2xf32> -> vector<32x132xf32>
    %53 = vector.extract_strided_slice %52 {offsets = [0, 0], sizes = [32, 128], strides = [1, 1]} : vector<32x132xf32> to vector<32x128xf32>
    %54 = vector.extract_strided_slice %52 {offsets = [0, 2], sizes = [32, 128], strides = [1, 1]} : vector<32x132xf32> to vector<32x128xf32>
    %55 = vector.extract_strided_slice %52 {offsets = [0, 4], sizes = [32, 128], strides = [1, 1]} : vector<32x132xf32> to vector<32x128xf32>
    %56 = tpu.concatenate %53, %54, %55 in 0 : vector<32x128xf32>, vector<32x128xf32>, vector<32x128xf32> -> vector<96x128xf32>
    %57 = arith.truncf %56 : vector<96x128xf32> to vector<96x128xbf16>
    %cst_27 = arith.constant dense<0.000000e+00> : vector<64x128xf32>
    %58 = tpu.matmul %44, %57, %cst_27 {dimension_numbers = #tpu.dot_dimension_numbers<[1], [0], [0], [1], [0, 0, 1, 1], [], []>} : vector<64x96xbf16>, vector<96x128xbf16>, vector<64x128xf32> -> vector<64x128xf32>
    %59 = vector.broadcast %45 : vector<64x1xf32> to vector<64x128xf32>
    %60 = arith.addf %58, %59 : vector<64x128xf32>
    %61 = vector.extract_strided_slice %60 {offsets = [0, 0], sizes = [32, 128], strides = [1, 1]} : vector<64x128xf32> to vector<32x128xf32>
    %62 = vector.extract_strided_slice %60 {offsets = [32, 0], sizes = [32, 128], strides = [1, 1]} : vector<64x128xf32> to vector<32x128xf32>
    %cst_28 = arith.constant 5.000000e-01 : f32
    %63 = vector.broadcast %cst_28 : f32 to vector<32x128xf32>
    %64 = arith.mulf %63, %61 : vector<32x128xf32>
    %65 = math.tanh %64 : vector<32x128xf32>
    %cst_29 = arith.constant 1.000000e+00 : f32
    %66 = vector.broadcast %cst_29 : f32 to vector<32x128xf32>
    %67 = arith.addf %66, %65 : vector<32x128xf32>
    %cst_30 = arith.constant 5.000000e-01 : f32
    %68 = vector.broadcast %cst_30 : f32 to vector<32x128xf32>
    %69 = arith.mulf %68, %67 : vector<32x128xf32>
    %70 = math.tanh %62 : vector<32x128xf32>
    %71 = arith.mulf %69, %70 : vector<32x128xf32>
    %72 = arith.truncf %71 : vector<32x128xf32> to vector<32x128xbf16>
    %cst_31 = arith.constant dense<0.000000e+00> : vector<64x128xf32>
    %73 = tpu.matmul %46, %72, %cst_31 {dimension_numbers = #tpu.dot_dimension_numbers<[1], [0], [0], [1], [0, 0, 1, 1], [], []>} : vector<64x32xbf16>, vector<32x128xbf16>, vector<64x128xf32> -> vector<64x128xf32>
    %74 = vector.broadcast %47 : vector<64x1xf32> to vector<64x128xf32>
    %75 = arith.addf %73, %74 : vector<64x128xf32>
    %76 = vector.extract_strided_slice %75 {offsets = [0, 0], sizes = [32, 128], strides = [1, 1]} : vector<64x128xf32> to vector<32x128xf32>
    %77 = arith.addf %41, %76 : vector<32x128xf32>
    %78 = arith.mulf %77, %5 : vector<32x128xf32>
    %79 = vector.extract_strided_slice %75 {offsets = [32, 0], sizes = [32, 128], strides = [1, 1]} : vector<64x128xf32> to vector<32x128xf32>
    %80 = arith.addf %43, %79 : vector<32x128xf32>
    %c0_32 = arith.constant 0 : index
    %c0_33 = arith.constant 0 : index
    %81 = vector.load %arg11[%c0_32, %c0_33] : memref<64x96xbf16, #tpu.memory_space<vmem>>, vector<64x96xbf16>
    %c0_34 = arith.constant 0 : index
    %c0_35 = arith.constant 0 : index
    %82 = vector.load %arg12[%c0_34, %c0_35] : memref<64x1xf32, #tpu.memory_space<vmem>>, vector<64x1xf32>
    %c0_36 = arith.constant 0 : index
    %c0_37 = arith.constant 0 : index
    %83 = vector.load %arg13[%c0_36, %c0_37] : memref<32x32xbf16, #tpu.memory_space<vmem>>, vector<32x32xbf16>
    %c0_38 = arith.constant 0 : index
    %c0_39 = arith.constant 0 : index
    %84 = vector.load %arg14[%c0_38, %c0_39] : memref<32x1xf32, #tpu.memory_space<vmem>>, vector<32x1xf32>
    %c0_i32_40 = arith.constant 0 : i32
    %85 = arith.sitofp %c0_i32_40 : i32 to f32
    %86 = vector.broadcast %85 : f32 to vector<32x4xf32>
    %87 = tpu.concatenate %86, %78 in 1 : vector<32x4xf32>, vector<32x128xf32> -> vector<32x132xf32>
    %88 = vector.broadcast %85 : f32 to vector<32x4xf32>
    %89 = tpu.concatenate %87, %88 in 1 : vector<32x132xf32>, vector<32x4xf32> -> vector<32x136xf32>
    %90 = vector.extract_strided_slice %89 {offsets = [0, 0], sizes = [32, 128], strides = [1, 1]} : vector<32x136xf32> to vector<32x128xf32>
    %91 = vector.extract_strided_slice %89 {offsets = [0, 4], sizes = [32, 128], strides = [1, 1]} : vector<32x136xf32> to vector<32x128xf32>
    %92 = vector.extract_strided_slice %89 {offsets = [0, 8], sizes = [32, 128], strides = [1, 1]} : vector<32x136xf32> to vector<32x128xf32>
    %93 = tpu.concatenate %90, %91, %92 in 0 : vector<32x128xf32>, vector<32x128xf32>, vector<32x128xf32> -> vector<96x128xf32>
    %94 = arith.truncf %93 : vector<96x128xf32> to vector<96x128xbf16>
    %cst_41 = arith.constant dense<0.000000e+00> : vector<64x128xf32>
    %95 = tpu.matmul %81, %94, %cst_41 {dimension_numbers = #tpu.dot_dimension_numbers<[1], [0], [0], [1], [0, 0, 1, 1], [], []>} : vector<64x96xbf16>, vector<96x128xbf16>, vector<64x128xf32> -> vector<64x128xf32>
    %96 = vector.broadcast %82 : vector<64x1xf32> to vector<64x128xf32>
    %97 = arith.addf %95, %96 : vector<64x128xf32>
    %98 = vector.extract_strided_slice %97 {offsets = [0, 0], sizes = [32, 128], strides = [1, 1]} : vector<64x128xf32> to vector<32x128xf32>
    %99 = vector.extract_strided_slice %97 {offsets = [32, 0], sizes = [32, 128], strides = [1, 1]} : vector<64x128xf32> to vector<32x128xf32>
    %cst_42 = arith.constant 5.000000e-01 : f32
    %100 = vector.broadcast %cst_42 : f32 to vector<32x128xf32>
    %101 = arith.mulf %100, %98 : vector<32x128xf32>
    %102 = math.tanh %101 : vector<32x128xf32>
    %cst_43 = arith.constant 1.000000e+00 : f32
    %103 = vector.broadcast %cst_43 : f32 to vector<32x128xf32>
    %104 = arith.addf %103, %102 : vector<32x128xf32>
    %cst_44 = arith.constant 5.000000e-01 : f32
    %105 = vector.broadcast %cst_44 : f32 to vector<32x128xf32>
    %106 = arith.mulf %105, %104 : vector<32x128xf32>
    %107 = math.tanh %99 : vector<32x128xf32>
    %108 = arith.mulf %106, %107 : vector<32x128xf32>
    %109 = arith.truncf %108 : vector<32x128xf32> to vector<32x128xbf16>
    %cst_45 = arith.constant dense<0.000000e+00> : vector<32x128xf32>
    %110 = tpu.matmul %83, %109, %cst_45 {dimension_numbers = #tpu.dot_dimension_numbers<[1], [0], [0], [1], [0, 0, 1, 1], [], []>} : vector<32x32xbf16>, vector<32x128xbf16>, vector<32x128xf32> -> vector<32x128xf32>
    %111 = vector.broadcast %84 : vector<32x1xf32> to vector<32x128xf32>
    %112 = arith.addf %110, %111 : vector<32x128xf32>
    %113 = arith.addf %80, %112 : vector<32x128xf32>
    %114 = arith.mulf %113, %5 : vector<32x128xf32>
    %c0_46 = arith.constant 0 : index
    %c0_47 = arith.constant 0 : index
    %c0_48 = arith.constant 0 : index
    %115 = vector.load %arg15[%c0_46, %c0_47, %c0_48] : memref<1x32x128xf32, #tpu.memory_space<vmem>>, vector<1x32x128xf32>
    %116 = vector.shape_cast %115 : vector<1x32x128xf32> to vector<32x128xf32>
    %117 = vector.shape_cast %114 : vector<32x128xf32> to vector<1x32x128xf32>
    tpu.vector_store %arg15[%c0_46, %c0_47, %c0_48], %117 {strides = array<i32>} : memref<1x32x128xf32, #tpu.memory_space<vmem>>, vector<1x32x128xf32>,
    return
  }
  func.func @transform_0(%arg0: i32) -> (i32, i32, i32) {
    %c0_i32 = arith.constant 0 : i32
    %c0_i32_0 = arith.constant 0 : i32
    %c0_i32_1 = arith.constant 0 : i32
    return %arg0, %c0_i32, %c0_i32_0 : i32, i32, i32
  }
  func.func @transform_1(%arg0: i32) -> (i32, i32, i32) {
    %c0_i32 = arith.constant 0 : i32
    %c0_i32_0 = arith.constant 0 : i32
    %c0_i32_1 = arith.constant 0 : i32
    return %arg0, %c0_i32, %c0_i32_0 : i32, i32, i32
  }
  func.func @transform_2(%arg0: i32) -> (i32, i32) {
    %c0_i32 = arith.constant 0 : i32
    %c0_i32_0 = arith.constant 0 : i32
    %c0_i32_1 = arith.constant 0 : i32
    return %c0_i32, %c0_i32_0 : i32, i32
  }
  func.func @transform_3(%arg0: i32) -> (i32, i32) {
    %c0_i32 = arith.constant 0 : i32
    %c0_i32_0 = arith.constant 0 : i32
    %c0_i32_1 = arith.constant 0 : i32
    return %c0_i32, %c0_i32_0 : i32, i32
  }
  func.func @transform_4(%arg0: i32) -> (i32, i32) {
    %c0_i32 = arith.constant 0 : i32
    %c0_i32_0 = arith.constant 0 : i32
    %c0_i32_1 = arith.constant 0 : i32
    return %c0_i32, %c0_i32_0 : i32, i32
  }
  func.func @transform_5(%arg0: i32) -> (i32, i32) {
    %c0_i32 = arith.constant 0 : i32
    %c0_i32_0 = arith.constant 0 : i32
    %c0_i32_1 = arith.constant 0 : i32
    return %c0_i32, %c0_i32_0 : i32, i32
  }
  func.func @transform_6(%arg0: i32) -> (i32, i32) {
    %c0_i32 = arith.constant 0 : i32
    %c0_i32_0 = arith.constant 0 : i32
    %c0_i32_1 = arith.constant 0 : i32
    return %c0_i32, %c0_i32_0 : i32, i32
  }
  func.func @transform_7(%arg0: i32) -> (i32, i32) {
    %c0_i32 = arith.constant 0 : i32
    %c0_i32_0 = arith.constant 0 : i32
    %c0_i32_1 = arith.constant 0 : i32
    return %c0_i32, %c0_i32_0 : i32, i32
  }
  func.func @transform_8(%arg0: i32) -> (i32, i32) {
    %c0_i32 = arith.constant 0 : i32
    %c0_i32_0 = arith.constant 0 : i32
    %c0_i32_1 = arith.constant 0 : i32
    return %c0_i32, %c0_i32_0 : i32, i32
  }
  func.func @transform_9(%arg0: i32) -> (i32, i32) {
    %c0_i32 = arith.constant 0 : i32
    %c0_i32_0 = arith.constant 0 : i32
    %c0_i32_1 = arith.constant 0 : i32
    return %c0_i32, %c0_i32_0 : i32, i32
  }
  func.func @transform_10(%arg0: i32) -> (i32, i32) {
    %c0_i32 = arith.constant 0 : i32
    %c0_i32_0 = arith.constant 0 : i32
    %c0_i32_1 = arith.constant 0 : i32
    return %c0_i32, %c0_i32_0 : i32, i32
  }
  func.func @transform_11(%arg0: i32) -> (i32, i32) {
    %c0_i32 = arith.constant 0 : i32
    %c0_i32_0 = arith.constant 0 : i32
    %c0_i32_1 = arith.constant 0 : i32
    return %c0_i32, %c0_i32_0 : i32, i32
  }
  func.func @transform_12(%arg0: i32) -> (i32, i32) {
    %c0_i32 = arith.constant 0 : i32
    %c0_i32_0 = arith.constant 0 : i32
    %c0_i32_1 = arith.constant 0 : i32
    return %c0_i32, %c0_i32_0 : i32, i32
  }
  func.func @transform_13(%arg0: i32) -> (i32, i32) {
    %c0_i32 = arith.constant 0 : i32
    %c0_i32_0 = arith.constant 0 : i32
    %c0_i32_1 = arith.constant 0 : i32
    return %c0_i32, %c0_i32_0 : i32, i32
  }
  func.func @transform_14(%arg0: i32) -> (i32, i32, i32) {
    %c0_i32 = arith.constant 0 : i32
    %c0_i32_0 = arith.constant 0 : i32
    %c0_i32_1 = arith.constant 0 : i32
    return %arg0, %c0_i32, %c0_i32_0 : i32, i32, i32
  }
}

</mosaic_0001>

<bundles_post_ra>
// kernel: tpu_custom_call.1
= control target key start
LH: loop header
LB: loop body
LE: loop exit
PB: predicated region body
PF: predicated region fallthrough
CT: control target
= control target key end

     0   :  { %s2559_s0 = inlined_call_operand.vmem [shape: f32[2,32,128], index: 0, kind: input, shape index: {}]   ;;  %s2560_s1 = inlined_call_operand.vmem [shape: f32[2,1,128], index: 1, kind: input, shape index: {}]   ;;  %s2561_s2 = inlined_call_operand.vmem [shape: bf16[64,96], index: 2, kind: input, shape index: {}]   ;;  %s2562_s3 = inlined_call_operand.vmem [shape: f32[64,1], index: 3, kind: input, shape index: {}]   ;;  %s2563_s4 = inlined_call_operand.vmem [shape: bf16[64,32], index: 4, kind: input, shape index: {}]   ;;  %s2564_s5 = inlined_call_operand.vmem [shape: f32[64,1], index: 5, kind: input, shape index: {}]   ;;  %s2565_s6 = inlined_call_operand.vmem [shape: bf16[64,96], index: 6, kind: input, shape index: {}]   ;;  %s2566_s7 = inlined_call_operand.vmem [shape: f32[64,1], index: 7, kind: input, shape index: {}]   ;;  %s2567_s8 = inlined_call_operand.vmem [shape: bf16[64,32], index: 8, kind: input, shape index: {}]   ;;  %s2568_s9 = inlined_call_operand.vmem [shape: f32[64,1], index: 9, kind: input, shape index: {}]   ;;  %s2569_s10 = inlined_call_operand.vmem [shape: bf16[64,96], index: 10, kind: input, shape index: {}]   ;;  %s2570_s11 = inlined_call_operand.vmem [shape: f32[64,1], index: 11, kind: input, shape index: {}]   ;;  %s2571_s12 = inlined_call_operand.vmem [shape: bf16[32,32], index: 12, kind: input, shape index: {}]   ;;  %s2572_s13 = inlined_call_operand.vmem [shape: f32[32,1], index: 13, kind: input, shape index: {}]   ;;  %s2573_s14 = inlined_call_operand.hbm [shape: f32[2,32,128], index: 14, kind: output, shape index: {}]  }
   0x1   :  { %2577 = sst [smem:[#allocation8_spill]] %s2559_s0 }
   0x2   :  { %19 = vsyncpa [#allocation3], 0 }
   0x3   :  { %21 = vsyncpa [#allocation3 + $0x1], 0  ;;  %s2163_s29 = smov 0   ;;  %s2165_s30 = smov 0  }
   0x4   :  { %s2167_s15 = smov 0   ;;  %s2169_s16 = smov 0  }
   0x5 LB: > { %2578 = sst [smem:[#allocation5_spill]] %s2072_s15  ;;  %s2184_s17 = sadd.s32 4294967295, %s2076_s16   ;;  %s2076_s16 = sphi %s2169_s16, %s2584_s16   ;;  %s2072_s15 = sphi %s2167_s15, %s2586_s15   ;;  %s2068_s30 = sphi %s2165_s30, %s2588_s30   ;;  %s2064_s29 = sphi %s2163_s29, %s2587_s29  }
   0x6   : > { %s1617_s18 = sadd.s32 4294967294, %s2076_s16   ;;  %s2188_s19 = sadd.s32 1, %s2076_s16  }
   0x7   : > { %2579 = sst [smem:[#allocation6_spill]] %s2188_s19  ;;  %s338_s20 = sadd.s32 1, %s2072_s15 }
   0x8   : > { %s335_s21 = ssub.s32 %s2076_s16, %s2188_s19  ;;  %p348_p0 = scmp.ne.s32.totalorder %s2072_s15, %s2068_s30 }
   0x9   : > { %p336_p1 = scmp.eq.s32.totalorder %s335_s21, 0  ;;  %p349_p2 = scmp.eq.s32.totalorder %s2184_s17, 1 }
   0xa   : > { %p354_p3 = scmp.ne.s32.totalorder %s2068_s30, %s2064_s29  ;;  %p355_p4 = scmp.eq.s32.totalorder %s1617_s18, 1 }
   0xb   : > { %s2199_s22 = scalar_select %p336_p1, %s2072_s15, %s338_s20  }
   0xc   : > { %p2201_p5 = por %p349_p2, %p348_p0  ;;  %p2205_p6 = por %p355_p4, %p354_p3 }
   0xd   : > { %2580 = sst [smem:[#allocation7_spill]] %s2199_s22  ;;  %p1620_p7 = scmp.ge.s32.totalorder %s2076_s16, 1 }
   0xe   : > { %p423_p8 = scmp.lt.s32.totalorder %s2076_s16, 3 }
  0x10   : > { %p424_p9 = pnand %p1620_p7, %p423_p8 }
  0x11   : > { %p472_p10 = scmp.lt.s32.totalorder (!%p424_p9), %s2184_s17, 1  ;;  %s2583_s0 = sld [smem:[#allocation8_spill]] (!%p424_p9)  ;;  %v1944_v6 = vld [vmem:[%s2561_s2] sm:$0xff] (!%p424_p9)   ;;  %vm606_vm0 = vcmask (!%p424_p9), 785408   ;;  %v501_v7 = vld [vmem:[%s2562_s3 + $0x8] sm:$0xff] (!%p424_p9)  ;;  %v2080_v9 = vmov (!%p424_p9), 0  }
  0x12   : > { %427 = sbr.rel (%p424_p9) target bundleno = 1885 (0x75d), region = 76  ;;  %s2078_s20 = smov (!%p424_p9), 1   ;;  %1734 = vmatprep.mubr.msk.bf16.mxu0 (!%p424_p9), %vm606_vm0, %v1944_v6  ;;  %v500_v8 = vld [vmem:[%s2562_s3] sm:$0xff] (!%p424_p9)  ;;  %1903 = vset.pattern.permute.xlu1 (!%p424_p9), %v2080_v9  ;;  %v502_v10 = vld [vmem:[%s2562_s3 + $0x10] sm:$0xff] (!%p424_p9)  ;;  %v503_v11 = vld [vmem:[%s2562_s3 + $0x18] sm:$0xff] (!%p424_p9)  ;;  %vm770_vm1 = vcmask (!%p424_p9), 261120  }
  0x13   : > { %s2079_s21 = smov (!%p424_p9), 127   ;;  %1902 = vset.pattern.permute.xlu0 (!%p424_p9), %v2080_v9  ;;  %v504_v12 = vld [vmem:[%s2562_s3 + $0x20] sm:$0xff] (!%p424_p9)  ;;  %v505_v13 = vld [vmem:[%s2562_s3 + $0x28] sm:$0xff] (!%p424_p9)  ;;  %v506_v14 = vld [vmem:[%s2562_s3 + $0x30] sm:$0xff] (!%p424_p9)  ;;  %s2082_s27 = smov (!%p424_p9), 126  }
  0x14   : > { %v507_v15 = vld [vmem:[%s2562_s3 + $0x38] sm:$0xff] (!%p424_p9)  ;;  %v516_v16 = vld [vmem:[%s2564_s5] sm:$0xff] (!%p424_p9)  ;;  %v517_v17 = vld [vmem:[%s2564_s5 + $0x8] sm:$0xff] (!%p424_p9) }
  0x15   : > { %v518_v18 = vld [vmem:[%s2564_s5 + $0x10] sm:$0xff] (!%p424_p9)  ;;  %v519_v19 = vld [vmem:[%s2564_s5 + $0x18] sm:$0xff] (!%p424_p9)  ;;  %v1945_v38 = vld [vmem:[%s2561_s2 + $0x8] sm:$0xff] (!%p424_p9)  }
  0x16   : > { %v1946_v39 = vld [vmem:[%s2561_s2 + $0x10] sm:$0xff] (!%p424_p9)   ;;  %v1947_v40 = vld [vmem:[%s2561_s2 + $0x18] sm:$0xff] (!%p424_p9)   ;;  %v1948_v41 = vld [vmem:[%s2563_s4] sm:$0xff] (!%p424_p9)  }
  0x17   : > { %1746 = vmatprep.mubr.msk.bf16.mxu1 (!%p424_p9), %vm770_vm1, %v1948_v41 }
  0x19   : > { %s2213_s25 = scalar_select %p472_p10, %s2184_s17, 1 }
  0x1b   : > { %s1674_s26 = sshll.u32 %s2213_s25, 5 }
  0x1c   : > { %s476_s18 = scalar_lea.vmem %s2583_s0, %s1674_s26  ;;  %s479_s26 = scalar_lea.vmem %s2560_s1, %s2213_s25 }
  0x1d   : > { %v2219_v0 = vld [vmem:[%s476_s18] sm:$0xff]  ;;  %v2221_v1 = vld [vmem:[%s476_s18 + $0x8] sm:$0xff]  ;;  %v2223_v2 = vld [vmem:[%s476_s18 + $0x10] sm:$0xff]  ;;  %s2081_s25 = smov 2  }
  0x1e   : > { %v1882_v3 = vpack.i.bf16 %v2221_v1, %v2219_v0  ;;  %v2227_v4 = vld [vmem:[%s476_s18 + $0x18] sm:$0xff]  ;;  %v542_v29 = vpack.c.bf16 %v2221_v1, %v2219_v0  ;;  %s1675_s18 = sshll.u32 %s2184_s17, 9 }
  0x1f   : > { %v1887_v5 = vpack.i.bf16 %v2227_v4, %v2223_v2  ;;  %v543_v32 = vpack.c.bf16 %v2227_v4, %v2223_v2  ;;  %s2513_s17 = scalar_lea.hbm %s2573_s14, %s1675_s18 }
  0x20   : > { %1883 = vrot.lane.b32.xlu0 %v1882_v3, %s2078_s20  ;;  %1893 = vrot.lane.b32.xlu1 %v1882_v3, %s2079_s21 }
  0x24   : > { %1888 = vrot.lane.b32.xlu0 %v1887_v5, %s2078_s20  ;;  %1898 = vrot.lane.b32.xlu1 %v1887_v5, %s2079_s21  ;;  %s2083_s21 = smov 4  }
  0x28   : > { %553 = vperm.xlu1 %1903, %v501_v7   ;;  %548 = vperm.xlu0 %1902, %v500_v8  }
  0x2c   : > { %558 = vperm.xlu1 %1903, %v502_v10   ;;  %563 = vperm.xlu0 %1902, %v503_v11  }
  0x30   : > { %568 = vperm.xlu1 %1903, %v504_v12   ;;  %573 = vperm.xlu0 %1902, %v505_v13  }
  0x34   : > { %578 = vperm.xlu1 %1903, %v506_v14   ;;  %583 = vperm.xlu0 %1902, %v507_v15  }
  0x38   : > { %712 = vperm.xlu1 %1903, %v516_v16   ;;  %717 = vperm.xlu0 %1902, %v517_v17  }
  0x3c   : > { %722 = vperm.xlu1 %1903, %v518_v18   ;;  %727 = vperm.xlu0 %1902, %v519_v19  }
  0x92   : > { %v1884_v20 = vpop.permute.xlu0 %1883  ;;  %v1894_v27 = vpop.permute.xlu1 %1893 }
  0x93   : > { %v1886_v21 = vunpack.i.h.bf16 %v1884_v20  ;;  %v1885_v22 = vunpack.i.l.bf16 %v1884_v20  ;;  %v1896_v30 = vunpack.i.h.bf16 %v1894_v27  ;;  %v1895_v31 = vunpack.i.l.bf16 %v1894_v27 }
  0x95   : > { %v540_v23 = vpack.c.bf16 %v1886_v21, %v1885_v22  ;;  %v544_v34 = vpack.c.bf16 %v1896_v30, %v1895_v31 }
  0x96   : > { %v1889_v24 = vpop.permute.xlu0 %1888  ;;  %v1899_v33 = vpop.permute.xlu1 %1898 }
  0x97   : > { %v1891_v25 = vunpack.i.h.bf16 %v1889_v24  ;;  %v1890_v26 = vunpack.i.l.bf16 %v1889_v24  ;;  %1722 = vmatprep.subr.bf16.mxu0 %v540_v23  ;;  %v1901_v35 = vunpack.i.h.bf16 %v1899_v33  ;;  %v1900_v36 = vunpack.i.l.bf16 %v1899_v33 }
  0x98   : > { %1723 = vmatpush3.bf16.msra.mxu0 %v540_v23 }
  0x99   : > { %v541_v28 = vpack.c.bf16 %v1891_v25, %v1890_v26  ;;  %v545_v37 = vpack.c.bf16 %v1901_v35, %v1900_v36 }
  0x9b   : > { %1724 = vmatprep.subr.bf16.mxu0 %v541_v28 }
  0x9c   : > { %1725 = vmatpush3.bf16.msra.mxu0 %v541_v28 }
  0x9d   : > { %1726 = vmatprep.subr.bf16.mxu0 %v542_v29 }
  0xa0   : > { %1727 = vmatpush3.bf16.msra.mxu0 %v542_v29 }
  0xa1   : > { %1728 = vmatprep.subr.bf16.mxu0 %v543_v32 }
  0xa4   : > { %1729 = vmatpush3.bf16.msra.mxu0 %v543_v32  ;;  %v1949_v32 = vld [vmem:[%s2563_s4 + $0x8] sm:$0xff]  }
  0xa5   : > { %1730 = vmatprep.subr.bf16.mxu0 %v544_v34 }
  0xa7   : > { %v554_v42 = vpop.permute.xlu1 %553  ;;  %v549_v43 = vpop.permute.xlu0 %548 }
  0xa8   : > { %1731 = vmatpush3.bf16.msra.mxu0 %v544_v34 }
  0xa9   : > { %1732 = vmatprep.subr.bf16.mxu0 %v545_v37 }
  0xab   : > { %v559_v44 = vpop.permute.xlu1 %558  ;;  %v564_v45 = vpop.permute.xlu0 %563 }
  0xac   : > { %1733 = vmatpush3.bf16.msra.mxu0 %v545_v37 }
  0xaf   : > { %1735 = vmatmul.mubr.msk.bf16.vlgmr.msra.gmra.mrb[0].mxu0 %vm606_vm0, %v1945_v38  ;;  %v569_v49 = vpop.permute.xlu1 %568  ;;  %v574_v55 = vpop.permute.xlu0 %573 }
  0xb0   : > { %1738 = vmatprep.mubr.msk.bf16.mxu0 %vm606_vm0, %v1946_v39 }
  0xb3   : > { %v579_v60 = vpop.permute.xlu1 %578  ;;  %v584_v3 = vpop.permute.xlu0 %583 }
  0xb7   : > { %1739 = vmatmul.mubr.msk.bf16.gmra.mrb[4].mxu0 %vm606_vm0, %v1947_v40  ;;  %v713_v33 = vpop.permute.xlu1 %712  ;;  %v718_v34 = vpop.permute.xlu0 %717 }
  0xbb   : > { %v723_v35 = vpop.permute.xlu1 %722  ;;  %v728_v39 = vpop.permute.xlu0 %727 }
 0x182   : > { %v1736_v46 = vpop.f32.mrb[0].mxu0 }
 0x183   : > { %v662_v47 = vadd.f32 %v1736_v46, %v559_v44  ;;  %v653_v48 = vpop.f32.mrb[1].mxu0 }
 0x184   : > { %v654_v50 = vadd.f32 %v653_v48, %v549_v43  ;;  %v1737_v51 = vpop.f32.mrb[2].mxu0 }
 0x185   : > { %v686_v52 = vmul.f32 0.5, %v662_v47  ;;  %v665_v53 = vadd.f32 %v1737_v51, %v564_v45  ;;  %v656_v54 = vpop.f32.mrb[3].mxu0  ;;  %v2300_v45 = vld [vmem:[%s479_s26] ss:$0 sm:$0xff]  ;;  %s2084_s26 = smov 124  }
 0x186   : > { %v684_v56 = vmul.f32 0.5, %v654_v50  ;;  %v657_v57 = vadd.f32 %v656_v54, %v554_v42  ;;  %v868_v54 = vld [vmem:[%s2566_s7] sm:$0xff] }
 0x187   : > { %1966 = vtanh.f32 %v686_v52  ;;  %v687_v58 = vmul.f32 0.5, %v665_v53  ;;  %v1950_v53 = vld [vmem:[%s2563_s4 + $0x10] sm:$0xff]  }
 0x188   : > { %1968 = vtanh.f32 %v684_v56  ;;  %v685_v59 = vmul.f32 0.5, %v657_v57  ;;  %v871_v56 = vld [vmem:[%s2566_s7 + $0x18] sm:$0xff]  ;;  %v870_v57 = vld [vmem:[%s2566_s7 + $0x10] sm:$0xff] }
 0x189   : > { %1970 = vtanh.f32 %v687_v58  ;;  %v873_v58 = vld [vmem:[%s2566_s7 + $0x28] sm:$0xff] }
 0x18a   : > { %1972 = vtanh.f32 %v685_v59  ;;  %v1740_v61 = vpop.f32.mrb[4].mxu0  ;;  %v1952_v59 = vld [vmem:[%s2565_s6] sm:$0xff]  }
 0x18b   : > { %v678_v62 = vadd.f32 %v1740_v61, %v579_v60  ;;  %v669_v63 = vpop.f32.mrb[5].mxu0  ;;  %v872_v60 = vld [vmem:[%s2566_s7 + $0x20] sm:$0xff]  ;;  %v875_v61 = vld [vmem:[%s2566_s7 + $0x38] sm:$0xff] }
 0x18c   : > { %v670_v5 = vadd.f32 %v669_v63, %v569_v49  ;;  %v1741_v6 = vpop.f32.mrb[6].mxu0  ;;  %v885_v63 = vld [vmem:[%s2568_s9 + $0x8] sm:$0xff] }
 0x18d   : > { %1974 = vtanh.f32 %v678_v62  ;;  %v681_v7 = vadd.f32 %v1741_v6, %v584_v3  ;;  %v672_v8 = vpop.f32.mrb[7].mxu0  ;;  %v874_v62 = vld [vmem:[%s2566_s7 + $0x30] sm:$0xff]  ;;  %v884_v3 = vld [vmem:[%s2568_s9] sm:$0xff] }
 0x18e   : > { %1976 = vtanh.f32 %v670_v5  ;;  %v673_v9 = vadd.f32 %v672_v8, %v574_v55  ;;  %v1951_v55 = vld [vmem:[%s2563_s4 + $0x18] sm:$0xff]   ;;  %v886_v6 = vld [vmem:[%s2568_s9 + $0x10] sm:$0xff] }
 0x18f   : > { %1978 = vtanh.f32 %v681_v7  ;;  %v887_v5 = vld [vmem:[%s2568_s9 + $0x18] sm:$0xff] }
 0x190   : > { %1980 = vtanh.f32 %v673_v9 }
 0x191   : > { %v1967_v10 = vpop.eup %1966 }
 0x192   : > { %v1969_v11 = vpop.eup %1968  ;;  %v694_v12 = vadd.f32 1.0, %v1967_v10 }
 0x193   : > { %v1971_v13 = vpop.eup %1970  ;;  %v692_v14 = vadd.f32 1.0, %v1969_v11 }
 0x194   : > { %v1973_v15 = vpop.eup %1972  ;;  %v695_v16 = vadd.f32 1.0, %v1971_v13  ;;  %v698_v18 = vmul.f32 0.5, %v694_v12 }
 0x195   : > { %v693_v17 = vadd.f32 1.0, %v1973_v15  ;;  %v696_v20 = vmul.f32 0.5, %v692_v14 }
 0x196   : > { %v699_v22 = vmul.f32 0.5, %v695_v16 }
 0x197   : > { %v1975_v19 = vpop.eup %1974  ;;  %v697_v25 = vmul.f32 0.5, %v693_v17 }
 0x198   : > { %v1977_v21 = vpop.eup %1976  ;;  %v706_v23 = vmul.f32 %v1975_v19, %v698_v18 }
 0x199   : > { %v1979_v24 = vpop.eup %1978  ;;  %v704_v26 = vmul.f32 %v1977_v21, %v696_v20 }
 0x19a   : > { %v1981_v27 = vpop.eup %1980  ;;  %v707_v28 = vmul.f32 %v1979_v24, %v699_v22 }
 0x19b   : > { %v705_v29 = vmul.f32 %v1981_v27, %v697_v25  ;;  %v1953_v25 = vld [vmem:[%s2565_s6 + $0x8] sm:$0xff]   ;;  %v1955_v27 = vld [vmem:[%s2565_s6 + $0x18] sm:$0xff]  }
 0x19c   : > { %v709_v30 = vpack.c.bf16 %v707_v28, %v706_v23  ;;  %v1956_v28 = vld [vmem:[%s2567_s8] sm:$0xff]  }
 0x19d   : > { %v708_v31 = vpack.c.bf16 %v705_v29, %v704_v26  ;;  %v1954_v26 = vld [vmem:[%s2565_s6 + $0x10] sm:$0xff]  }
 0x19f   : > { %1742 = vmatprep.subr.bf16.mxu1 %v708_v31 }
 0x1a0   : > { %1743 = vmatpush3.bf16.msra.mxu1 %v708_v31 }
 0x1a1   : > { %1744 = vmatprep.subr.bf16.mxu1 %v709_v30 }
 0x1a4   : > { %1745 = vmatpush3.bf16.msra.mxu1 %v709_v30 }
 0x1a7   : > { %1747 = vmatmul.mubr.msk.bf16.vlgmr.msra.gmra.mrb[0].mxu1 %vm770_vm1, %v1949_v32 }
 0x1a8   : > { %1750 = vmatprep.mubr.msk.bf16.mxu1 %vm770_vm1, %v1950_v53 }
 0x1af   : > { %1751 = vmatmul.mubr.msk.bf16.gmra.mrb[4].mxu1 %vm770_vm1, %v1951_v55 }
 0x1b0   : > { %1766 = vmatprep.mubr.msk.bf16.mxu1 %vm606_vm0, %v1952_v59 }
 0x27a   : > { %v1748_v36 = vpop.f32.mrb[0].mxu1 }
 0x27b   : > { %v826_v37 = vadd.f32 %v1748_v36, %v723_v35  ;;  %v817_v38 = vpop.f32.mrb[1].mxu1 }
 0x27c   : > { %v818_v40 = vadd.f32 %v817_v38, %v713_v33  ;;  %v1749_v41 = vpop.f32.mrb[2].mxu1 }
 0x27d   : > { %v850_v42 = vadd.f32 %v826_v37, %v2223_v2  ;;  %v829_v43 = vadd.f32 %v1749_v41, %v728_v39  ;;  %v820_v44 = vpop.f32.mrb[3].mxu1 }
 0x27e   : > { %v848_v46 = vadd.f32 %v818_v40, %v2219_v0  ;;  %v821_v47 = vadd.f32 %v820_v44, %v718_v34 }
 0x27f   : > { %v851_v48 = vadd.f32 %v829_v43, %v2227_v4  ;;  %v2306_v50 = vmul.f32 %v2300_v45, %v850_v42 }
 0x280   : > { %v849_v49 = vadd.f32 %v821_v47, %v2221_v1  ;;  %v2312_v52 = vmul.f32 %v2300_v45, %v848_v46  ;;  %v869_v1 = vld [vmem:[%s2566_s7 + $0x8] sm:$0xff] }
 0x281   : > { %v2309_v51 = vmul.f32 %v2300_v45, %v851_v48 }
 0x282   : > { %v2315_v2 = vmul.f32 %v2300_v45, %v849_v49 }
 0x283   : > { %v1909_v0 = vpack.i.bf16 %v2309_v51, %v2306_v50  ;;  %v911_v19 = vpack.c.bf16 %v2309_v51, %v2306_v50 }
 0x284   : > { %v1904_v4 = vpack.i.bf16 %v2315_v2, %v2312_v52  ;;  %v910_v15 = vpack.c.bf16 %v2315_v2, %v2312_v52 }
 0x285   : > { %1910 = vrot.lane.b32.xlu0 %v1909_v0, %s2081_s25 }
 0x286   : > { %1905 = vrot.lane.b32.xlu1 %v1904_v4, %s2081_s25 }
 0x289   : > { %1920 = vrot.lane.b32.xlu0 %v1909_v0, %s2082_s27 }
 0x28a   : > { %1915 = vrot.lane.b32.xlu1 %v1904_v4, %s2082_s27  ;;  %s469_s27 = sand.u32 1, %s2068_s30  }
 0x28b   : > { %s1621_s0 = sshll.u32 %s469_s27, 5  ;;  %s2518_s20 = scalar_lea.sflag [#allocation3], %s469_s27 }
 0x28c   : > { %s471_s28 = scalar_lea.vmem [#allocation2], %s1621_s0 }
 0x28d   : > { %921 = vperm.xlu0 %1902, %v869_v1   ;;  %s1546_s22 = sshll.u32 %s471_s28, 4  ;;  %s2507_s22 = int_to_ptr.vmem [resolvable:$true] %s1546_s22 }
 0x28e   : > { %916 = vperm.xlu1 %1903, %v868_v54  }
 0x291   : > { %931 = vperm.xlu0 %1902, %v871_v56  }
 0x292   : > { %926 = vperm.xlu1 %1903, %v870_v57  }
 0x295   : > { %941 = vperm.xlu0 %1902, %v873_v58  }
 0x296   : > { %936 = vperm.xlu1 %1903, %v872_v60  }
 0x299   : > { %951 = vperm.xlu0 %1902, %v875_v61  }
 0x29a   : > { %946 = vperm.xlu1 %1903, %v874_v62  }
 0x29d   : > { %1084 = vperm.xlu0 %1902, %v885_v63  }
 0x29e   : > { %1079 = vperm.xlu1 %1903, %v884_v3  }
 0x2a1   : > { %1094 = vperm.xlu0 %1902, %v887_v5  }
 0x2a2   : > { %1089 = vperm.xlu1 %1903, %v886_v6  }
 0x2f7   : > { %v1911_v7 = vpop.permute.xlu0 %1910 }
 0x2f8   : > { %v1906_v8 = vpop.permute.xlu1 %1905  ;;  %v1913_v9 = vunpack.i.h.bf16 %v1911_v7  ;;  %v1912_v10 = vunpack.i.l.bf16 %v1911_v7 }
 0x2f9   : > { %v1908_v11 = vunpack.i.h.bf16 %v1906_v8  ;;  %v1907_v12 = vunpack.i.l.bf16 %v1906_v8 }
 0x2fa   : > { %v909_v14 = vpack.c.bf16 %v1913_v9, %v1912_v10 }
 0x2fb   : > { %v908_v13 = vpack.c.bf16 %v1908_v11, %v1907_v12  ;;  %v1921_v20 = vpop.permute.xlu0 %1920 }
 0x2fc   : > { %v1916_v16 = vpop.permute.xlu1 %1915  ;;  %v1923_v21 = vunpack.i.h.bf16 %v1921_v20  ;;  %v1922_v22 = vunpack.i.l.bf16 %v1921_v20  ;;  %v1957_v20 = vld [vmem:[%s2567_s8 + $0x8] sm:$0xff]  }
 0x2fd   : > { %1754 = vmatprep.subr.bf16.mxu1 %v908_v13  ;;  %v1918_v17 = vunpack.i.h.bf16 %v1916_v16  ;;  %v1917_v18 = vunpack.i.l.bf16 %v1916_v16 }
 0x2fe   : > { %1755 = vmatpush3.bf16.msra.mxu1 %v908_v13  ;;  %v913_v24 = vpack.c.bf16 %v1923_v21, %v1922_v22 }
 0x2ff   : > { %1756 = vmatprep.subr.bf16.mxu1 %v909_v14  ;;  %v912_v23 = vpack.c.bf16 %v1918_v17, %v1917_v18 }
 0x302   : > { %1757 = vmatpush3.bf16.msra.mxu1 %v909_v14 }
 0x303   : > { %1758 = vmatprep.subr.bf16.mxu1 %v910_v15 }
 0x306   : > { %1759 = vmatpush3.bf16.msra.mxu1 %v910_v15 }
 0x307   : > { %1760 = vmatprep.subr.bf16.mxu1 %v911_v19 }
 0x30a   : > { %1761 = vmatpush3.bf16.msra.mxu1 %v911_v19 }
 0x30b   : > { %1762 = vmatprep.subr.bf16.mxu1 %v912_v23 }
 0x30c   : > { %v922_v30 = vpop.permute.xlu0 %921 }
 0x30d   : > { %v917_v29 = vpop.permute.xlu1 %916 }
 0x30e   : > { %1763 = vmatpush3.bf16.msra.mxu1 %v912_v23 }
 0x30f   : > { %1764 = vmatprep.subr.bf16.mxu1 %v913_v24 }
 0x310   : > { %v932_v32 = vpop.permute.xlu0 %931 }
 0x311   : > { %v927_v31 = vpop.permute.xlu1 %926 }
 0x312   : > { %1765 = vmatpush3.bf16.msra.mxu1 %v913_v24 }
 0x314   : > { %v942_v42 = vpop.permute.xlu0 %941 }
 0x315   : > { %1767 = vmatmul.mubr.msk.bf16.vlgmr.msra.gmra.mrb[8].mxu1 %vm606_vm0, %v1953_v25  ;;  %v937_v36 = vpop.permute.xlu1 %936 }
 0x316   : > { %1770 = vmatprep.mubr.msk.bf16.mxu1 %vm606_vm0, %v1954_v26 }
 0x318   : > { %v952_v1 = vpop.permute.xlu0 %951 }
 0x319   : > { %v947_v48 = vpop.permute.xlu1 %946 }
 0x31c   : > { %v1085_v22 = vpop.permute.xlu0 %1084 }
 0x31d   : > { %1771 = vmatmul.mubr.msk.bf16.gmra.mrb[12].mxu1 %vm606_vm0, %v1955_v27  ;;  %v1080_v21 = vpop.permute.xlu1 %1079 }
 0x31e   : > { %1778 = vmatprep.mubr.msk.bf16.mxu1 %vm770_vm1, %v1956_v28 }
 0x320   : > { %v1095_v27 = vpop.permute.xlu0 %1094 }
 0x321   : > { %v1090_v23 = vpop.permute.xlu1 %1089 }
 0x3e8   : > { %v1768_v33 = vpop.f32.mrb[8].mxu1 }
 0x3e9   : > { %v1029_v34 = vadd.f32 %v1768_v33, %v927_v31  ;;  %v1020_v35 = vpop.f32.mrb[9].mxu1 }
 0x3ea   : > { %v1021_v37 = vadd.f32 %v1020_v35, %v917_v29  ;;  %v1769_v38 = vpop.f32.mrb[10].mxu1 }
 0x3eb   : > { %v1053_v39 = vmul.f32 0.5, %v1029_v34  ;;  %v1032_v40 = vadd.f32 %v1769_v38, %v932_v32  ;;  %v1023_v41 = vpop.f32.mrb[11].mxu1 }
 0x3ec   : > { %v1051_v43 = vmul.f32 0.5, %v1021_v37  ;;  %v1024_v44 = vadd.f32 %v1023_v41, %v922_v30 }
 0x3ed   : > { %1982 = vtanh.f32 %v1053_v39  ;;  %v1054_v46 = vmul.f32 0.5, %v1032_v40 }
 0x3ee   : > { %1984 = vtanh.f32 %v1051_v43  ;;  %v1052_v47 = vmul.f32 0.5, %v1024_v44  ;;  %v1236_v44 = vld [vmem:[%s2570_s11 + $0x10] sm:$0xff] }
 0x3ef   : > { %1986 = vtanh.f32 %v1054_v46  ;;  %v1239_v46 = vld [vmem:[%s2570_s11 + $0x28] sm:$0xff] }
 0x3f0   : > { %1988 = vtanh.f32 %v1052_v47  ;;  %v1772_v49 = vpop.f32.mrb[12].mxu1  ;;  %v1958_v47 = vld [vmem:[%s2569_s10] sm:$0xff]  }
 0x3f1   : > { %v1045_v0 = vadd.f32 %v1772_v49, %v947_v48  ;;  %v1036_v4 = vpop.f32.mrb[13].mxu1  ;;  %v1238_v48 = vld [vmem:[%s2570_s11 + $0x20] sm:$0xff]  ;;  %1798 = vmatprep.mubr.msk.bf16.mxu0 %vm606_vm0, %v1958_v47  ;;  %v1241_v49 = vld [vmem:[%s2570_s11 + $0x38] sm:$0xff] }
 0x3f2   : > { %v1037_v53 = vadd.f32 %v1036_v4, %v937_v36  ;;  %v1773_v54 = vpop.f32.mrb[14].mxu1  ;;  %v521_v4 = vld [vmem:[%s2564_s5 + $0x28] sm:$0xff] }
 0x3f3   : > { %1990 = vtanh.f32 %v1045_v0  ;;  %v1048_v55 = vadd.f32 %v1773_v54, %v952_v1  ;;  %v1039_v56 = vpop.f32.mrb[15].mxu1  ;;  %v1240_v0 = vld [vmem:[%s2570_s11 + $0x30] sm:$0xff]  ;;  %v520_v1 = vld [vmem:[%s2564_s5 + $0x20] sm:$0xff] }
 0x3f4   : > { %1992 = vtanh.f32 %v1037_v53  ;;  %v1040_v57 = vadd.f32 %v1039_v56, %v942_v42  ;;  %v523_v53 = vld [vmem:[%s2564_s5 + $0x38] sm:$0xff]  ;;  %v522_v54 = vld [vmem:[%s2564_s5 + $0x30] sm:$0xff]  ;;  %v888_v56 = vld [vmem:[%s2568_s9 + $0x20] sm:$0xff] }
 0x3f5   : > { %1994 = vtanh.f32 %v1048_v55  ;;  %v889_v55 = vld [vmem:[%s2568_s9 + $0x28] sm:$0xff] }
 0x3f6   : > { %1996 = vtanh.f32 %v1040_v57  ;;  %v891_v57 = vld [vmem:[%s2568_s9 + $0x38] sm:$0xff] }
 0x3f7   : > { %v1983_v58 = vpop.eup %1982 }
 0x3f8   : > { %v1985_v59 = vpop.eup %1984  ;;  %v1061_v60 = vadd.f32 1.0, %v1983_v58  ;;  %v890_v58 = vld [vmem:[%s2568_s9 + $0x30] sm:$0xff] }
 0x3f9   : > { %v1987_v61 = vpop.eup %1986  ;;  %v1059_v62 = vadd.f32 1.0, %v1985_v59  ;;  %v1247_v59 = vld [vmem:[%s2572_s13 + $0x8] sm:$0xff] }
 0x3fa   : > { %v1989_v63 = vpop.eup %1988  ;;  %v1062_v3 = vadd.f32 1.0, %v1987_v61  ;;  %v1065_v6 = vmul.f32 0.5, %v1061_v60  ;;  %v1246_v60 = vld [vmem:[%s2572_s13] sm:$0xff]  ;;  %v1249_v61 = vld [vmem:[%s2572_s13 + $0x18] sm:$0xff] }
 0x3fb   : > { %v1060_v5 = vadd.f32 1.0, %v1989_v63  ;;  %v1063_v8 = vmul.f32 0.5, %v1059_v62  ;;  %v1248_v62 = vld [vmem:[%s2572_s13 + $0x10] sm:$0xff] }
 0x3fc   : > { %v1066_v10 = vmul.f32 0.5, %v1062_v3 }
 0x3fd   : > { %v1991_v7 = vpop.eup %1990  ;;  %v1064_v13 = vmul.f32 0.5, %v1060_v5 }
 0x3fe   : > { %v1993_v9 = vpop.eup %1992  ;;  %v1073_v11 = vmul.f32 %v1991_v7, %v1065_v6 }
 0x3ff   : > { %v1995_v12 = vpop.eup %1994  ;;  %v1071_v14 = vmul.f32 %v1993_v9, %v1063_v8 }
 0x400   : > { %v1997_v15 = vpop.eup %1996  ;;  %v1074_v16 = vmul.f32 %v1995_v12, %v1066_v10 }
 0x401   : > { %v1072_v17 = vmul.f32 %v1997_v15, %v1064_v13 }
 0x402   : > { %v1076_v18 = vpack.c.bf16 %v1074_v16, %v1073_v11 }
 0x403   : > { %v1075_v19 = vpack.c.bf16 %v1072_v17, %v1071_v14 }
 0x405   : > { %1774 = vmatprep.subr.bf16.mxu1 %v1075_v19 }
 0x406   : > { %1775 = vmatpush3.bf16.msra.mxu1 %v1075_v19  ;;  %v1959_v19 = vld [vmem:[%s2569_s10 + $0x8] sm:$0xff]  }
 0x407   : > { %1776 = vmatprep.subr.bf16.mxu1 %v1076_v18 }
 0x40a   : > { %1777 = vmatpush3.bf16.msra.mxu1 %v1076_v18 }
 0x40d   : > { %1779 = vmatmul.mubr.msk.bf16.vlgmr.msra.gmra.mrb[16].mxu1 %vm770_vm1, %v1957_v20  ;;  %v1960_v20 = vld [vmem:[%s2569_s10 + $0x10] sm:$0xff]  }
 0x4e0   : > { %v1780_v24 = vpop.f32.mrb[16].mxu1 }
 0x4e1   : > { %v1192_v25 = vadd.f32 %v1780_v24, %v1090_v23  ;;  %v1183_v26 = vpop.f32.mrb[17].mxu1  ;;  %v1963_v23 = vld [vmem:[%s2567_s8 + $0x18] sm:$0xff]   ;;  %v1964_v24 = vld [vmem:[%s2571_s12] sm:$0xff]  }
 0x4e2   : > { %v1184_v28 = vadd.f32 %v1183_v26, %v1080_v21  ;;  %v1781_v29 = vpop.f32.mrb[18].mxu1  ;;  %v1961_v21 = vld [vmem:[%s2569_s10 + $0x18] sm:$0xff]  }
 0x4e3   : > { %v1216_v30 = vadd.f32 %v1192_v25, %v2306_v50  ;;  %v1195_v31 = vadd.f32 %v1781_v29, %v1095_v27  ;;  %v1186_v32 = vpop.f32.mrb[19].mxu1 }
 0x4e4   : > { %v1214_v33 = vadd.f32 %v1184_v28, %v2312_v52  ;;  %v1187_v34 = vadd.f32 %v1186_v32, %v1085_v22  ;;  %v1234_v52 = vld [vmem:[%s2570_s11] sm:$0xff]  ;;  %v1962_v22 = vld [vmem:[%s2567_s8 + $0x10] sm:$0xff]  }
 0x4e5   : > { %v1217_v35 = vadd.f32 %v1195_v31, %v2309_v51  ;;  %v1220_v37 = vmul.f32 %v2300_v45, %v1216_v30  ;;  %v1235_v51 = vld [vmem:[%s2570_s11 + $0x8] sm:$0xff]  ;;  %1782 = vmatprep.mubr.msk.bf16.mxu1 %vm770_vm1, %v1962_v22 }
 0x4e6   : > { %v1215_v36 = vadd.f32 %v1187_v34, %v2315_v2  ;;  %v1218_v39 = vmul.f32 %v2300_v45, %v1214_v33  ;;  %v1237_v2 = vld [vmem:[%s2570_s11 + $0x18] sm:$0xff]  ;;  %1783 = vmatmul.mubr.msk.bf16.gmra.mrb[4].mxu1 %vm770_vm1, %v1963_v23 }
 0x4e7   : > { %v1221_v38 = vmul.f32 %v2300_v45, %v1217_v35  ;;  %1810 = vmatprep.mubr.msk.bf16.mxu1 %vm770_vm1, %v1964_v24 }
 0x4e8   : > { %v1219_v40 = vmul.f32 %v2300_v45, %v1215_v36 }
 0x4e9   : > { %v1929_v41 = vpack.i.bf16 %v1221_v38, %v1220_v37  ;;  %v2401_v42 = vpack.c.bf16 %v1221_v38, %v1220_v37 }
 0x4ea   : > { %v1924_v50 = vpack.i.bf16 %v1219_v40, %v1218_v39  ;;  %v2403_v43 = vpack.c.bf16 %v1219_v40, %v1218_v39 }
 0x4eb   : > { %1930 = vrot.lane.b32.xlu0 %v1929_v41, %s2083_s21 }
 0x4ec   : > { %1925 = vrot.lane.b32.xlu1 %v1924_v50, %s2083_s21  ;;  %s2014_s21 = scalar_lea.vmem %s2507_s22, 512 }
 0x4ed   : > { %p2015_p11 = scmp.ne.s32.totalorder %s2507_s22, %s2014_s21 }
 0x4ef   : > { %1940 = vrot.lane.b32.xlu0 %v1929_v41, %s2084_s26  ;;  %p2016_p12 = pnand %p2015_p11, %p2201_p5 }
 0x4f0   : > { %1935 = vrot.lane.b32.xlu1 %v1924_v50, %s2084_s26  ;;  %s2085_s26 = smov [#allocation2]  }
 0x4f1   : > { %p2017_p13 = pneg %p2016_p12  ;;  %s2018_s25 = sshll.u32 %s2085_s26, 4  ;;  %s2019_s25 = int_to_ptr.vmem [resolvable:$false] %s2018_s25 }
 0x4f2   : > { %s2020_s0 = scalar_lea.vmem %s2019_s25, 1024  ;;  %p2021_p0 = scmp.lt.s32.totalorder %s2507_s22, %s2019_s25 }
 0x4f3   : > { %1279 = vperm.xlu0 %1902, %v1235_v51   ;;  %p2022_p1 = scmp.lt.s32.totalorder %s2020_s0, %s2014_s21 }
 0x4f4   : > { %1274 = vperm.xlu1 %1903, %v1234_v52  }
 0x4f5   : > { %p2023_p2 = por %p2022_p1, %p2021_p0 }
 0x4f7   : > { %1289 = vperm.xlu0 %1902, %v1237_v2   ;;  %p2024_p3 = pnand %p2023_p2, %p2017_p13 }
 0x4f8   : > { %1284 = vperm.xlu1 %1903, %v1236_v44  }
 0x4fb   : > { %1299 = vperm.xlu0 %1902, %v1239_v46  }
 0x4fc   : > { %1294 = vperm.xlu1 %1903, %v1238_v48  }
 0x4ff   : > { %1309 = vperm.xlu0 %1902, %v1241_v49  }
 0x500   : > { %1304 = vperm.xlu1 %1903, %v1240_v0  }
 0x503   : > { %737 = vperm.xlu0 %1902, %v521_v4  }
 0x504   : > { %732 = vperm.xlu1 %1903, %v520_v1  }
 0x507   : > { %747 = vperm.xlu0 %1902, %v523_v53  }
 0x508   : > { %742 = vperm.xlu1 %1903, %v522_v54  }
 0x50b   : > { %1104 = vperm.xlu0 %1902, %v889_v55  }
 0x50c   : > { %1099 = vperm.xlu1 %1903, %v888_v56  }
 0x50f   : > { %1114 = vperm.xlu0 %1902, %v891_v57  }
 0x510   : > { %1109 = vperm.xlu1 %1903, %v890_v58  }
 0x513   : > { %1442 = vperm.xlu0 %1902, %v1247_v59  }
 0x514   : > { %1437 = vperm.xlu1 %1903, %v1246_v60  }
 0x517   : > { %1452 = vperm.xlu0 %1902, %v1249_v61  }
 0x518   : > { %1447 = vperm.xlu1 %1903, %v1248_v62  }
 0x55d   : > { %v1931_v63 = vpop.permute.xlu0 %1930 }
 0x55e   : > { %v1926_v3 = vpop.permute.xlu1 %1925  ;;  %v1933_v5 = vunpack.i.h.bf16 %v1931_v63  ;;  %v1932_v6 = vunpack.i.l.bf16 %v1931_v63 }
 0x55f   : > { %v1928_v7 = vunpack.i.h.bf16 %v1926_v3  ;;  %v1927_v8 = vunpack.i.l.bf16 %v1926_v3 }
 0x560   : > { %v1267_v10 = vpack.c.bf16 %v1933_v5, %v1932_v6 }
 0x561   : > { %v1266_v9 = vpack.c.bf16 %v1928_v7, %v1927_v8  ;;  %v1941_v14 = vpop.permute.xlu0 %1940 }
 0x562   : > { %v1936_v11 = vpop.permute.xlu1 %1935  ;;  %v1943_v15 = vunpack.i.h.bf16 %v1941_v14  ;;  %v1942_v16 = vunpack.i.l.bf16 %v1941_v14 }
 0x563   : > { %1786 = vmatprep.subr.bf16.mxu0 %v1266_v9  ;;  %v1938_v12 = vunpack.i.h.bf16 %v1936_v11  ;;  %v1937_v13 = vunpack.i.l.bf16 %v1936_v11 }
 0x564   : > { %1787 = vmatpush3.bf16.msra.mxu0 %v1266_v9  ;;  %v1271_v18 = vpack.c.bf16 %v1943_v15, %v1942_v16 }
 0x565   : > { %1788 = vmatprep.subr.bf16.mxu0 %v1267_v10  ;;  %v1270_v17 = vpack.c.bf16 %v1938_v12, %v1937_v13  ;;  %v1965_v12 = vld [vmem:[%s2571_s12 + $0x8] sm:$0xff]  }
 0x568   : > { %1789 = vmatpush3.bf16.msra.mxu0 %v1267_v10 }
 0x569   : > { %1790 = vmatprep.subr.bf16.mxu0 %v2403_v43 }
 0x56c   : > { %1791 = vmatpush3.bf16.msra.mxu0 %v2403_v43 }
 0x56d   : > { %1792 = vmatprep.subr.bf16.mxu0 %v2401_v42 }
 0x570   : > { %1793 = vmatpush3.bf16.msra.mxu0 %v2401_v42 }
 0x571   : > { %1794 = vmatprep.subr.bf16.mxu0 %v1270_v17 }
 0x572   : > { %v1280_v26 = vpop.permute.xlu0 %1279 }
 0x573   : > { %v1275_v25 = vpop.permute.xlu1 %1274 }
 0x574   : > { %1795 = vmatpush3.bf16.msra.mxu0 %v1270_v17 }
 0x575   : > { %1796 = vmatprep.subr.bf16.mxu0 %v1271_v18 }
 0x576   : > { %v1290_v28 = vpop.permute.xlu0 %1289 }
 0x577   : > { %v1285_v27 = vpop.permute.xlu1 %1284 }
 0x578   : > { %1797 = vmatpush3.bf16.msra.mxu0 %v1271_v18 }
 0x57a   : > { %v1300_v38 = vpop.permute.xlu0 %1299 }
 0x57b   : > { %1799 = vmatmul.mubr.msk.bf16.vlgmr.msra.gmra.mrb[8].mxu0 %vm606_vm0, %v1959_v19  ;;  %v1295_v32 = vpop.permute.xlu1 %1294 }
 0x57c   : > { %1802 = vmatprep.mubr.msk.bf16.mxu0 %vm606_vm0, %v1960_v20 }
 0x57e   : > { %v1310_v2 = vpop.permute.xlu0 %1309 }
 0x57f   : > { %v1305_v50 = vpop.permute.xlu1 %1304 }
 0x582   : > { %v738_v14 = vpop.permute.xlu0 %737 }
 0x583   : > { %1803 = vmatmul.mubr.msk.bf16.gmra.mrb[12].mxu0 %vm606_vm0, %v1961_v21  ;;  %v733_v13 = vpop.permute.xlu1 %732 }
 0x586   : > { %v748_v16 = vpop.permute.xlu0 %747 }
 0x587   : > { %v743_v15 = vpop.permute.xlu1 %742 }
 0x58a   : > { %v1105_v18 = vpop.permute.xlu0 %1104 }
 0x58b   : > { %v1100_v17 = vpop.permute.xlu1 %1099 }
 0x58e   : > { %v1115_v20 = vpop.permute.xlu0 %1114 }
 0x58f   : > { %v1110_v19 = vpop.permute.xlu1 %1109 }
 0x590   : > { %v1814_v24 = vadd.f32 %v1110_v19, %v743_v15 }
 0x592   : > { %v1443_v22 = vpop.permute.xlu0 %1442 }
 0x593   : > { %v1438_v21 = vpop.permute.xlu1 %1437 }
 0x597   : > { %v1448_v23 = vpop.permute.xlu1 %1447 }
 0x64e   : > { %v1800_v29 = vpop.f32.mrb[8].mxu0 }
 0x64f   : > { %v1387_v30 = vadd.f32 %v1800_v29, %v1285_v27  ;;  %v1378_v31 = vpop.f32.mrb[9].mxu0  ;;  %v1820_v27 = vadd.f32 %v1115_v20, %v748_v16  ;;  %v1823_v29 = vadd.f32 %v1105_v18, %v738_v14 }
 0x650   : > { %v1379_v33 = vadd.f32 %v1378_v31, %v1275_v25  ;;  %v1801_v34 = vpop.f32.mrb[10].mxu0  ;;  %v1817_v25 = vadd.f32 %v1100_v17, %v733_v13 }
 0x651   : > { %v1411_v35 = vmul.f32 0.5, %v1387_v30  ;;  %v1390_v36 = vadd.f32 %v1801_v34, %v1290_v28  ;;  %v1381_v37 = vpop.f32.mrb[11].mxu0  ;;  %v1815_v28 = vadd.f32 %v1814_v24, %v1448_v23 }
 0x652   : > { %v1409_v39 = vmul.f32 0.5, %v1379_v33  ;;  %v1382_v40 = vadd.f32 %v1381_v37, %v1280_v26  ;;  %v1453_v26 = vpop.permute.xlu0 %1452  ;;  %v1818_v30 = vadd.f32 %v1817_v25, %v1438_v21 }
 0x653   : > { %1998 = vtanh.f32 %v1411_v35  ;;  %v1412_v41 = vmul.f32 0.5, %v1390_v36  ;;  %v1824_v35 = vadd.f32 %v1823_v29, %v1443_v22 }
 0x654   : > { %2000 = vtanh.f32 %v1409_v39  ;;  %v1410_v42 = vmul.f32 0.5, %v1382_v40 }
 0x655   : > { %2002 = vtanh.f32 %v1412_v41 }
 0x656   : > { %2004 = vtanh.f32 %v1410_v42  ;;  %v1804_v43 = vpop.f32.mrb[12].mxu0 }
 0x657   : > { %v1403_v51 = vadd.f32 %v1804_v43, %v1305_v50  ;;  %v1394_v52 = vpop.f32.mrb[13].mxu0 }
 0x658   : > { %v1395_v44 = vadd.f32 %v1394_v52, %v1295_v32  ;;  %v1805_v46 = vpop.f32.mrb[14].mxu0  ;;  %v1821_v32 = vadd.f32 %v1820_v27, %v1453_v26 }
 0x659   : > { %2006 = vtanh.f32 %v1403_v51  ;;  %v1406_v47 = vadd.f32 %v1805_v46, %v1310_v2  ;;  %v1397_v48 = vpop.f32.mrb[15].mxu0 }
 0x65a   : > { %2008 = vtanh.f32 %v1395_v44  ;;  %v1398_v49 = vadd.f32 %v1397_v48, %v1300_v38 }
 0x65b   : > { %2010 = vtanh.f32 %v1406_v47 }
 0x65c   : > { %2012 = vtanh.f32 %v1398_v49 }
 0x65d   : > { %v1999_v0 = vpop.eup %1998 }
 0x65e   : > { %v2001_v4 = vpop.eup %2000  ;;  %v1419_v1 = vadd.f32 1.0, %v1999_v0 }
 0x65f   : > { %v2003_v53 = vpop.eup %2002  ;;  %v1417_v54 = vadd.f32 1.0, %v2001_v4 }
 0x660   : > { %v2005_v55 = vpop.eup %2004  ;;  %v1420_v56 = vadd.f32 1.0, %v2003_v53  ;;  %v1423_v58 = vmul.f32 0.5, %v1419_v1 }
 0x661   : > { %v1418_v57 = vadd.f32 1.0, %v2005_v55  ;;  %v1421_v60 = vmul.f32 0.5, %v1417_v54 }
 0x662   : > { %v1424_v62 = vmul.f32 0.5, %v1420_v56 }
 0x663   : > { %v2007_v59 = vpop.eup %2006  ;;  %v1422_v5 = vmul.f32 0.5, %v1418_v57 }
 0x664   : > { %v2009_v61 = vpop.eup %2008  ;;  %v1431_v63 = vmul.f32 %v2007_v59, %v1423_v58 }
 0x665   : > { %v2011_v3 = vpop.eup %2010  ;;  %v1429_v6 = vmul.f32 %v2009_v61, %v1421_v60 }
 0x666   : > { %v2013_v7 = vpop.eup %2012  ;;  %v1432_v8 = vmul.f32 %v2011_v3, %v1424_v62 }
 0x667   : > { %v1430_v9 = vmul.f32 %v2013_v7, %v1422_v5 }
 0x668   : > { %v1434_v10 = vpack.c.bf16 %v1432_v8, %v1431_v63 }
 0x669   : > { %v1433_v11 = vpack.c.bf16 %v1430_v9, %v1429_v6 }
 0x66b   : > { %1806 = vmatprep.subr.bf16.mxu1 %v1433_v11 }
 0x66c   : > { %1807 = vmatpush3.bf16.msra.mxu1 %v1433_v11 }
 0x66d   : > { %1808 = vmatprep.subr.bf16.mxu1 %v1434_v10 }
 0x670   : > { %1809 = vmatpush3.bf16.msra.mxu1 %v1434_v10 }
 0x673   : > { %1811 = vmatmul.mubr.msk.bf16.vlgmr.msra.gmra.mrb[4].mxu1 %vm770_vm1, %v1965_v12 }
 0x746   : > { %v1812_v31 = vpop.f32.mrb[4].mxu1 }
 0x747   : > { %v1816_v33 = vadd.f32 %v1815_v28, %v1812_v31  ;;  %v1505_v34 = vpop.f32.mrb[5].mxu1 }
 0x748   : > { %v1819_v36 = vadd.f32 %v1818_v30, %v1505_v34  ;;  %v1813_v37 = vpop.f32.mrb[6].mxu1 }
 0x749   : > { %v1526_v38 = vmul.f32 %v1816_v33, %v2300_v45  ;;  %v1822_v39 = vadd.f32 %v1821_v32, %v1813_v37  ;;  %v1508_v40 = vpop.f32.mrb[7].mxu1 }
 0x74a   : > { %v1524_v41 = vmul.f32 %v1819_v36, %v2300_v45  ;;  %v1825_v42 = vadd.f32 %v1824_v35, %v1508_v40 }
 0x74b   : > { %1530 = vst [vmem:[%s471_s28 + $0x10] sm:$0xff] %v1526_v38  ;;  %v1527_v50 = vmul.f32 %v1822_v39, %v2300_v45 }
 0x74c   : > { %1528 = vst [vmem:[%s471_s28] sm:$0xff] %v1524_v41  ;;  %v1525_v43 = vmul.f32 %v1825_v42, %v2300_v45 }
 0x74d   : > { %1531 = vst [vmem:[%s471_s28 + $0x18] sm:$0xff] %v1527_v50 }
 0x74e   : > { %1529 = vst [vmem:[%s471_s28 + $0x8] sm:$0xff] %v1525_v43 }
 0x74f   : > { %2027 = shalt.err (!%p2024_p3)
}
 0x750   : > { %s2028_s27 = scalar_lea.hbm %s2513_s17, 512  ;;  %s2032_s15 = scalar_lea.hbm %s2573_s14, 1024 }
 0x751   : > { %p2029_p4 = scmp.ne.s32.totalorder %s2513_s17, %s2028_s27  ;;  %p2033_p9 = scmp.lt.u32.totalorder %s2513_s17, %s2573_s14 }
 0x752   : > { %p2034_p10 = scmp.lt.u32.totalorder %s2032_s15, %s2028_s27  ;;  %p2036_p12 = scmp.lt.u32.totalorder %s2028_s27, %s2513_s17 }
 0x753   : > { %p2030_p7 = pnand %p2029_p4, %p2201_p5 }
 0x754   : > { %p2035_p11 = por %p2034_p10, %p2033_p9 }
 0x755   : > { %p2031_p8 = pneg %p2030_p7 }
 0x756   : > { %p2037_p13 = por %p2036_p12, %p2035_p11 }
 0x758   : > { %p2038_p0 = pnand %p2037_p13, %p2031_p8 }
 0x75a   : > { %2041 = shalt.err (!%p2038_p0)
}
 0x75b   : > { %s2086_s21 = smov 128   ;;  %s2087_s25 = smov 8  }
 0x75c   : > { %1834 = dma.vmem_to_hbm [thread:$0]  (%p2201_p5), %s2507_s22, 512, %s2513_s17, %s2518_s20, %s2086_s21, %s2086_s21, %s2087_s25  }
 0x75d PF: > { %p1840_p1 = scmp.ge.s32.totalorder %s2076_s16, 2  ;;  %s1561_s0 = sand.u32 1, %s2064_s29  }
 0x75e   : > { %s1562_s27 = scalar_lea.sflag [#allocation3], %s1561_s0 }
 0x75f   : > { %p1837_p2 = pnand %p1840_p1, %p2205_p6 }
 0x761   : > { %2059 = dma.done.wait (!%p1837_p2), %s1562_s27, 512  }
 0x762   : > { %2061 = vsyncadd (!%p1837_p2), %s1562_s27, 4294966784  ;;  %s2584_s16 = sld [smem:[#allocation6_spill]]  ;;  %s2585_s28 = sld [smem:[#allocation5_spill]] }
 0x763   : > { %s2586_s15 = sld [smem:[#allocation7_spill]]  ;;  %s2587_s29 = smov %s2068_s30 }
 0x768   : > { %p24_p3 = scmp.ge.s32.totalorder %s2584_s16, 4   ;;  %s2588_s30 = smov %s2585_s28 }
 0x76a   :  { %26 = sbr.rel (!%p24_p3) target bundleno = 5 (0x5), region = 114 }
 0x771   :  { %1567 = vsyncpa [#allocation3], 1 }
 0x772   :  { %1569 = vsyncpa [#allocation3 + $0x1], 1 }

// kernel: tpu_custom_call.1
= control target key start
LH: loop header
LB: loop body
LE: loop exit
PB: predicated region body
PF: predicated region fallthrough
CT: control target
= control target key end

     0   :  { %s2559_s0 = inlined_call_operand.vmem [shape: f32[2,32,128], index: 0, kind: input, shape index: {}]   ;;  %s2560_s1 = inlined_call_operand.vmem [shape: f32[2,1,128], index: 1, kind: input, shape index: {}]   ;;  %s2561_s2 = inlined_call_operand.vmem [shape: bf16[64,96], index: 2, kind: input, shape index: {}]   ;;  %s2562_s3 = inlined_call_operand.vmem [shape: f32[64,1], index: 3, kind: input, shape index: {}]   ;;  %s2563_s4 = inlined_call_operand.vmem [shape: bf16[64,32], index: 4, kind: input, shape index: {}]   ;;  %s2564_s5 = inlined_call_operand.vmem [shape: f32[64,1], index: 5, kind: input, shape index: {}]   ;;  %s2565_s6 = inlined_call_operand.vmem [shape: bf16[64,96], index: 6, kind: input, shape index: {}]   ;;  %s2566_s7 = inlined_call_operand.vmem [shape: f32[64,1], index: 7, kind: input, shape index: {}]   ;;  %s2567_s8 = inlined_call_operand.vmem [shape: bf16[64,32], index: 8, kind: input, shape index: {}]   ;;  %s2568_s9 = inlined_call_operand.vmem [shape: f32[64,1], index: 9, kind: input, shape index: {}]   ;;  %s2569_s10 = inlined_call_operand.vmem [shape: bf16[64,96], index: 10, kind: input, shape index: {}]   ;;  %s2570_s11 = inlined_call_operand.vmem [shape: f32[64,1], index: 11, kind: input, shape index: {}]   ;;  %s2571_s12 = inlined_call_operand.vmem [shape: bf16[32,32], index: 12, kind: input, shape index: {}]   ;;  %s2572_s13 = inlined_call_operand.vmem [shape: f32[32,1], index: 13, kind: input, shape index: {}]   ;;  %s2573_s14 = inlined_call_operand.hbm [shape: f32[2,32,128], index: 14, kind: output, shape index: {}]  }
   0x1   :  { %2577 = sst [smem:[#allocation8_spill]] %s2559_s0 }
   0x2   :  { %19 = vsyncpa [#allocation3], 0 }
   0x3   :  { %21 = vsyncpa [#allocation3 + $0x1], 0  ;;  %s2163_s29 = smov 0   ;;  %s2165_s30 = smov 0  }
   0x4   :  { %s2167_s15 = smov 0   ;;  %s2169_s16 = smov 0  }
   0x5 LB: > { %2578 = sst [smem:[#allocation5_spill]] %s2072_s15  ;;  %s2184_s17 = sadd.s32 4294967295, %s2076_s16   ;;  %s2076_s16 = sphi %s2169_s16, %s2584_s16   ;;  %s2072_s15 = sphi %s2167_s15, %s2586_s15   ;;  %s2068_s30 = sphi %s2165_s30, %s2588_s30   ;;  %s2064_s29 = sphi %s2163_s29, %s2587_s29  }
   0x6   : > { %s1617_s18 = sadd.s32 4294967294, %s2076_s16   ;;  %s2188_s19 = sadd.s32 1, %s2076_s16  }
   0x7   : > { %2579 = sst [smem:[#allocation6_spill]] %s2188_s19  ;;  %s338_s20 = sadd.s32 1, %s2072_s15 }
   0x8   : > { %s335_s21 = ssub.s32 %s2076_s16, %s2188_s19  ;;  %p348_p0 = scmp.ne.s32.totalorder %s2072_s15, %s2068_s30 }
   0x9   : > { %p336_p1 = scmp.eq.s32.totalorder %s335_s21, 0  ;;  %p349_p2 = scmp.eq.s32.totalorder %s2184_s17, 1 }
   0xa   : > { %p354_p3 = scmp.ne.s32.totalorder %s2068_s30, %s2064_s29  ;;  %p355_p4 = scmp.eq.s32.totalorder %s1617_s18, 1 }
   0xb   : > { %s2199_s22 = scalar_select %p336_p1, %s2072_s15, %s338_s20  }
   0xc   : > { %p2201_p5 = por %p349_p2, %p348_p0  ;;  %p2205_p6 = por %p355_p4, %p354_p3 }
   0xd   : > { %2580 = sst [smem:[#allocation7_spill]] %s2199_s22  ;;  %p1620_p7 = scmp.ge.s32.totalorder %s2076_s16, 1 }
   0xe   : > { %p423_p8 = scmp.lt.s32.totalorder %s2076_s16, 3 }
  0x10   : > { %p424_p9 = pnand %p1620_p7, %p423_p8 }
  0x11   : > { %p472_p10 = scmp.lt.s32.totalorder (!%p424_p9), %s2184_s17, 1  ;;  %s2583_s0 = sld [smem:[#allocation8_spill]] (!%p424_p9)  ;;  %v1944_v6 = vld [vmem:[%s2561_s2] sm:$0xff] (!%p424_p9)   ;;  %vm606_vm0 = vcmask (!%p424_p9), 785408   ;;  %v501_v7 = vld [vmem:[%s2562_s3 + $0x8] sm:$0xff] (!%p424_p9)  ;;  %v2080_v9 = vmov (!%p424_p9), 0  }
  0x12   : > { %427 = sbr.rel (%p424_p9) target bundleno = 1885 (0x75d), region = 76  ;;  %s2078_s20 = smov (!%p424_p9), 1   ;;  %1734 = vmatprep.mubr.msk.bf16.mxu0 (!%p424_p9), %vm606_vm0, %v1944_v6  ;;  %v500_v8 = vld [vmem:[%s2562_s3] sm:$0xff] (!%p424_p9)  ;;  %1903 = vset.pattern.permute.xlu1 (!%p424_p9), %v2080_v9  ;;  %v502_v10 = vld [vmem:[%s2562_s3 + $0x10] sm:$0xff] (!%p424_p9)  ;;  %v503_v11 = vld [vmem:[%s2562_s3 + $0x18] sm:$0xff] (!%p424_p9)  ;;  %vm770_vm1 = vcmask (!%p424_p9), 261120  }
  0x13   : > { %s2079_s21 = smov (!%p424_p9), 127   ;;  %1902 = vset.pattern.permute.xlu0 (!%p424_p9), %v2080_v9  ;;  %v504_v12 = vld [vmem:[%s2562_s3 + $0x20] sm:$0xff] (!%p424_p9)  ;;  %v505_v13 = vld [vmem:[%s2562_s3 + $0x28] sm:$0xff] (!%p424_p9)  ;;  %v506_v14 = vld [vmem:[%s2562_s3 + $0x30] sm:$0xff] (!%p424_p9)  ;;  %s2082_s27 = smov (!%p424_p9), 126  }
  0x14   : > { %v507_v15 = vld [vmem:[%s2562_s3 + $0x38] sm:$0xff] (!%p424_p9)  ;;  %v516_v16 = vld [vmem:[%s2564_s5] sm:$0xff] (!%p424_p9)  ;;  %v517_v17 = vld [vmem:[%s2564_s5 + $0x8] sm:$0xff] (!%p424_p9) }
  0x15   : > { %v518_v18 = vld [vmem:[%s2564_s5 + $0x10] sm:$0xff] (!%p424_p9)  ;;  %v519_v19 = vld [vmem:[%s2564_s5 + $0x18] sm:$0xff] (!%p424_p9)  ;;  %v1945_v38 = vld [vmem:[%s2561_s2 + $0x8] sm:$0xff] (!%p424_p9)  }
  0x16   : > { %v1946_v39 = vld [vmem:[%s2561_s2 + $0x10] sm:$0xff] (!%p424_p9)   ;;  %v1947_v40 = vld [vmem:[%s2561_s2 + $0x18] sm:$0xff] (!%p424_p9)   ;;  %v1948_v41 = vld [vmem:[%s2563_s4] sm:$0xff] (!%p424_p9)  }
  0x17   : > { %1746 = vmatprep.mubr.msk.bf16.mxu1 (!%p424_p9), %vm770_vm1, %v1948_v41 }
  0x19   : > { %s2213_s25 = scalar_select %p472_p10, %s2184_s17, 1 }
  0x1b   : > { %s1674_s26 = sshll.u32 %s2213_s25, 5 }
  0x1c   : > { %s476_s18 = scalar_lea.vmem %s2583_s0, %s1674_s26  ;;  %s479_s26 = scalar_lea.vmem %s2560_s1, %s2213_s25 }
  0x1d   : > { %v2219_v0 = vld [vmem:[%s476_s18] sm:$0xff]  ;;  %v2221_v1 = vld [vmem:[%s476_s18 + $0x8] sm:$0xff]  ;;  %v2223_v2 = vld [vmem:[%s476_s18 + $0x10] sm:$0xff]  ;;  %s2081_s25 = smov 2  }
  0x1e   : > { %v1882_v3 = vpack.i.bf16 %v2221_v1, %v2219_v0  ;;  %v2227_v4 = vld [vmem:[%s476_s18 + $0x18] sm:$0xff]  ;;  %v542_v29 = vpack.c.bf16 %v2221_v1, %v2219_v0  ;;  %s1675_s18 = sshll.u32 %s2184_s17, 9 }
  0x1f   : > { %v1887_v5 = vpack.i.bf16 %v2227_v4, %v2223_v2  ;;  %v543_v32 = vpack.c.bf16 %v2227_v4, %v2223_v2  ;;  %s2513_s17 = scalar_lea.hbm %s2573_s14, %s1675_s18 }
  0x20   : > { %1883 = vrot.lane.b32.xlu0 %v1882_v3, %s2078_s20  ;;  %1893 = vrot.lane.b32.xlu1 %v1882_v3, %s2079_s21 }
  0x24   : > { %1888 = vrot.lane.b32.xlu0 %v1887_v5, %s2078_s20  ;;  %1898 = vrot.lane.b32.xlu1 %v1887_v5, %s2079_s21  ;;  %s2083_s21 = smov 4  }
  0x28   : > { %553 = vperm.xlu1 %1903, %v501_v7   ;;  %548 = vperm.xlu0 %1902, %v500_v8  }
  0x2c   : > { %558 = vperm.xlu1 %1903, %v502_v10   ;;  %563 = vperm.xlu0 %1902, %v503_v11  }
  0x30   : > { %568 = vperm.xlu1 %1903, %v504_v12   ;;  %573 = vperm.xlu0 %1902, %v505_v13  }
  0x34   : > { %578 = vperm.xlu1 %1903, %v506_v14   ;;  %583 = vperm.xlu0 %1902, %v507_v15  }
  0x38   : > { %712 = vperm.xlu1 %1903, %v516_v16   ;;  %717 = vperm.xlu0 %1902, %v517_v17  }
  0x3c   : > { %722 = vperm.xlu1 %1903, %v518_v18   ;;  %727 = vperm.xlu0 %1902, %v519_v19  }
  0x92   : > { %v1884_v20 = vpop.permute.xlu0 %1883  ;;  %v1894_v27 = vpop.permute.xlu1 %1893 }
  0x93   : > { %v1886_v21 = vunpack.i.h.bf16 %v1884_v20  ;;  %v1885_v22 = vunpack.i.l.bf16 %v1884_v20  ;;  %v1896_v30 = vunpack.i.h.bf16 %v1894_v27  ;;  %v1895_v31 = vunpack.i.l.bf16 %v1894_v27 }
  0x95   : > { %v540_v23 = vpack.c.bf16 %v1886_v21, %v1885_v22  ;;  %v544_v34 = vpack.c.bf16 %v1896_v30, %v1895_v31 }
  0x96   : > { %v1889_v24 = vpop.permute.xlu0 %1888  ;;  %v1899_v33 = vpop.permute.xlu1 %1898 }
  0x97   : > { %v1891_v25 = vunpack.i.h.bf16 %v1889_v24  ;;  %v1890_v26 = vunpack.i.l.bf16 %v1889_v24  ;;  %1722 = vmatprep.subr.bf16.mxu0 %v540_v23  ;;  %v1901_v35 = vunpack.i.h.bf16 %v1899_v33  ;;  %v1900_v36 = vunpack.i.l.bf16 %v1899_v33 }
  0x98   : > { %1723 = vmatpush3.bf16.msra.mxu0 %v540_v23 }
  0x99   : > { %v541_v28 = vpack.c.bf16 %v1891_v25, %v1890_v26  ;;  %v545_v37 = vpack.c.bf16 %v1901_v35, %v1900_v36 }
  0x9b   : > { %1724 = vmatprep.subr.bf16.mxu0 %v541_v28 }
  0x9c   : > { %1725 = vmatpush3.bf16.msra.mxu0 %v541_v28 }
  0x9d   : > { %1726 = vmatprep.subr.bf16.mxu0 %v542_v29 }
  0xa0   : > { %1727 = vmatpush3.bf16.msra.mxu0 %v542_v29 }
  0xa1   : > { %1728 = vmatprep.subr.bf16.mxu0 %v543_v32 }
  0xa4   : > { %1729 = vmatpush3.bf16.msra.mxu0 %v543_v32  ;;  %v1949_v32 = vld [vmem:[%s2563_s4 + $0x8] sm:$0xff]  }
  0xa5   : > { %1730 = vmatprep.subr.bf16.mxu0 %v544_v34 }
  0xa7   : > { %v554_v42 = vpop.permute.xlu1 %553  ;;  %v549_v43 = vpop.permute.xlu0 %548 }
  0xa8   : > { %1731 = vmatpush3.bf16.msra.mxu0 %v544_v34 }
  0xa9   : > { %1732 = vmatprep.subr.bf16.mxu0 %v545_v37 }
  0xab   : > { %v559_v44 = vpop.permute.xlu1 %558  ;;  %v564_v45 = vpop.permute.xlu0 %563 }
  0xac   : > { %1733 = vmatpush3.bf16.msra.mxu0 %v545_v37 }
  0xaf   : > { %1735 = vmatmul.mubr.msk.bf16.vlgmr.msra.gmra.mrb[0].mxu0 %vm606_vm0, %v1945_v38  ;;  %v569_v49 = vpop.permute.xlu1 %568  ;;  %v574_v55 = vpop.permute.xlu0 %573 }
  0xb0   : > { %1738 = vmatprep.mubr.msk.bf16.mxu0 %vm606_vm0, %v1946_v39 }
  0xb3   : > { %v579_v60 = vpop.permute.xlu1 %578  ;;  %v584_v3 = vpop.permute.xlu0 %583 }
  0xb7   : > { %1739 = vmatmul.mubr.msk.bf16.gmra.mrb[4].mxu0 %vm606_vm0, %v1947_v40  ;;  %v713_v33 = vpop.permute.xlu1 %712  ;;  %v718_v34 = vpop.permute.xlu0 %717 }
  0xbb   : > { %v723_v35 = vpop.permute.xlu1 %722  ;;  %v728_v39 = vpop.permute.xlu0 %727 }
 0x182   : > { %v1736_v46 = vpop.f32.mrb[0].mxu0 }
 0x183   : > { %v662_v47 = vadd.f32 %v1736_v46, %v559_v44  ;;  %v653_v48 = vpop.f32.mrb[1].mxu0 }
 0x184   : > { %v654_v50 = vadd.f32 %v653_v48, %v549_v43  ;;  %v1737_v51 = vpop.f32.mrb[2].mxu0 }
 0x185   : > { %v686_v52 = vmul.f32 0.5, %v662_v47  ;;  %v665_v53 = vadd.f32 %v1737_v51, %v564_v45  ;;  %v656_v54 = vpop.f32.mrb[3].mxu0  ;;  %v2300_v45 = vld [vmem:[%s479_s26] ss:$0 sm:$0xff]  ;;  %s2084_s26 = smov 124  }
 0x186   : > { %v684_v56 = vmul.f32 0.5, %v654_v50  ;;  %v657_v57 = vadd.f32 %v656_v54, %v554_v42  ;;  %v868_v54 = vld [vmem:[%s2566_s7] sm:$0xff] }
 0x187   : > { %1966 = vtanh.f32 %v686_v52  ;;  %v687_v58 = vmul.f32 0.5, %v665_v53  ;;  %v1950_v53 = vld [vmem:[%s2563_s4 + $0x10] sm:$0xff]  }
 0x188   : > { %1968 = vtanh.f32 %v684_v56  ;;  %v685_v59 = vmul.f32 0.5, %v657_v57  ;;  %v871_v56 = vld [vmem:[%s2566_s7 + $0x18] sm:$0xff]  ;;  %v870_v57 = vld [vmem:[%s2566_s7 + $0x10] sm:$0xff] }
 0x189   : > { %1970 = vtanh.f32 %v687_v58  ;;  %v873_v58 = vld [vmem:[%s2566_s7 + $0x28] sm:$0xff] }
 0x18a   : > { %1972 = vtanh.f32 %v685_v59  ;;  %v1740_v61 = vpop.f32.mrb[4].mxu0  ;;  %v1952_v59 = vld [vmem:[%s2565_s6] sm:$0xff]  }
 0x18b   : > { %v678_v62 = vadd.f32 %v1740_v61, %v579_v60  ;;  %v669_v63 = vpop.f32.mrb[5].mxu0  ;;  %v872_v60 = vld [vmem:[%s2566_s7 + $0x20] sm:$0xff]  ;;  %v875_v61 = vld [vmem:[%s2566_s7 + $0x38] sm:$0xff] }
 0x18c   : > { %v670_v5 = vadd.f32 %v669_v63, %v569_v49  ;;  %v1741_v6 = vpop.f32.mrb[6].mxu0  ;;  %v885_v63 = vld [vmem:[%s2568_s9 + $0x8] sm:$0xff] }
 0x18d   : > { %1974 = vtanh.f32 %v678_v62  ;;  %v681_v7 = vadd.f32 %v1741_v6, %v584_v3  ;;  %v672_v8 = vpop.f32.mrb[7].mxu0  ;;  %v874_v62 = vld [vmem:[%s2566_s7 + $0x30] sm:$0xff]  ;;  %v884_v3 = vld [vmem:[%s2568_s9] sm:$0xff] }
 0x18e   : > { %1976 = vtanh.f32 %v670_v5  ;;  %v673_v9 = vadd.f32 %v672_v8, %v574_v55  ;;  %v1951_v55 = vld [vmem:[%s2563_s4 + $0x18] sm:$0xff]   ;;  %v886_v6 = vld [vmem:[%s2568_s9 + $0x10] sm:$0xff] }
 0x18f   : > { %1978 = vtanh.f32 %v681_v7  ;;  %v887_v5 = vld [vmem:[%s2568_s9 + $0x18] sm:$0xff] }
 0x190   : > { %1980 = vtanh.f32 %v673_v9 }
 0x191   : > { %v1967_v10 = vpop.eup %1966 }
 0x192   : > { %v1969_v11 = vpop.eup %1968  ;;  %v694_v12 = vadd.f32 1.0, %v1967_v10 }
 0x193   : > { %v1971_v13 = vpop.eup %1970  ;;  %v692_v14 = vadd.f32 1.0, %v1969_v11 }
 0x194   : > { %v1973_v15 = vpop.eup %1972  ;;  %v695_v16 = vadd.f32 1.0, %v1971_v13  ;;  %v698_v18 = vmul.f32 0.5, %v694_v12 }
 0x195   : > { %v693_v17 = vadd.f32 1.0, %v1973_v15  ;;  %v696_v20 = vmul.f32 0.5, %v692_v14 }
 0x196   : > { %v699_v22 = vmul.f32 0.5, %v695_v16 }
 0x197   : > { %v1975_v19 = vpop.eup %1974  ;;  %v697_v25 = vmul.f32 0.5, %v693_v17 }
 0x198   : > { %v1977_v21 = vpop.eup %1976  ;;  %v706_v23 = vmul.f32 %v1975_v19, %v698_v18 }
 0x199   : > { %v1979_v24 = vpop.eup %1978  ;;  %v704_v26 = vmul.f32 %v1977_v21, %v696_v20 }
 0x19a   : > { %v1981_v27 = vpop.eup %1980  ;;  %v707_v28 = vmul.f32 %v1979_v24, %v699_v22 }
 0x19b   : > { %v705_v29 = vmul.f32 %v1981_v27, %v697_v25  ;;  %v1953_v25 = vld [vmem:[%s2565_s6 + $0x8] sm:$0xff]   ;;  %v1955_v27 = vld [vmem:[%s2565_s6 + $0x18] sm:$0xff]  }
 0x19c   : > { %v709_v30 = vpack.c.bf16 %v707_v28, %v706_v23  ;;  %v1956_v28 = vld [vmem:[%s2567_s8] sm:$0xff]  }
 0x19d   : > { %v708_v31 = vpack.c.bf16 %v705_v29, %v704_v26  ;;  %v1954_v26 = vld [vmem:[%s2565_s6 + $0x10] sm:$0xff]  }
 0x19f   : > { %1742 = vmatprep.subr.bf16.mxu1 %v708_v31 }
 0x1a0   : > { %1743 = vmatpush3.bf16.msra.mxu1 %v708_v31 }
 0x1a1   : > { %1744 = vmatprep.subr.bf16.mxu1 %v709_v30 }
 0x1a4   : > { %1745 = vmatpush3.bf16.msra.mxu1 %v709_v30 }
 0x1a7   : > { %1747 = vmatmul.mubr.msk.bf16.vlgmr.msra.gmra.mrb[0].mxu1 %vm770_vm1, %v1949_v32 }
 0x1a8   : > { %1750 = vmatprep.mubr.msk.bf16.mxu1 %vm770_vm1, %v1950_v53 }
 0x1af   : > { %1751 = vmatmul.mubr.msk.bf16.gmra.mrb[4].mxu1 %vm770_vm1, %v1951_v55 }
 0x1b0   : > { %1766 = vmatprep.mubr.msk.bf16.mxu1 %vm606_vm0, %v1952_v59 }
 0x27a   : > { %v1748_v36 = vpop.f32.mrb[0].mxu1 }
 0x27b   : > { %v826_v37 = vadd.f32 %v1748_v36, %v723_v35  ;;  %v817_v38 = vpop.f32.mrb[1].mxu1 }
 0x27c   : > { %v818_v40 = vadd.f32 %v817_v38, %v713_v33  ;;  %v1749_v41 = vpop.f32.mrb[2].mxu1 }
 0x27d   : > { %v850_v42 = vadd.f32 %v826_v37, %v2223_v2  ;;  %v829_v43 = vadd.f32 %v1749_v41, %v728_v39  ;;  %v820_v44 = vpop.f32.mrb[3].mxu1 }
 0x27e   : > { %v848_v46 = vadd.f32 %v818_v40, %v2219_v0  ;;  %v821_v47 = vadd.f32 %v820_v44, %v718_v34 }
 0x27f   : > { %v851_v48 = vadd.f32 %v829_v43, %v2227_v4  ;;  %v2306_v50 = vmul.f32 %v2300_v45, %v850_v42 }
 0x280   : > { %v849_v49 = vadd.f32 %v821_v47, %v2221_v1  ;;  %v2312_v52 = vmul.f32 %v2300_v45, %v848_v46  ;;  %v869_v1 = vld [vmem:[%s2566_s7 + $0x8] sm:$0xff] }
 0x281   : > { %v2309_v51 = vmul.f32 %v2300_v45, %v851_v48 }
 0x282   : > { %v2315_v2 = vmul.f32 %v2300_v45, %v849_v49 }
 0x283   : > { %v1909_v0 = vpack.i.bf16 %v2309_v51, %v2306_v50  ;;  %v911_v19 = vpack.c.bf16 %v2309_v51, %v2306_v50 }
 0x284   : > { %v1904_v4 = vpack.i.bf16 %v2315_v2, %v2312_v52  ;;  %v910_v15 = vpack.c.bf16 %v2315_v2, %v2312_v52 }
 0x285   : > { %1910 = vrot.lane.b32.xlu0 %v1909_v0, %s2081_s25 }
 0x286   : > { %1905 = vrot.lane.b32.xlu1 %v1904_v4, %s2081_s25 }
 0x289   : > { %1920 = vrot.lane.b32.xlu0 %v1909_v0, %s2082_s27 }
 0x28a   : > { %1915 = vrot.lane.b32.xlu1 %v1904_v4, %s2082_s27  ;;  %s469_s27 = sand.u32 1, %s2068_s30  }
 0x28b   : > { %s1621_s0 = sshll.u32 %s469_s27, 5  ;;  %s2518_s20 = scalar_lea.sflag [#allocation3], %s469_s27 }
 0x28c   : > { %s471_s28 = scalar_lea.vmem [#allocation2], %s1621_s0 }
 0x28d   : > { %921 = vperm.xlu0 %1902, %v869_v1   ;;  %s1546_s22 = sshll.u32 %s471_s28, 4  ;;  %s2507_s22 = int_to_ptr.vmem [resolvable:$true] %s1546_s22 }
 0x28e   : > { %916 = vperm.xlu1 %1903, %v868_v54  }
 0x291   : > { %931 = vperm.xlu0 %1902, %v871_v56  }
 0x292   : > { %926 = vperm.xlu1 %1903, %v870_v57  }
 0x295   : > { %941 = vperm.xlu0 %1902, %v873_v58  }
 0x296   : > { %936 = vperm.xlu1 %1903, %v872_v60  }
 0x299   : > { %951 = vperm.xlu0 %1902, %v875_v61  }
 0x29a   : > { %946 = vperm.xlu1 %1903, %v874_v62  }
 0x29d   : > { %1084 = vperm.xlu0 %1902, %v885_v63  }
 0x29e   : > { %1079 = vperm.xlu1 %1903, %v884_v3  }
 0x2a1   : > { %1094 = vperm.xlu0 %1902, %v887_v5  }
 0x2a2   : > { %1089 = vperm.xlu1 %1903, %v886_v6  }
 0x2f7   : > { %v1911_v7 = vpop.permute.xlu0 %1910 }
 0x2f8   : > { %v1906_v8 = vpop.permute.xlu1 %1905  ;;  %v1913_v9 = vunpack.i.h.bf16 %v1911_v7  ;;  %v1912_v10 = vunpack.i.l.bf16 %v1911_v7 }
 0x2f9   : > { %v1908_v11 = vunpack.i.h.bf16 %v1906_v8  ;;  %v1907_v12 = vunpack.i.l.bf16 %v1906_v8 }
 0x2fa   : > { %v909_v14 = vpack.c.bf16 %v1913_v9, %v1912_v10 }
 0x2fb   : > { %v908_v13 = vpack.c.bf16 %v1908_v11, %v1907_v12  ;;  %v1921_v20 = vpop.permute.xlu0 %1920 }
 0x2fc   : > { %v1916_v16 = vpop.permute.xlu1 %1915  ;;  %v1923_v21 = vunpack.i.h.bf16 %v1921_v20  ;;  %v1922_v22 = vunpack.i.l.bf16 %v1921_v20  ;;  %v1957_v20 = vld [vmem:[%s2567_s8 + $0x8] sm:$0xff]  }
 0x2fd   : > { %1754 = vmatprep.subr.bf16.mxu1 %v908_v13  ;;  %v1918_v17 = vunpack.i.h.bf16 %v1916_v16  ;;  %v1917_v18 = vunpack.i.l.bf16 %v1916_v16 }
 0x2fe   : > { %1755 = vmatpush3.bf16.msra.mxu1 %v908_v13  ;;  %v913_v24 = vpack.c.bf16 %v1923_v21, %v1922_v22 }
 0x2ff   : > { %1756 = vmatprep.subr.bf16.mxu1 %v909_v14  ;;  %v912_v23 = vpack.c.bf16 %v1918_v17, %v1917_v18 }
 0x302   : > { %1757 = vmatpush3.bf16.msra.mxu1 %v909_v14 }
 0x303   : > { %1758 = vmatprep.subr.bf16.mxu1 %v910_v15 }
 0x306   : > { %1759 = vmatpush3.bf16.msra.mxu1 %v910_v15 }
 0x307   : > { %1760 = vmatprep.subr.bf16.mxu1 %v911_v19 }
 0x30a   : > { %1761 = vmatpush3.bf16.msra.mxu1 %v911_v19 }
 0x30b   : > { %1762 = vmatprep.subr.bf16.mxu1 %v912_v23 }
 0x30c   : > { %v922_v30 = vpop.permute.xlu0 %921 }
 0x30d   : > { %v917_v29 = vpop.permute.xlu1 %916 }
 0x30e   : > { %1763 = vmatpush3.bf16.msra.mxu1 %v912_v23 }
 0x30f   : > { %1764 = vmatprep.subr.bf16.mxu1 %v913_v24 }
 0x310   : > { %v932_v32 = vpop.permute.xlu0 %931 }
 0x311   : > { %v927_v31 = vpop.permute.xlu1 %926 }
 0x312   : > { %1765 = vmatpush3.bf16.msra.mxu1 %v913_v24 }
 0x314   : > { %v942_v42 = vpop.permute.xlu0 %941 }
 0x315   : > { %1767 = vmatmul.mubr.msk.bf16.vlgmr.msra.gmra.mrb[8].mxu1 %vm606_vm0, %v1953_v25  ;;  %v937_v36 = vpop.permute.xlu1 %936 }
 0x316   : > { %1770 = vmatprep.mubr.msk.bf16.mxu1 %vm606_vm0, %v1954_v26 }
 0x318   : > { %v952_v1 = vpop.permute.xlu0 %951 }
 0x319   : > { %v947_v48 = vpop.permute.xlu1 %946 }
 0x31c   : > { %v1085_v22 = vpop.permute.xlu0 %1084 }
 0x31d   : > { %1771 = vmatmul.mubr.msk.bf16.gmra.mrb[12].mxu1 %vm606_vm0, %v1955_v27  ;;  %v1080_v21 = vpop.permute.xlu1 %1079 }
 0x31e   : > { %1778 = vmatprep.mubr.msk.bf16.mxu1 %vm770_vm1, %v1956_v28 }
 0x320   : > { %v1095_v27 = vpop.permute.xlu0 %1094 }
 0x321   : > { %v1090_v23 = vpop.permute.xlu1 %1089 }
 0x3e8   : > { %v1768_v33 = vpop.f32.mrb[8].mxu1 }
 0x3e9   : > { %v1029_v34 = vadd.f32 %v1768_v33, %v927_v31  ;;  %v1020_v35 = vpop.f32.mrb[9].mxu1 }
 0x3ea   : > { %v1021_v37 = vadd.f32 %v1020_v35, %v917_v29  ;;  %v1769_v38 = vpop.f32.mrb[10].mxu1 }
 0x3eb   : > { %v1053_v39 = vmul.f32 0.5, %v1029_v34  ;;  %v1032_v40 = vadd.f32 %v1769_v38, %v932_v32  ;;  %v1023_v41 = vpop.f32.mrb[11].mxu1 }
 0x3ec   : > { %v1051_v43 = vmul.f32 0.5, %v1021_v37  ;;  %v1024_v44 = vadd.f32 %v1023_v41, %v922_v30 }
 0x3ed   : > { %1982 = vtanh.f32 %v1053_v39  ;;  %v1054_v46 = vmul.f32 0.5, %v1032_v40 }
 0x3ee   : > { %1984 = vtanh.f32 %v1051_v43  ;;  %v1052_v47 = vmul.f32 0.5, %v1024_v44  ;;  %v1236_v44 = vld [vmem:[%s2570_s11 + $0x10] sm:$0xff] }
 0x3ef   : > { %1986 = vtanh.f32 %v1054_v46  ;;  %v1239_v46 = vld [vmem:[%s2570_s11 + $0x28] sm:$0xff] }
 0x3f0   : > { %1988 = vtanh.f32 %v1052_v47  ;;  %v1772_v49 = vpop.f32.mrb[12].mxu1  ;;  %v1958_v47 = vld [vmem:[%s2569_s10] sm:$0xff]  }
 0x3f1   : > { %v1045_v0 = vadd.f32 %v1772_v49, %v947_v48  ;;  %v1036_v4 = vpop.f32.mrb[13].mxu1  ;;  %v1238_v48 = vld [vmem:[%s2570_s11 + $0x20] sm:$0xff]  ;;  %1798 = vmatprep.mubr.msk.bf16.mxu0 %vm606_vm0, %v1958_v47  ;;  %v1241_v49 = vld [vmem:[%s2570_s11 + $0x38] sm:$0xff] }
 0x3f2   : > { %v1037_v53 = vadd.f32 %v1036_v4, %v937_v36  ;;  %v1773_v54 = vpop.f32.mrb[14].mxu1  ;;  %v521_v4 = vld [vmem:[%s2564_s5 + $0x28] sm:$0xff] }
 0x3f3   : > { %1990 = vtanh.f32 %v1045_v0  ;;  %v1048_v55 = vadd.f32 %v1773_v54, %v952_v1  ;;  %v1039_v56 = vpop.f32.mrb[15].mxu1  ;;  %v1240_v0 = vld [vmem:[%s2570_s11 + $0x30] sm:$0xff]  ;;  %v520_v1 = vld [vmem:[%s2564_s5 + $0x20] sm:$0xff] }
 0x3f4   : > { %1992 = vtanh.f32 %v1037_v53  ;;  %v1040_v57 = vadd.f32 %v1039_v56, %v942_v42  ;;  %v523_v53 = vld [vmem:[%s2564_s5 + $0x38] sm:$0xff]  ;;  %v522_v54 = vld [vmem:[%s2564_s5 + $0x30] sm:$0xff]  ;;  %v888_v56 = vld [vmem:[%s2568_s9 + $0x20] sm:$0xff] }
 0x3f5   : > { %1994 = vtanh.f32 %v1048_v55  ;;  %v889_v55 = vld [vmem:[%s2568_s9 + $0x28] sm:$0xff] }
 0x3f6   : > { %1996 = vtanh.f32 %v1040_v57  ;;  %v891_v57 = vld [vmem:[%s2568_s9 + $0x38] sm:$0xff] }
 0x3f7   : > { %v1983_v58 = vpop.eup %1982 }
 0x3f8   : > { %v1985_v59 = vpop.eup %1984  ;;  %v1061_v60 = vadd.f32 1.0, %v1983_v58  ;;  %v890_v58 = vld [vmem:[%s2568_s9 + $0x30] sm:$0xff] }
 0x3f9   : > { %v1987_v61 = vpop.eup %1986  ;;  %v1059_v62 = vadd.f32 1.0, %v1985_v59  ;;  %v1247_v59 = vld [vmem:[%s2572_s13 + $0x8] sm:$0xff] }
 0x3fa   : > { %v1989_v63 = vpop.eup %1988  ;;  %v1062_v3 = vadd.f32 1.0, %v1987_v61  ;;  %v1065_v6 = vmul.f32 0.5, %v1061_v60  ;;  %v1246_v60 = vld [vmem:[%s2572_s13] sm:$0xff]  ;;  %v1249_v61 = vld [vmem:[%s2572_s13 + $0x18] sm:$0xff] }
 0x3fb   : > { %v1060_v5 = vadd.f32 1.0, %v1989_v63  ;;  %v1063_v8 = vmul.f32 0.5, %v1059_v62  ;;  %v1248_v62 = vld [vmem:[%s2572_s13 + $0x10] sm:$0xff] }
 0x3fc   : > { %v1066_v10 = vmul.f32 0.5, %v1062_v3 }
 0x3fd   : > { %v1991_v7 = vpop.eup %1990  ;;  %v1064_v13 = vmul.f32 0.5, %v1060_v5 }
 0x3fe   : > { %v1993_v9 = vpop.eup %1992  ;;  %v1073_v11 = vmul.f32 %v1991_v7, %v1065_v6 }
 0x3ff   : > { %v1995_v12 = vpop.eup %1994  ;;  %v1071_v14 = vmul.f32 %v1993_v9, %v1063_v8 }
 0x400   : > { %v1997_v15 = vpop.eup %1996  ;;  %v1074_v16 = vmul.f32 %v1995_v12, %v1066_v10 }
 0x401   : > { %v1072_v17 = vmul.f32 %v1997_v15, %v1064_v13 }
 0x402   : > { %v1076_v18 = vpack.c.bf16 %v1074_v16, %v1073_v11 }
 0x403   : > { %v1075_v19 = vpack.c.bf16 %v1072_v17, %v1071_v14 }
 0x405   : > { %1774 = vmatprep.subr.bf16.mxu1 %v1075_v19 }
 0x406   : > { %1775 = vmatpush3.bf16.msra.mxu1 %v1075_v19  ;;  %v1959_v19 = vld [vmem:[%s2569_s10 + $0x8] sm:$0xff]  }
 0x407   : > { %1776 = vmatprep.subr.bf16.mxu1 %v1076_v18 }
 0x40a   : > { %1777 = vmatpush3.bf16.msra.mxu1 %v1076_v18 }
 0x40d   : > { %1779 = vmatmul.mubr.msk.bf16.vlgmr.msra.gmra.mrb[16].mxu1 %vm770_vm1, %v1957_v20  ;;  %v1960_v20 = vld [vmem:[%s2569_s10 + $0x10] sm:$0xff]  }
 0x4e0   : > { %v1780_v24 = vpop.f32.mrb[16].mxu1 }
 0x4e1   : > { %v1192_v25 = vadd.f32 %v1780_v24, %v1090_v23  ;;  %v1183_v26 = vpop.f32.mrb[17].mxu1  ;;  %v1963_v23 = vld [vmem:[%s2567_s8 + $0x18] sm:$0xff]   ;;  %v1964_v24 = vld [vmem:[%s2571_s12] sm:$0xff]  }
 0x4e2   : > { %v1184_v28 = vadd.f32 %v1183_v26, %v1080_v21  ;;  %v1781_v29 = vpop.f32.mrb[18].mxu1  ;;  %v1961_v21 = vld [vmem:[%s2569_s10 + $0x18] sm:$0xff]  }
 0x4e3   : > { %v1216_v30 = vadd.f32 %v1192_v25, %v2306_v50  ;;  %v1195_v31 = vadd.f32 %v1781_v29, %v1095_v27  ;;  %v1186_v32 = vpop.f32.mrb[19].mxu1 }
 0x4e4   : > { %v1214_v33 = vadd.f32 %v1184_v28, %v2312_v52  ;;  %v1187_v34 = vadd.f32 %v1186_v32, %v1085_v22  ;;  %v1234_v52 = vld [vmem:[%s2570_s11] sm:$0xff]  ;;  %v1962_v22 = vld [vmem:[%s2567_s8 + $0x10] sm:$0xff]  }
 0x4e5   : > { %v1217_v35 = vadd.f32 %v1195_v31, %v2309_v51  ;;  %v1220_v37 = vmul.f32 %v2300_v45, %v1216_v30  ;;  %v1235_v51 = vld [vmem:[%s2570_s11 + $0x8] sm:$0xff]  ;;  %1782 = vmatprep.mubr.msk.bf16.mxu1 %vm770_vm1, %v1962_v22 }
 0x4e6   : > { %v1215_v36 = vadd.f32 %v1187_v34, %v2315_v2  ;;  %v1218_v39 = vmul.f32 %v2300_v45, %v1214_v33  ;;  %v1237_v2 = vld [vmem:[%s2570_s11 + $0x18] sm:$0xff]  ;;  %1783 = vmatmul.mubr.msk.bf16.gmra.mrb[4].mxu1 %vm770_vm1, %v1963_v23 }
 0x4e7   : > { %v1221_v38 = vmul.f32 %v2300_v45, %v1217_v35  ;;  %1810 = vmatprep.mubr.msk.bf16.mxu1 %vm770_vm1, %v1964_v24 }
 0x4e8   : > { %v1219_v40 = vmul.f32 %v2300_v45, %v1215_v36 }
 0x4e9   : > { %v1929_v41 = vpack.i.bf16 %v1221_v38, %v1220_v37  ;;  %v2401_v42 = vpack.c.bf16 %v1221_v38, %v1220_v37 }
 0x4ea   : > { %v1924_v50 = vpack.i.bf16 %v1219_v40, %v1218_v39  ;;  %v2403_v43 = vpack.c.bf16 %v1219_v40, %v1218_v39 }
 0x4eb   : > { %1930 = vrot.lane.b32.xlu0 %v1929_v41, %s2083_s21 }
 0x4ec   : > { %1925 = vrot.lane.b32.xlu1 %v1924_v50, %s2083_s21  ;;  %s2014_s21 = scalar_lea.vmem %s2507_s22, 512 }
 0x4ed   : > { %p2015_p11 = scmp.ne.s32.totalorder %s2507_s22, %s2014_s21 }
 0x4ef   : > { %1940 = vrot.lane.b32.xlu0 %v1929_v41, %s2084_s26  ;;  %p2016_p12 = pnand %p2015_p11, %p2201_p5 }
 0x4f0   : > { %1935 = vrot.lane.b32.xlu1 %v1924_v50, %s2084_s26  ;;  %s2085_s26 = smov [#allocation2]  }
 0x4f1   : > { %p2017_p13 = pneg %p2016_p12  ;;  %s2018_s25 = sshll.u32 %s2085_s26, 4  ;;  %s2019_s25 = int_to_ptr.vmem [resolvable:$false] %s2018_s25 }
 0x4f2   : > { %s2020_s0 = scalar_lea.vmem %s2019_s25, 1024  ;;  %p2021_p0 = scmp.lt.s32.totalorder %s2507_s22, %s2019_s25 }
 0x4f3   : > { %1279 = vperm.xlu0 %1902, %v1235_v51   ;;  %p2022_p1 = scmp.lt.s32.totalorder %s2020_s0, %s2014_s21 }
 0x4f4   : > { %1274 = vperm.xlu1 %1903, %v1234_v52  }
 0x4f5   : > { %p2023_p2 = por %p2022_p1, %p2021_p0 }
 0x4f7   : > { %1289 = vperm.xlu0 %1902, %v1237_v2   ;;  %p2024_p3 = pnand %p2023_p2, %p2017_p13 }
 0x4f8   : > { %1284 = vperm.xlu1 %1903, %v1236_v44  }
 0x4fb   : > { %1299 = vperm.xlu0 %1902, %v1239_v46  }
 0x4fc   : > { %1294 = vperm.xlu1 %1903, %v1238_v48  }
 0x4ff   : > { %1309 = vperm.xlu0 %1902, %v1241_v49  }
 0x500   : > { %1304 = vperm.xlu1 %1903, %v1240_v0  }
 0x503   : > { %737 = vperm.xlu0 %1902, %v521_v4  }
 0x504   : > { %732 = vperm.xlu1 %1903, %v520_v1  }
 0x507   : > { %747 = vperm.xlu0 %1902, %v523_v53  }
 0x508   : > { %742 = vperm.xlu1 %1903, %v522_v54  }
 0x50b   : > { %1104 = vperm.xlu0 %1902, %v889_v55  }
 0x50c   : > { %1099 = vperm.xlu1 %1903, %v888_v56  }
 0x50f   : > { %1114 = vperm.xlu0 %1902, %v891_v57  }
 0x510   : > { %1109 = vperm.xlu1 %1903, %v890_v58  }
 0x513   : > { %1442 = vperm.xlu0 %1902, %v1247_v59  }
 0x514   : > { %1437 = vperm.xlu1 %1903, %v1246_v60  }
 0x517   : > { %1452 = vperm.xlu0 %1902, %v1249_v61  }
 0x518   : > { %1447 = vperm.xlu1 %1903, %v1248_v62  }
 0x55d   : > { %v1931_v63 = vpop.permute.xlu0 %1930 }
 0x55e   : > { %v1926_v3 = vpop.permute.xlu1 %1925  ;;  %v1933_v5 = vunpack.i.h.bf16 %v1931_v63  ;;  %v1932_v6 = vunpack.i.l.bf16 %v1931_v63 }
 0x55f   : > { %v1928_v7 = vunpack.i.h.bf16 %v1926_v3  ;;  %v1927_v8 = vunpack.i.l.bf16 %v1926_v3 }
 0x560   : > { %v1267_v10 = vpack.c.bf16 %v1933_v5, %v1932_v6 }
 0x561   : > { %v1266_v9 = vpack.c.bf16 %v1928_v7, %v1927_v8  ;;  %v1941_v14 = vpop.permute.xlu0 %1940 }
 0x562   : > { %v1936_v11 = vpop.permute.xlu1 %1935  ;;  %v1943_v15 = vunpack.i.h.bf16 %v1941_v14  ;;  %v1942_v16 = vunpack.i.l.bf16 %v1941_v14 }
 0x563   : > { %1786 = vmatprep.subr.bf16.mxu0 %v1266_v9  ;;  %v1938_v12 = vunpack.i.h.bf16 %v1936_v11  ;;  %v1937_v13 = vunpack.i.l.bf16 %v1936_v11 }
 0x564   : > { %1787 = vmatpush3.bf16.msra.mxu0 %v1266_v9  ;;  %v1271_v18 = vpack.c.bf16 %v1943_v15, %v1942_v16 }
 0x565   : > { %1788 = vmatprep.subr.bf16.mxu0 %v1267_v10  ;;  %v1270_v17 = vpack.c.bf16 %v1938_v12, %v1937_v13  ;;  %v1965_v12 = vld [vmem:[%s2571_s12 + $0x8] sm:$0xff]  }
 0x568   : > { %1789 = vmatpush3.bf16.msra.mxu0 %v1267_v10 }
 0x569   : > { %1790 = vmatprep.subr.bf16.mxu0 %v2403_v43 }
 0x56c   : > { %1791 = vmatpush3.bf16.msra.mxu0 %v2403_v43 }
 0x56d   : > { %1792 = vmatprep.subr.bf16.mxu0 %v2401_v42 }
 0x570   : > { %1793 = vmatpush3.bf16.msra.mxu0 %v2401_v42 }
 0x571   : > { %1794 = vmatprep.subr.bf16.mxu0 %v1270_v17 }
 0x572   : > { %v1280_v26 = vpop.permute.xlu0 %1279 }
 0x573   : > { %v1275_v25 = vpop.permute.xlu1 %1274 }
 0x574   : > { %1795 = vmatpush3.bf16.msra.mxu0 %v1270_v17 }
 0x575   : > { %1796 = vmatprep.subr.bf16.mxu0 %v1271_v18 }
 0x576   : > { %v1290_v28 = vpop.permute.xlu0 %1289 }
 0x577   : > { %v1285_v27 = vpop.permute.xlu1 %1284 }
 0x578   : > { %1797 = vmatpush3.bf16.msra.mxu0 %v1271_v18 }
 0x57a   : > { %v1300_v38 = vpop.permute.xlu0 %1299 }
 0x57b   : > { %1799 = vmatmul.mubr.msk.bf16.vlgmr.msra.gmra.mrb[8].mxu0 %vm606_vm0, %v1959_v19  ;;  %v1295_v32 = vpop.permute.xlu1 %1294 }
 0x57c   : > { %1802 = vmatprep.mubr.msk.bf16.mxu0 %vm606_vm0, %v1960_v20 }
 0x57e   : > { %v1310_v2 = vpop.permute.xlu0 %1309 }
 0x57f   : > { %v1305_v50 = vpop.permute.xlu1 %1304 }
 0x582   : > { %v738_v14 = vpop.permute.xlu0 %737 }
 0x583   : > { %1803 = vmatmul.mubr.msk.bf16.gmra.mrb[12].mxu0 %vm606_vm0, %v1961_v21  ;;  %v733_v13 = vpop.permute.xlu1 %732 }
 0x586   : > { %v748_v16 = vpop.permute.xlu0 %747 }
 0x587   : > { %v743_v15 = vpop.permute.xlu1 %742 }
 0x58a   : > { %v1105_v18 = vpop.permute.xlu0 %1104 }
 0x58b   : > { %v1100_v17 = vpop.permute.xlu1 %1099 }
 0x58e   : > { %v1115_v20 = vpop.permute.xlu0 %1114 }
 0x58f   : > { %v1110_v19 = vpop.permute.xlu1 %1109 }
 0x590   : > { %v1814_v24 = vadd.f32 %v1110_v19, %v743_v15 }
 0x592   : > { %v1443_v22 = vpop.permute.xlu0 %1442 }
 0x593   : > { %v1438_v21 = vpop.permute.xlu1 %1437 }
 0x597   : > { %v1448_v23 = vpop.permute.xlu1 %1447 }
 0x64e   : > { %v1800_v29 = vpop.f32.mrb[8].mxu0 }
 0x64f   : > { %v1387_v30 = vadd.f32 %v1800_v29, %v1285_v27  ;;  %v1378_v31 = vpop.f32.mrb[9].mxu0  ;;  %v1820_v27 = vadd.f32 %v1115_v20, %v748_v16  ;;  %v1823_v29 = vadd.f32 %v1105_v18, %v738_v14 }
 0x650   : > { %v1379_v33 = vadd.f32 %v1378_v31, %v1275_v25  ;;  %v1801_v34 = vpop.f32.mrb[10].mxu0  ;;  %v1817_v25 = vadd.f32 %v1100_v17, %v733_v13 }
 0x651   : > { %v1411_v35 = vmul.f32 0.5, %v1387_v30  ;;  %v1390_v36 = vadd.f32 %v1801_v34, %v1290_v28  ;;  %v1381_v37 = vpop.f32.mrb[11].mxu0  ;;  %v1815_v28 = vadd.f32 %v1814_v24, %v1448_v23 }
 0x652   : > { %v1409_v39 = vmul.f32 0.5, %v1379_v33  ;;  %v1382_v40 = vadd.f32 %v1381_v37, %v1280_v26  ;;  %v1453_v26 = vpop.permute.xlu0 %1452  ;;  %v1818_v30 = vadd.f32 %v1817_v25, %v1438_v21 }
 0x653   : > { %1998 = vtanh.f32 %v1411_v35  ;;  %v1412_v41 = vmul.f32 0.5, %v1390_v36  ;;  %v1824_v35 = vadd.f32 %v1823_v29, %v1443_v22 }
 0x654   : > { %2000 = vtanh.f32 %v1409_v39  ;;  %v1410_v42 = vmul.f32 0.5, %v1382_v40 }
 0x655   : > { %2002 = vtanh.f32 %v1412_v41 }
 0x656   : > { %2004 = vtanh.f32 %v1410_v42  ;;  %v1804_v43 = vpop.f32.mrb[12].mxu0 }
 0x657   : > { %v1403_v51 = vadd.f32 %v1804_v43, %v1305_v50  ;;  %v1394_v52 = vpop.f32.mrb[13].mxu0 }
 0x658   : > { %v1395_v44 = vadd.f32 %v1394_v52, %v1295_v32  ;;  %v1805_v46 = vpop.f32.mrb[14].mxu0  ;;  %v1821_v32 = vadd.f32 %v1820_v27, %v1453_v26 }
 0x659   : > { %2006 = vtanh.f32 %v1403_v51  ;;  %v1406_v47 = vadd.f32 %v1805_v46, %v1310_v2  ;;  %v1397_v48 = vpop.f32.mrb[15].mxu0 }
 0x65a   : > { %2008 = vtanh.f32 %v1395_v44  ;;  %v1398_v49 = vadd.f32 %v1397_v48, %v1300_v38 }
 0x65b   : > { %2010 = vtanh.f32 %v1406_v47 }
 0x65c   : > { %2012 = vtanh.f32 %v1398_v49 }
 0x65d   : > { %v1999_v0 = vpop.eup %1998 }
 0x65e   : > { %v2001_v4 = vpop.eup %2000  ;;  %v1419_v1 = vadd.f32 1.0, %v1999_v0 }
 0x65f   : > { %v2003_v53 = vpop.eup %2002  ;;  %v1417_v54 = vadd.f32 1.0, %v2001_v4 }
 0x660   : > { %v2005_v55 = vpop.eup %2004  ;;  %v1420_v56 = vadd.f32 1.0, %v2003_v53  ;;  %v1423_v58 = vmul.f32 0.5, %v1419_v1 }
 0x661   : > { %v1418_v57 = vadd.f32 1.0, %v2005_v55  ;;  %v1421_v60 = vmul.f32 0.5, %v1417_v54 }
 0x662   : > { %v1424_v62 = vmul.f32 0.5, %v1420_v56 }
 0x663   : > { %v2007_v59 = vpop.eup %2006  ;;  %v1422_v5 = vmul.f32 0.5, %v1418_v57 }
 0x664   : > { %v2009_v61 = vpop.eup %2008  ;;  %v1431_v63 = vmul.f32 %v2007_v59, %v1423_v58 }
 0x665   : > { %v2011_v3 = vpop.eup %2010  ;;  %v1429_v6 = vmul.f32 %v2009_v61, %v1421_v60 }
 0x666   : > { %v2013_v7 = vpop.eup %2012  ;;  %v1432_v8 = vmul.f32 %v2011_v3, %v1424_v62 }
 0x667   : > { %v1430_v9 = vmul.f32 %v2013_v7, %v1422_v5 }
 0x668   : > { %v1434_v10 = vpack.c.bf16 %v1432_v8, %v1431_v63 }
 0x669   : > { %v1433_v11 = vpack.c.bf16 %v1430_v9, %v1429_v6 }
 0x66b   : > { %1806 = vmatprep.subr.bf16.mxu1 %v1433_v11 }
 0x66c   : > { %1807 = vmatpush3.bf16.msra.mxu1 %v1433_v11 }
 0x66d   : > { %1808 = vmatprep.subr.bf16.mxu1 %v1434_v10 }
 0x670   : > { %1809 = vmatpush3.bf16.msra.mxu1 %v1434_v10 }
 0x673   : > { %1811 = vmatmul.mubr.msk.bf16.vlgmr.msra.gmra.mrb[4].mxu1 %vm770_vm1, %v1965_v12 }
 0x746   : > { %v1812_v31 = vpop.f32.mrb[4].mxu1 }
 0x747   : > { %v1816_v33 = vadd.f32 %v1815_v28, %v1812_v31  ;;  %v1505_v34 = vpop.f32.mrb[5].mxu1 }
 0x748   : > { %v1819_v36 = vadd.f32 %v1818_v30, %v1505_v34  ;;  %v1813_v37 = vpop.f32.mrb[6].mxu1 }
 0x749   : > { %v1526_v38 = vmul.f32 %v1816_v33, %v2300_v45  ;;  %v1822_v39 = vadd.f32 %v1821_v32, %v1813_v37  ;;  %v1508_v40 = vpop.f32.mrb[7].mxu1 }
 0x74a   : > { %v1524_v41 = vmul.f32 %v1819_v36, %v2300_v45  ;;  %v1825_v42 = vadd.f32 %v1824_v35, %v1508_v40 }
 0x74b   : > { %1530 = vst [vmem:[%s471_s28 + $0x10] sm:$0xff] %v1526_v38  ;;  %v1527_v50 = vmul.f32 %v1822_v39, %v2300_v45 }
 0x74c   : > { %1528 = vst [vmem:[%s471_s28] sm:$0xff] %v1524_v41  ;;  %v1525_v43 = vmul.f32 %v1825_v42, %v2300_v45 }
 0x74d   : > { %1531 = vst [vmem:[%s471_s28 + $0x18] sm:$0xff] %v1527_v50 }
 0x74e   : > { %1529 = vst [vmem:[%s471_s28 + $0x8] sm:$0xff] %v1525_v43 }
 0x74f   : > { %2027 = shalt.err (!%p2024_p3)
}
 0x750   : > { %s2028_s27 = scalar_lea.hbm %s2513_s17, 512  ;;  %s2032_s15 = scalar_lea.hbm %s2573_s14, 1024 }
 0x751   : > { %p2029_p4 = scmp.ne.s32.totalorder %s2513_s17, %s2028_s27  ;;  %p2033_p9 = scmp.lt.u32.totalorder %s2513_s17, %s2573_s14 }
 0x752   : > { %p2034_p10 = scmp.lt.u32.totalorder %s2032_s15, %s2028_s27  ;;  %p2036_p12 = scmp.lt.u32.totalorder %s2028_s27, %s2513_s17 }
 0x753   : > { %p2030_p7 = pnand %p2029_p4, %p2201_p5 }
 0x754   : > { %p2035_p11 = por %p2034_p10, %p2033_p9 }
 0x755   : > { %p2031_p8 = pneg %p2030_p7 }
 0x756   : > { %p2037_p13 = por %p2036_p12, %p2035_p11 }
 0x758   : > { %p2038_p0 = pnand %p2037_p13, %p2031_p8 }
 0x75a   : > { %2041 = shalt.err (!%p2038_p0)
}
 0x75b   : > { %s2086_s21 = smov 128   ;;  %s2087_s25 = smov 8  }
 0x75c   : > { %1834 = dma.vmem_to_hbm [thread:$0]  (%p2201_p5), %s2507_s22, 512, %s2513_s17, %s2518_s20, %s2086_s21, %s2086_s21, %s2087_s25  }
 0x75d PF: > { %p1840_p1 = scmp.ge.s32.totalorder %s2076_s16, 2  ;;  %s1561_s0 = sand.u32 1, %s2064_s29  }
 0x75e   : > { %s1562_s27 = scalar_lea.sflag [#allocation3], %s1561_s0 }
 0x75f   : > { %p1837_p2 = pnand %p1840_p1, %p2205_p6 }
 0x761   : > { %2059 = dma.done.wait (!%p1837_p2), %s1562_s27, 512  }
 0x762   : > { %2061 = vsyncadd (!%p1837_p2), %s1562_s27, 4294966784  ;;  %s2584_s16 = sld [smem:[#allocation6_spill]]  ;;  %s2585_s28 = sld [smem:[#allocation5_spill]] }
 0x763   : > { %s2586_s15 = sld [smem:[#allocation7_spill]]  ;;  %s2587_s29 = smov %s2068_s30 }
 0x768   : > { %p24_p3 = scmp.ge.s32.totalorder %s2584_s16, 4   ;;  %s2588_s30 = smov %s2585_s28 }
 0x76a   :  { %26 = sbr.rel (!%p24_p3) target bundleno = 5 (0x5), region = 114 }
 0x771   :  { %1567 = vsyncpa [#allocation3], 1 }
 0x772   :  { %1569 = vsyncpa [#allocation3 + $0x1], 1 }

// kernel: tpu_custom_call.1
= control target key start
LH: loop header
LB: loop body
LE: loop exit
PB: predicated region body
PF: predicated region fallthrough
CT: control target
= control target key end

     0   :  { %s2967_s0 = inlined_call_operand.vmem [shape: f32[2,32,128], index: 0, kind: input, shape index: {}]   ;;  %s2968_s1 = inlined_call_operand.vmem [shape: f32[2,1,128], index: 1, kind: input, shape index: {}]   ;;  %s2969_s2 = inlined_call_operand.vmem [shape: bf16[64,96], index: 2, kind: input, shape index: {}]   ;;  %s2970_s3 = inlined_call_operand.vmem [shape: f32[64,1], index: 3, kind: input, shape index: {}]   ;;  %s2971_s4 = inlined_call_operand.vmem [shape: bf16[64,32], index: 4, kind: input, shape index: {}]   ;;  %s2972_s5 = inlined_call_operand.vmem [shape: f32[64,1], index: 5, kind: input, shape index: {}]   ;;  %s2973_s6 = inlined_call_operand.vmem [shape: bf16[64,96], index: 6, kind: input, shape index: {}]   ;;  %s2974_s7 = inlined_call_operand.vmem [shape: f32[64,1], index: 7, kind: input, shape index: {}]   ;;  %s2975_s8 = inlined_call_operand.vmem [shape: bf16[64,32], index: 8, kind: input, shape index: {}]   ;;  %s2976_s9 = inlined_call_operand.vmem [shape: f32[64,1], index: 9, kind: input, shape index: {}]   ;;  %s2977_s10 = inlined_call_operand.vmem [shape: bf16[64,96], index: 10, kind: input, shape index: {}]   ;;  %s2978_s11 = inlined_call_operand.vmem [shape: f32[64,1], index: 11, kind: input, shape index: {}]   ;;  %s2979_s12 = inlined_call_operand.vmem [shape: bf16[32,32], index: 12, kind: input, shape index: {}]   ;;  %s2980_s13 = inlined_call_operand.vmem [shape: f32[32,1], index: 13, kind: input, shape index: {}]   ;;  %s2981_s14 = inlined_call_operand.hbm [shape: f32[2,32,128], index: 14, kind: output, shape index: {}]  }
   0x1   :  { %2987 = sst [smem:[#allocation8_spill]] %s2967_s0 }
   0x2   :  { %19 = vsyncpa [#allocation3], 0 }
   0x3   :  { %21 = vsyncpa [#allocation3 + $0x1], 0  ;;  %s2484_s29 = smov 0   ;;  %s2486_s30 = smov 0  }
   0x4   :  { %s2488_s15 = smov 0   ;;  %s2490_s16 = smov 0  }
   0x5 LB: > { %2988 = sst [smem:[#allocation5_spill]] %s2392_s15  ;;  %s2505_s17 = sadd.s32 4294967295, %s2396_s16   ;;  %s2396_s16 = sphi %s2490_s16, %s3001_s16   ;;  %s2392_s15 = sphi %s2488_s15, %s3003_s15   ;;  %s2388_s30 = sphi %s2486_s30, %s3005_s30   ;;  %s2384_s29 = sphi %s2484_s29, %s3004_s29  }
   0x6   : > { %s1816_s18 = sadd.s32 4294967294, %s2396_s16   ;;  %s2509_s19 = sadd.s32 1, %s2396_s16  }
   0x7   : > { %2989 = sst [smem:[#allocation6_spill]] %s2509_s19  ;;  %s338_s20 = sadd.s32 1, %s2392_s15 }
   0x8   : > { %s335_s21 = ssub.s32 %s2396_s16, %s2509_s19  ;;  %p348_p0 = scmp.ne.s32.totalorder %s2392_s15, %s2388_s30 }
   0x9   : > { %p336_p1 = scmp.eq.s32.totalorder %s335_s21, 0  ;;  %p349_p2 = scmp.eq.s32.totalorder %s2505_s17, 1 }
   0xa   : > { %p354_p3 = scmp.ne.s32.totalorder %s2388_s30, %s2384_s29  ;;  %p355_p4 = scmp.eq.s32.totalorder %s1816_s18, 1 }
   0xb   : > { %s2520_s22 = scalar_select %p336_p1, %s2392_s15, %s338_s20  }
   0xc   : > { %p2522_p5 = por %p349_p2, %p348_p0  ;;  %p2526_p6 = por %p355_p4, %p354_p3 }
   0xd   : > { %2990 = sst [smem:[#allocation7_spill]] %s2520_s22  ;;  %p1819_p7 = scmp.ge.s32.totalorder %s2396_s16, 1 }
   0xe   : > { %p423_p8 = scmp.lt.s32.totalorder %s2396_s16, 3 }
  0x10   : > { %p424_p9 = pnand %p1819_p7, %p423_p8 }
  0x11   : > { %p472_p10 = scmp.lt.s32.totalorder (!%p424_p9), %s2505_s17, 1  ;;  %s2993_s0 = sld [smem:[#allocation8_spill]] (!%p424_p9)  ;;  %vm540_vm0 = vcmask (!%p424_p9), 7168   ;;  %v2264_v27 = vld [vmem:[%s2969_s2] sm:$0xff] (!%p424_p9)   ;;  %vm673_vm3 = vcmask (!%p424_p9), 785408   ;;  %v501_v29 = vld [vmem:[%s2970_s3 + $0x8] sm:$0xff] (!%p424_p9) }
  0x12   : > { %427 = sbr.rel (%p424_p9) target bundleno = 2230 (0x8b6), region = 76  ;;  %s2398_s20 = smov (!%p424_p9), 1   ;;  %vm1828_vm1 = vmneg (!%p424_p9), %vm540_vm0  ;;  %1963 = vmatprep.mubr.msk.bf16.mxu0 (!%p424_p9), %vm673_vm3, %v2264_v27  ;;  %v500_v28 = vld [vmem:[%s2970_s3] sm:$0xff] (!%p424_p9)  ;;  %v2401_v30 = vmov (!%p424_p9), 0   ;;  %v503_v31 = vld [vmem:[%s2970_s3 + $0x18] sm:$0xff] (!%p424_p9)  ;;  %vm573_vm4 = vcmask (!%p424_p9), 1039360  }
  0x13   : > { %vm2553_vm2 = vmpackc.low (!%p424_p9), %vm1828_vm1, %vm1828_vm1  ;;  %s2399_s21 = smov (!%p424_p9), 127   ;;  %2163 = vset.pattern.permute.xlu1 (!%p424_p9), %v2401_v30  ;;  %2162 = vset.pattern.permute.xlu0 (!%p424_p9), %v2401_v30  ;;  %v502_v32 = vld [vmem:[%s2970_s3 + $0x10] sm:$0xff] (!%p424_p9)  ;;  %v505_v33 = vld [vmem:[%s2970_s3 + $0x28] sm:$0xff] (!%p424_p9)  ;;  %vm598_vm5 = vcmask (!%p424_p9), 1031168   ;;  %vm837_vm6 = vcmask (!%p424_p9), 261120   ;;  %vm975_vm7 = vcmask (!%p424_p9), 15360  }
  0x14   : > { %v504_v34 = vld [vmem:[%s2970_s3 + $0x20] sm:$0xff] (!%p424_p9)  ;;  %v507_v35 = vld [vmem:[%s2970_s3 + $0x38] sm:$0xff] (!%p424_p9)  ;;  %v506_v36 = vld [vmem:[%s2970_s3 + $0x30] sm:$0xff] (!%p424_p9)  ;;  %s2998_s28 = smov (!%p424_p9), 126   ;;  %vm1032_vm10 = vcmask (!%p424_p9), 1014784   ;;  %vm1399_vm11 = vcmask (!%p424_p9), 31744  }
  0x15   : > { %v517_v37 = vld [vmem:[%s2972_s5 + $0x8] sm:$0xff] (!%p424_p9)  ;;  %v516_v38 = vld [vmem:[%s2972_s5] sm:$0xff] (!%p424_p9)  ;;  %v519_v39 = vld [vmem:[%s2972_s5 + $0x18] sm:$0xff] (!%p424_p9)  ;;  %s2405_s22 = smov (!%p424_p9), 120   ;;  %vm1456_vm14 = vcmask (!%p424_p9), 982016  }
  0x16   : > { %v518_v40 = vld [vmem:[%s2972_s5 + $0x10] sm:$0xff] (!%p424_p9)  ;;  %vm1854_vm8 = vmneg (!%p424_p9), %vm975_vm7 }
  0x17   : > { %vm2672_vm9 = vmpackc.low (!%p424_p9), %vm1854_vm8, %vm1854_vm8 }
  0x18   : > { %vm1880_vm12 = vmneg (!%p424_p9), %vm1399_vm11 }
  0x19   : > { %s2534_s25 = scalar_select %p472_p10, %s2505_s17, 1  ;;  %vm2785_vm13 = vmpackc.low %vm1880_vm12, %vm1880_vm12 }
  0x1b   : > { %s1903_s26 = sshll.u32 %s2534_s25, 5  ;;  %s479_s15 = scalar_lea.vmem %s2968_s1, %s2534_s25 }
  0x1c   : > { %s476_s18 = scalar_lea.vmem %s2993_s0, %s1903_s26  ;;  %s2983_s26 = smov 126  }
  0x1d   : > { %v2540_v0 = vld [vmem:[%s476_s18] sm:$0xff]  ;;  %v2542_v1 = vld [vmem:[%s476_s18 + $0x8] sm:$0xff]  ;;  %v2544_v2 = vld [vmem:[%s476_s18 + $0x10] sm:$0xff]  ;;  %s2402_s25 = smov 2  }
  0x1e   : > { %v2112_v3 = vpack.i.bf16 %v2542_v1, %v2540_v0  ;;  %v2548_v4 = vld [vmem:[%s476_s18 + $0x18] sm:$0xff]  ;;  %s2404_s18 = smov 4  }
  0x1f   : > { %v2117_v5 = vpack.i.bf16 %v2548_v4, %v2544_v2 }
  0x20   : > { %2113 = vrot.lane.b32.xlu0 %v2112_v3, %s2398_s20 }
  0x24   : > { %2118 = vrot.lane.b32.xlu0 %v2117_v5, %s2398_s20  ;;  %s2406_s20 = smov [#allocation2]  }
  0x25   : > { %s2338_s0 = sshll.u32 %s2406_s20, 4  ;;  %s2339_s0 = int_to_ptr.vmem [resolvable:$false] %s2338_s0 }
  0x92   : > { %v2114_v6 = vpop.permute.xlu0 %2113 }
  0x93   : > { %v2116_v7 = vunpack.i.h.bf16 %v2114_v6  ;;  %v2115_v8 = vunpack.i.l.bf16 %v2114_v6 }
  0x95   : > { %v1831_v10 = vpack.c.bf16 %v2116_v7, %v2115_v8  ;;  %v541_v11 = vsel %vm540_vm0, 0.0, %v2115_v8  ;;  %v545_v12 = vsel %vm540_vm0, %v2115_v8, 0.0  ;;  %v542_v17 = vsel %vm540_vm0, 0.0, %v2116_v7 }
  0x96   : > { %v2119_v13 = vpop.permute.xlu0 %2118  ;;  %v2122_v14 = vpack.i.bf16 %v545_v12, %v541_v11  ;;  %v546_v18 = vsel %vm540_vm0, %v2116_v7, 0.0 }
  0x97   : > { %v2121_v15 = vunpack.i.h.bf16 %v2119_v13  ;;  %v2120_v16 = vunpack.i.l.bf16 %v2119_v13  ;;  %1951 = vmatprep.subr.msk.bf16.mxu0 %vm2553_vm2, %v1831_v10  ;;  %v2127_v24 = vpack.i.bf16 %v546_v18, %v542_v17  ;;  %v2265_v17 = vld [vmem:[%s2969_s2 + $0x8] sm:$0xff]   ;;  %v2266_v18 = vld [vmem:[%s2969_s2 + $0x10] sm:$0xff]  }
  0x98   : > { %1952 = vmatpush3.bf16.msk.msra.mxu0 %vm2553_vm2, %v1831_v10  ;;  %2123 = vrot.lane.b32.xlu1 %v2122_v14, %s2399_s21 }
  0x99   : > { %v1836_v19 = vpack.c.bf16 %v2121_v15, %v2120_v16  ;;  %v543_v20 = vsel %vm540_vm0, 0.0, %v2120_v16  ;;  %v547_v21 = vsel %vm540_vm0, %v2120_v16, 0.0  ;;  %v544_v22 = vsel %vm540_vm0, 0.0, %v2121_v15 }
  0x9a   : > { %v2132_v23 = vpack.i.bf16 %v547_v21, %v543_v20  ;;  %v548_v25 = vsel %vm540_vm0, %v2121_v15, 0.0  ;;  %v2268_v20 = vld [vmem:[%s2971_s4] sm:$0xff]  }
  0x9b   : > { %1953 = vmatprep.subr.msk.bf16.mxu0 %vm2553_vm2, %v1836_v19  ;;  %v2137_v26 = vpack.i.bf16 %v548_v25, %v544_v22  ;;  %1975 = vmatprep.mubr.msk.bf16.mxu1 %vm837_vm6, %v2268_v20 }
  0x9c   : > { %2133 = vrot.lane.b32.xlu0 %v2132_v23, %s2399_s21  ;;  %2128 = vrot.lane.b32.xlu1 %v2127_v24, %s2399_s21 }
  0x9d   : > { %1954 = vmatpush3.bf16.msk.msra.mxu0 %vm2553_vm2, %v1836_v19  ;;  %v2267_v19 = vld [vmem:[%s2969_s2 + $0x18] sm:$0xff]  }
  0xa0   : > { %2143 = vrot.lane.b32.xlu0 %v2122_v14, %s2983_s26  ;;  %2138 = vrot.lane.b32.xlu1 %v2137_v26, %s2399_s21  ;;  %s2403_s21 = smov 124  }
  0xa4   : > { %2153 = vrot.lane.b32.xlu0 %v2132_v23, %s2983_s26  ;;  %2148 = vrot.lane.b32.xlu1 %v2127_v24, %s2983_s26 }
  0xa8   : > { %2158 = vrot.lane.b32.xlu1 %v2137_v26, %s2983_s26  ;;  %615 = vperm.xlu0 %2162, %v500_v28  }
  0xac   : > { %620 = vperm.xlu1 %2163, %v501_v29   ;;  %630 = vperm.xlu0 %2162, %v503_v31  }
  0xb0   : > { %625 = vperm.xlu1 %2163, %v502_v32   ;;  %640 = vperm.xlu0 %2162, %v505_v33  }
  0xb4   : > { %635 = vperm.xlu1 %2163, %v504_v34   ;;  %650 = vperm.xlu0 %2162, %v507_v35  }
  0xb8   : > { %645 = vperm.xlu1 %2163, %v506_v36   ;;  %784 = vperm.xlu0 %2162, %v517_v37  }
  0xbc   : > { %779 = vperm.xlu1 %2163, %v516_v38   ;;  %794 = vperm.xlu0 %2162, %v519_v39  }
  0xc0   : > { %789 = vperm.xlu1 %2163, %v518_v40  }
 0x10a   : > { %v2124_v41 = vpop.permute.xlu1 %2123 }
 0x10b   : > { %v2126_v42 = vunpack.i.h.bf16 %v2124_v41  ;;  %v2125_v43 = vunpack.i.l.bf16 %v2124_v41 }
 0x10d   : > { %v574_v50 = vsel %vm573_vm4, %v2125_v43, %v2126_v42 }
 0x10e   : > { %v2134_v44 = vpop.permute.xlu0 %2133  ;;  %v2129_v45 = vpop.permute.xlu1 %2128 }
 0x10f   : > { %v2136_v46 = vunpack.i.h.bf16 %v2134_v44  ;;  %v2135_v47 = vunpack.i.l.bf16 %v2134_v44  ;;  %v2131_v48 = vunpack.i.h.bf16 %v2129_v45  ;;  %v2130_v49 = vunpack.i.l.bf16 %v2129_v45 }
 0x111   : > { %v575_v51 = vsel %vm573_vm4, %v2130_v49, %v2131_v48  ;;  %v576_v57 = vsel %vm573_vm4, %v2135_v47, %v2136_v46 }
 0x112   : > { %v2144_v52 = vpop.permute.xlu0 %2143  ;;  %v2139_v53 = vpop.permute.xlu1 %2138  ;;  %v609_v54 = vpack.c.bf16 %v575_v51, %v574_v50 }
 0x113   : > { %v2141_v55 = vunpack.i.h.bf16 %v2139_v53  ;;  %v2140_v56 = vunpack.i.l.bf16 %v2139_v53  ;;  %v2146_v58 = vunpack.i.h.bf16 %v2144_v52  ;;  %v2145_v59 = vunpack.i.l.bf16 %v2144_v52 }
 0x114   : > { %1955 = vmatprep.subr.bf16.mxu0 %v609_v54 }
 0x115   : > { %1956 = vmatpush3.bf16.msra.mxu0 %v609_v54  ;;  %v577_v60 = vsel %vm573_vm4, %v2140_v56, %v2141_v55  ;;  %v599_v8 = vsel %vm598_vm5, %v2145_v59, %v2146_v58 }
 0x116   : > { %v2154_v61 = vpop.permute.xlu0 %2153  ;;  %v2149_v62 = vpop.permute.xlu1 %2148  ;;  %v610_v63 = vpack.c.bf16 %v577_v60, %v576_v57 }
 0x117   : > { %v2151_v3 = vunpack.i.h.bf16 %v2149_v62  ;;  %v2150_v5 = vunpack.i.l.bf16 %v2149_v62  ;;  %v2156_v6 = vunpack.i.h.bf16 %v2154_v61  ;;  %v2155_v7 = vunpack.i.l.bf16 %v2154_v61 }
 0x118   : > { %1957 = vmatprep.subr.bf16.mxu0 %v610_v63 }
 0x119   : > { %1958 = vmatpush3.bf16.msra.mxu0 %v610_v63  ;;  %v600_v9 = vsel %vm598_vm5, %v2150_v5, %v2151_v3  ;;  %v601_v14 = vsel %vm598_vm5, %v2155_v7, %v2156_v6 }
 0x11a   : > { %v2159_v10 = vpop.permute.xlu1 %2158  ;;  %v611_v11 = vpack.c.bf16 %v600_v9, %v599_v8 }
 0x11b   : > { %v2161_v12 = vunpack.i.h.bf16 %v2159_v10  ;;  %v2160_v13 = vunpack.i.l.bf16 %v2159_v10 }
 0x11c   : > { %1959 = vmatprep.subr.bf16.mxu0 %v611_v11 }
 0x11d   : > { %1960 = vmatpush3.bf16.msra.mxu0 %v611_v11  ;;  %v602_v15 = vsel %vm598_vm5, %v2160_v13, %v2161_v12  ;;  %v2269_v11 = vld [vmem:[%s2971_s4 + $0x8] sm:$0xff]  }
 0x11e   : > { %v612_v16 = vpack.c.bf16 %v602_v15, %v601_v14 }
 0x120   : > { %1961 = vmatprep.subr.bf16.mxu0 %v612_v16 }
 0x121   : > { %1962 = vmatpush3.bf16.msra.mxu0 %v612_v16 }
 0x124   : > { %1964 = vmatmul.mubr.msk.bf16.vlgmr.msra.gmra.mrb[0].mxu0 %vm673_vm3, %v2265_v17 }
 0x125   : > { %1967 = vmatprep.mubr.msk.bf16.mxu0 %vm673_vm3, %v2266_v18 }
 0x127   : > { %v616_v22 = vpop.permute.xlu0 %615 }
 0x12b   : > { %v621_v21 = vpop.permute.xlu1 %620  ;;  %v631_v24 = vpop.permute.xlu0 %630 }
 0x12c   : > { %1968 = vmatmul.mubr.msk.bf16.gmra.mrb[4].mxu0 %vm673_vm3, %v2267_v19 }
 0x12f   : > { %v626_v23 = vpop.permute.xlu1 %625  ;;  %v641_v34 = vpop.permute.xlu0 %640 }
 0x133   : > { %v636_v28 = vpop.permute.xlu1 %635  ;;  %v651_v43 = vpop.permute.xlu0 %650 }
 0x137   : > { %v646_v39 = vpop.permute.xlu1 %645  ;;  %v785_v13 = vpop.permute.xlu0 %784 }
 0x13b   : > { %v780_v12 = vpop.permute.xlu1 %779  ;;  %v795_v18 = vpop.permute.xlu0 %794 }
 0x13f   : > { %v790_v14 = vpop.permute.xlu1 %789 }
 0x1f7   : > { %v1965_v25 = vpop.f32.mrb[0].mxu0 }
 0x1f8   : > { %v729_v26 = vadd.f32 %v1965_v25, %v626_v23  ;;  %v720_v27 = vpop.f32.mrb[1].mxu0 }
 0x1f9   : > { %v721_v29 = vadd.f32 %v720_v27, %v616_v22  ;;  %v1966_v30 = vpop.f32.mrb[2].mxu0 }
 0x1fa   : > { %v753_v31 = vmul.f32 0.5, %v729_v26  ;;  %v732_v32 = vadd.f32 %v1966_v30, %v631_v24  ;;  %v723_v33 = vpop.f32.mrb[3].mxu0  ;;  %v2650_v24 = vld [vmem:[%s479_s15] ss:$0 sm:$0xff]  ;;  %s1904_s15 = sshll.u32 %s2505_s17, 9 }
 0x1fb   : > { %v751_v35 = vmul.f32 0.5, %v721_v29  ;;  %v724_v36 = vadd.f32 %v723_v33, %v621_v21 }
 0x1fc   : > { %2286 = vtanh.f32 %v753_v31  ;;  %v754_v37 = vmul.f32 0.5, %v732_v32 }
 0x1fd   : > { %2288 = vtanh.f32 %v751_v35  ;;  %v752_v38 = vmul.f32 0.5, %v724_v36 }
 0x1fe   : > { %2290 = vtanh.f32 %v754_v37 }
 0x1ff   : > { %2292 = vtanh.f32 %v752_v38  ;;  %v1969_v40 = vpop.f32.mrb[4].mxu0 }
 0x200   : > { %v745_v41 = vadd.f32 %v1969_v40, %v646_v39  ;;  %v736_v42 = vpop.f32.mrb[5].mxu0 }
 0x201   : > { %v737_v44 = vadd.f32 %v736_v42, %v636_v28  ;;  %v1970_v45 = vpop.f32.mrb[6].mxu0 }
 0x202   : > { %2294 = vtanh.f32 %v745_v41  ;;  %v748_v46 = vadd.f32 %v1970_v45, %v651_v43  ;;  %v739_v47 = vpop.f32.mrb[7].mxu0 }
 0x203   : > { %2296 = vtanh.f32 %v737_v44  ;;  %v740_v48 = vadd.f32 %v739_v47, %v641_v34 }
 0x204   : > { %2298 = vtanh.f32 %v748_v46 }
 0x205   : > { %2300 = vtanh.f32 %v740_v48 }
 0x206   : > { %v2287_v49 = vpop.eup %2286 }
 0x207   : > { %v2289_v50 = vpop.eup %2288  ;;  %v761_v51 = vadd.f32 1.0, %v2287_v49 }
 0x208   : > { %v2291_v52 = vpop.eup %2290  ;;  %v759_v53 = vadd.f32 1.0, %v2289_v50  ;;  %v2270_v50 = vld [vmem:[%s2971_s4 + $0x10] sm:$0xff]  }
 0x209   : > { %v2293_v54 = vpop.eup %2292  ;;  %v762_v55 = vadd.f32 1.0, %v2291_v52  ;;  %v765_v57 = vmul.f32 0.5, %v761_v51  ;;  %v2271_v51 = vld [vmem:[%s2971_s4 + $0x18] sm:$0xff]  }
 0x20a   : > { %v760_v56 = vadd.f32 1.0, %v2293_v54  ;;  %v763_v59 = vmul.f32 0.5, %v759_v53  ;;  %v2272_v54 = vld [vmem:[%s2973_s6] sm:$0xff]  }
 0x20b   : > { %v766_v61 = vmul.f32 0.5, %v762_v55  ;;  %v936_v55 = vld [vmem:[%s2974_s7 + $0x8] sm:$0xff] }
 0x20c   : > { %v2295_v58 = vpop.eup %2294  ;;  %v764_v3 = vmul.f32 0.5, %v760_v56  ;;  %v935_v56 = vld [vmem:[%s2974_s7] sm:$0xff] }
 0x20d   : > { %v2297_v60 = vpop.eup %2296  ;;  %v773_v62 = vmul.f32 %v2295_v58, %v765_v57  ;;  %v938_v57 = vld [vmem:[%s2974_s7 + $0x18] sm:$0xff]  ;;  %v937_v58 = vld [vmem:[%s2974_s7 + $0x10] sm:$0xff] }
 0x20e   : > { %v2299_v63 = vpop.eup %2298  ;;  %v771_v5 = vmul.f32 %v2297_v60, %v763_v59  ;;  %v940_v59 = vld [vmem:[%s2974_s7 + $0x28] sm:$0xff]  ;;  %v939_v60 = vld [vmem:[%s2974_s7 + $0x20] sm:$0xff] }
 0x20f   : > { %v2301_v6 = vpop.eup %2300  ;;  %v774_v7 = vmul.f32 %v2299_v63, %v766_v61  ;;  %v942_v61 = vld [vmem:[%s2974_s7 + $0x38] sm:$0xff]  ;;  %v952_v63 = vld [vmem:[%s2976_s9 + $0x8] sm:$0xff] }
 0x210   : > { %v772_v8 = vmul.f32 %v2301_v6, %v764_v3  ;;  %v951_v3 = vld [vmem:[%s2976_s9] sm:$0xff]  ;;  %v953_v6 = vld [vmem:[%s2976_s9 + $0x10] sm:$0xff] }
 0x211   : > { %v776_v9 = vpack.c.bf16 %v774_v7, %v773_v62  ;;  %v941_v62 = vld [vmem:[%s2974_s7 + $0x30] sm:$0xff] }
 0x212   : > { %v775_v10 = vpack.c.bf16 %v772_v8, %v771_v5  ;;  %v954_v5 = vld [vmem:[%s2976_s9 + $0x18] sm:$0xff] }
 0x214   : > { %1971 = vmatprep.subr.bf16.mxu1 %v775_v10 }
 0x215   : > { %1972 = vmatpush3.bf16.msra.mxu1 %v775_v10 }
 0x216   : > { %1973 = vmatprep.subr.bf16.mxu1 %v776_v9 }
 0x219   : > { %1974 = vmatpush3.bf16.msra.mxu1 %v776_v9 }
 0x21c   : > { %1976 = vmatmul.mubr.msk.bf16.vlgmr.msra.gmra.mrb[0].mxu1 %vm837_vm6, %v2269_v11 }
 0x21d   : > { %1979 = vmatprep.mubr.msk.bf16.mxu1 %vm837_vm6, %v2270_v50 }
 0x224   : > { %1980 = vmatmul.mubr.msk.bf16.gmra.mrb[4].mxu1 %vm837_vm6, %v2271_v51 }
 0x225   : > { %1995 = vmatprep.mubr.msk.bf16.mxu1 %vm673_vm3, %v2272_v54 }
 0x2ef   : > { %v1977_v15 = vpop.f32.mrb[0].mxu1 }
 0x2f0   : > { %v893_v16 = vadd.f32 %v1977_v15, %v790_v14  ;;  %v884_v17 = vpop.f32.mrb[1].mxu1 }
 0x2f1   : > { %v885_v19 = vadd.f32 %v884_v17, %v780_v12  ;;  %v1978_v20 = vpop.f32.mrb[2].mxu1 }
 0x2f2   : > { %v917_v21 = vadd.f32 %v893_v16, %v2544_v2  ;;  %v896_v22 = vadd.f32 %v1978_v20, %v795_v18  ;;  %v887_v23 = vpop.f32.mrb[3].mxu1 }
 0x2f3   : > { %v915_v25 = vadd.f32 %v885_v19, %v2540_v0  ;;  %v888_v26 = vadd.f32 %v887_v23, %v785_v13 }
 0x2f4   : > { %v918_v27 = vadd.f32 %v896_v22, %v2548_v4  ;;  %v2656_v29 = vmul.f32 %v2650_v24, %v917_v21 }
 0x2f5   : > { %v916_v28 = vadd.f32 %v888_v26, %v2542_v1  ;;  %v2662_v31 = vmul.f32 %v2650_v24, %v915_v25 }
 0x2f6   : > { %v2659_v30 = vmul.f32 %v2650_v24, %v918_v27 }
 0x2f7   : > { %v2665_v2 = vmul.f32 %v2650_v24, %v916_v28 }
 0x2f8   : > { %v2169_v0 = vpack.i.bf16 %v2659_v30, %v2656_v29 }
 0x2f9   : > { %v2164_v4 = vpack.i.bf16 %v2665_v2, %v2662_v31 }
 0x2fa   : > { %2170 = vrot.lane.b32.xlu0 %v2169_v0, %s2402_s25 }
 0x2fb   : > { %2165 = vrot.lane.b32.xlu1 %v2164_v4, %s2402_s25 }
 0x36c   : > { %v2171_v1 = vpop.permute.xlu0 %2170 }
 0x36d   : > { %v2166_v32 = vpop.permute.xlu1 %2165  ;;  %v2173_v33 = vunpack.i.h.bf16 %v2171_v1  ;;  %v2172_v34 = vunpack.i.l.bf16 %v2171_v1 }
 0x36e   : > { %v2168_v35 = vunpack.i.h.bf16 %v2166_v32  ;;  %v2167_v36 = vunpack.i.l.bf16 %v2166_v32 }
 0x36f   : > { %v1862_v44 = vpack.c.bf16 %v2173_v33, %v2172_v34  ;;  %v979_v46 = vsel %vm975_vm7, 0.0, %v2173_v33  ;;  %v983_v47 = vsel %vm975_vm7, %v2173_v33, 0.0  ;;  %v978_v48 = vsel %vm975_vm7, 0.0, %v2172_v34 }
 0x370   : > { %v1857_v38 = vpack.c.bf16 %v2168_v35, %v2167_v36  ;;  %v977_v39 = vsel %vm975_vm7, 0.0, %v2168_v35  ;;  %v981_v40 = vsel %vm975_vm7, %v2168_v35, 0.0  ;;  %v976_v41 = vsel %vm975_vm7, 0.0, %v2167_v36 }
 0x371   : > { %v2184_v42 = vpack.i.bf16 %v981_v40, %v977_v39  ;;  %v980_v43 = vsel %vm975_vm7, %v2167_v36, 0.0  ;;  %v982_v49 = vsel %vm975_vm7, %v2172_v34, 0.0  ;;  %v2189_v52 = vpack.i.bf16 %v983_v47, %v979_v46  ;;  %v2275_v46 = vld [vmem:[%s2973_s6 + $0x18] sm:$0xff]   ;;  %v2276_v47 = vld [vmem:[%s2975_s8] sm:$0xff]  }
 0x372   : > { %1983 = vmatprep.subr.msk.bf16.mxu1 %vm2672_vm9, %v1857_v38  ;;  %v2174_v45 = vpack.i.bf16 %v980_v43, %v976_v41  ;;  %v2179_v53 = vpack.i.bf16 %v982_v49, %v978_v48 }
 0x373   : > { %2185 = vrot.lane.b32.xlu0 %v2184_v42, %s2998_s28  ;;  %1984 = vmatpush3.bf16.msk.msra.mxu1 %vm2672_vm9, %v1857_v38 }
 0x374   : > { %2175 = vrot.lane.b32.xlu1 %v2174_v45, %s2998_s28  ;;  %1985 = vmatprep.subr.msk.bf16.mxu1 %vm2672_vm9, %v1862_v44 }
 0x377   : > { %2190 = vrot.lane.b32.xlu0 %v2189_v52, %s2998_s28  ;;  %1986 = vmatpush3.bf16.msk.msra.mxu1 %vm2672_vm9, %v1862_v44  ;;  %v2273_v44 = vld [vmem:[%s2973_s6 + $0x8] sm:$0xff]  }
 0x378   : > { %2180 = vrot.lane.b32.xlu1 %v2179_v53, %s2998_s28  ;;  %s2922_s28 = scalar_lea.hbm %s2981_s14, %s1904_s15 }
 0x37b   : > { %2205 = vrot.lane.b32.xlu0 %v2184_v42, %s2403_s21 }
 0x37c   : > { %2195 = vrot.lane.b32.xlu1 %v2174_v45, %s2403_s21  ;;  %v2274_v45 = vld [vmem:[%s2973_s6 + $0x10] sm:$0xff]  }
 0x37f   : > { %2210 = vrot.lane.b32.xlu0 %v2189_v52, %s2403_s21 }
 0x380   : > { %2200 = vrot.lane.b32.xlu1 %v2179_v53, %s2403_s21 }
 0x383   : > { %1054 = vperm.xlu0 %2162, %v936_v55  }
 0x384   : > { %1049 = vperm.xlu1 %2163, %v935_v56  }
 0x387   : > { %1064 = vperm.xlu0 %2162, %v938_v57  }
 0x388   : > { %1059 = vperm.xlu1 %2163, %v937_v58  }
 0x38b   : > { %1074 = vperm.xlu0 %2162, %v940_v59  }
 0x38c   : > { %1069 = vperm.xlu1 %2163, %v939_v60  }
 0x38f   : > { %1084 = vperm.xlu0 %2162, %v942_v61  }
 0x390   : > { %1079 = vperm.xlu1 %2163, %v941_v62  }
 0x393   : > { %1217 = vperm.xlu0 %2162, %v952_v63  }
 0x394   : > { %1212 = vperm.xlu1 %2163, %v951_v3  }
 0x397   : > { %1227 = vperm.xlu0 %2162, %v954_v5  }
 0x398   : > { %1222 = vperm.xlu1 %2163, %v953_v6  }
 0x3e5   : > { %v2186_v7 = vpop.permute.xlu0 %2185 }
 0x3e6   : > { %v2188_v8 = vunpack.i.h.bf16 %v2186_v7  ;;  %v2187_v9 = vunpack.i.l.bf16 %v2186_v7  ;;  %v2176_v10 = vpop.permute.xlu1 %2175 }
 0x3e7   : > { %v2178_v11 = vunpack.i.h.bf16 %v2176_v10  ;;  %v2177_v12 = vunpack.i.l.bf16 %v2176_v10 }
 0x3e8   : > { %v1009_v13 = vsel %vm598_vm5, %v2187_v9, %v2188_v8 }
 0x3e9   : > { %v2191_v14 = vpop.permute.xlu0 %2190  ;;  %v1008_v15 = vsel %vm598_vm5, %v2177_v12, %v2178_v11 }
 0x3ea   : > { %v2193_v16 = vunpack.i.h.bf16 %v2191_v14  ;;  %v2192_v17 = vunpack.i.l.bf16 %v2191_v14  ;;  %v2181_v18 = vpop.permute.xlu1 %2180  ;;  %v1043_v19 = vpack.c.bf16 %v1009_v13, %v1008_v15 }
 0x3eb   : > { %v2183_v20 = vunpack.i.h.bf16 %v2181_v18  ;;  %v2182_v21 = vunpack.i.l.bf16 %v2181_v18 }
 0x3ec   : > { %1987 = vmatprep.subr.bf16.mxu1 %v1043_v19  ;;  %v1011_v22 = vsel %vm598_vm5, %v2192_v17, %v2193_v16 }
 0x3ed   : > { %1988 = vmatpush3.bf16.msra.mxu1 %v1043_v19  ;;  %v2206_v23 = vpop.permute.xlu0 %2205  ;;  %v1010_v25 = vsel %vm598_vm5, %v2182_v21, %v2183_v20 }
 0x3ee   : > { %v2208_v26 = vunpack.i.h.bf16 %v2206_v23  ;;  %v2207_v27 = vunpack.i.l.bf16 %v2206_v23  ;;  %v2196_v28 = vpop.permute.xlu1 %2195  ;;  %v1044_v0 = vpack.c.bf16 %v1011_v22, %v1010_v25 }
 0x3ef   : > { %v2198_v4 = vunpack.i.h.bf16 %v2196_v28  ;;  %v2197_v1 = vunpack.i.l.bf16 %v2196_v28 }
 0x3f0   : > { %1989 = vmatprep.subr.bf16.mxu1 %v1044_v0  ;;  %v1034_v32 = vsel %vm1032_vm10, %v2207_v27, %v2208_v26 }
 0x3f1   : > { %1990 = vmatpush3.bf16.msra.mxu1 %v1044_v0  ;;  %v2211_v33 = vpop.permute.xlu0 %2210  ;;  %v1033_v34 = vsel %vm1032_vm10, %v2197_v1, %v2198_v4 }
 0x3f2   : > { %v2213_v35 = vunpack.i.h.bf16 %v2211_v33  ;;  %v2212_v36 = vunpack.i.l.bf16 %v2211_v33  ;;  %v2201_v37 = vpop.permute.xlu1 %2200  ;;  %v1045_v38 = vpack.c.bf16 %v1034_v32, %v1033_v34 }
 0x3f3   : > { %v2203_v39 = vunpack.i.h.bf16 %v2201_v37  ;;  %v2202_v40 = vunpack.i.l.bf16 %v2201_v37 }
 0x3f4   : > { %1991 = vmatprep.subr.bf16.mxu1 %v1045_v38  ;;  %v1036_v41 = vsel %vm1032_vm10, %v2212_v36, %v2213_v35 }
 0x3f5   : > { %1992 = vmatpush3.bf16.msra.mxu1 %v1045_v38  ;;  %v1035_v42 = vsel %vm1032_vm10, %v2202_v40, %v2203_v39  ;;  %v2277_v39 = vld [vmem:[%s2975_s8 + $0x8] sm:$0xff]  }
 0x3f6   : > { %v1046_v43 = vpack.c.bf16 %v1036_v41, %v1035_v42 }
 0x3f8   : > { %1993 = vmatprep.subr.bf16.mxu1 %v1046_v43 }
 0x3f9   : > { %1994 = vmatpush3.bf16.msra.mxu1 %v1046_v43 }
 0x3fc   : > { %1996 = vmatmul.mubr.msk.bf16.vlgmr.msra.gmra.mrb[8].mxu1 %vm673_vm3, %v2273_v44 }
 0x3fd   : > { %1999 = vmatprep.mubr.msk.bf16.mxu1 %vm673_vm3, %v2274_v45 }
 0x402   : > { %v1055_v49 = vpop.permute.xlu0 %1054 }
 0x403   : > { %v1050_v48 = vpop.permute.xlu1 %1049 }
 0x404   : > { %2000 = vmatmul.mubr.msk.bf16.gmra.mrb[12].mxu1 %vm673_vm3, %v2275_v46 }
 0x405   : > { %2007 = vmatprep.mubr.msk.bf16.mxu1 %vm837_vm6, %v2276_v47 }
 0x406   : > { %v1065_v51 = vpop.permute.xlu0 %1064 }
 0x407   : > { %v1060_v50 = vpop.permute.xlu1 %1059 }
 0x40a   : > { %v1075_v61 = vpop.permute.xlu0 %1074 }
 0x40b   : > { %v1070_v55 = vpop.permute.xlu1 %1069 }
 0x40e   : > { %v1085_v10 = vpop.permute.xlu0 %1084 }
 0x40f   : > { %v1080_v6 = vpop.permute.xlu1 %1079 }
 0x412   : > { %v1218_v41 = vpop.permute.xlu0 %1217 }
 0x413   : > { %v1213_v40 = vpop.permute.xlu1 %1212 }
 0x416   : > { %v1228_v46 = vpop.permute.xlu0 %1227 }
 0x417   : > { %v1223_v42 = vpop.permute.xlu1 %1222 }
 0x4cf   : > { %v1997_v52 = vpop.f32.mrb[8].mxu1 }
 0x4d0   : > { %v1162_v53 = vadd.f32 %v1997_v52, %v1060_v50  ;;  %v1153_v54 = vpop.f32.mrb[9].mxu1 }
 0x4d1   : > { %v1154_v56 = vadd.f32 %v1153_v54, %v1050_v48  ;;  %v1998_v57 = vpop.f32.mrb[10].mxu1 }
 0x4d2   : > { %v1186_v58 = vmul.f32 0.5, %v1162_v53  ;;  %v1165_v59 = vadd.f32 %v1998_v57, %v1065_v51  ;;  %v1156_v60 = vpop.f32.mrb[11].mxu1 }
 0x4d3   : > { %v1184_v62 = vmul.f32 0.5, %v1154_v56  ;;  %v1157_v63 = vadd.f32 %v1156_v60, %v1055_v49 }
 0x4d4   : > { %2302 = vtanh.f32 %v1186_v58  ;;  %v1187_v3 = vmul.f32 0.5, %v1165_v59 }
 0x4d5   : > { %2304 = vtanh.f32 %v1184_v62  ;;  %v1185_v5 = vmul.f32 0.5, %v1157_v63 }
 0x4d6   : > { %2306 = vtanh.f32 %v1187_v3 }
 0x4d7   : > { %2308 = vtanh.f32 %v1185_v5  ;;  %v2001_v7 = vpop.f32.mrb[12].mxu1 }
 0x4d8   : > { %v1178_v8 = vadd.f32 %v2001_v7, %v1080_v6  ;;  %v1169_v9 = vpop.f32.mrb[13].mxu1 }
 0x4d9   : > { %v1170_v11 = vadd.f32 %v1169_v9, %v1070_v55  ;;  %v2002_v12 = vpop.f32.mrb[14].mxu1 }
 0x4da   : > { %2310 = vtanh.f32 %v1178_v8  ;;  %v1181_v13 = vadd.f32 %v2002_v12, %v1085_v10  ;;  %v1172_v14 = vpop.f32.mrb[15].mxu1 }
 0x4db   : > { %2312 = vtanh.f32 %v1170_v11  ;;  %v1173_v15 = vadd.f32 %v1172_v14, %v1075_v61 }
 0x4dc   : > { %2314 = vtanh.f32 %v1181_v13 }
 0x4dd   : > { %2316 = vtanh.f32 %v1173_v15 }
 0x4de   : > { %v2303_v16 = vpop.eup %2302 }
 0x4df   : > { %v2305_v17 = vpop.eup %2304  ;;  %v1194_v18 = vadd.f32 1.0, %v2303_v16 }
 0x4e0   : > { %v2307_v19 = vpop.eup %2306  ;;  %v1192_v20 = vadd.f32 1.0, %v2305_v17 }
 0x4e1   : > { %v2309_v21 = vpop.eup %2308  ;;  %v1195_v22 = vadd.f32 1.0, %v2307_v19  ;;  %v1198_v25 = vmul.f32 0.5, %v1194_v18  ;;  %v2278_v19 = vld [vmem:[%s2977_s10] sm:$0xff]  }
 0x4e2   : > { %v1193_v23 = vadd.f32 1.0, %v2309_v21  ;;  %v1196_v27 = vmul.f32 0.5, %v1192_v20  ;;  %2027 = vmatprep.mubr.msk.bf16.mxu0 %vm673_vm3, %v2278_v19  ;;  %v1368_v20 = vld [vmem:[%s2978_s11 + $0x8] sm:$0xff]  ;;  %v1367_v21 = vld [vmem:[%s2978_s11] sm:$0xff] }
 0x4e3   : > { %v1199_v0 = vmul.f32 0.5, %v1195_v22  ;;  %v1370_v22 = vld [vmem:[%s2978_s11 + $0x18] sm:$0xff] }
 0x4e4   : > { %v2311_v26 = vpop.eup %2310  ;;  %v1197_v32 = vmul.f32 0.5, %v1193_v23  ;;  %v1369_v23 = vld [vmem:[%s2978_s11 + $0x10] sm:$0xff] }
 0x4e5   : > { %v2313_v28 = vpop.eup %2312  ;;  %v1206_v4 = vmul.f32 %v2311_v26, %v1198_v25  ;;  %v1372_v25 = vld [vmem:[%s2978_s11 + $0x28] sm:$0xff]  ;;  %v1371_v26 = vld [vmem:[%s2978_s11 + $0x20] sm:$0xff] }
 0x4e6   : > { %v2315_v1 = vpop.eup %2314  ;;  %v1204_v33 = vmul.f32 %v2313_v28, %v1196_v27  ;;  %v1374_v27 = vld [vmem:[%s2978_s11 + $0x38] sm:$0xff]  ;;  %v1373_v28 = vld [vmem:[%s2978_s11 + $0x30] sm:$0xff] }
 0x4e7   : > { %v2317_v34 = vpop.eup %2316  ;;  %v1207_v35 = vmul.f32 %v2315_v1, %v1199_v0  ;;  %v521_v0 = vld [vmem:[%s2972_s5 + $0x28] sm:$0xff]  ;;  %v523_v1 = vld [vmem:[%s2972_s5 + $0x38] sm:$0xff] }
 0x4e8   : > { %v1205_v36 = vmul.f32 %v2317_v34, %v1197_v32  ;;  %v522_v32 = vld [vmem:[%s2972_s5 + $0x30] sm:$0xff]  ;;  %v955_v34 = vld [vmem:[%s2976_s9 + $0x20] sm:$0xff] }
 0x4e9   : > { %v1209_v37 = vpack.c.bf16 %v1207_v35, %v1206_v4  ;;  %v520_v4 = vld [vmem:[%s2972_s5 + $0x20] sm:$0xff]  ;;  %v958_v35 = vld [vmem:[%s2976_s9 + $0x38] sm:$0xff] }
 0x4ea   : > { %v1208_v38 = vpack.c.bf16 %v1205_v36, %v1204_v33  ;;  %v956_v33 = vld [vmem:[%s2976_s9 + $0x28] sm:$0xff]  ;;  %v957_v36 = vld [vmem:[%s2976_s9 + $0x30] sm:$0xff] }
 0x4ec   : > { %2003 = vmatprep.subr.bf16.mxu1 %v1208_v38 }
 0x4ed   : > { %2004 = vmatpush3.bf16.msra.mxu1 %v1208_v38  ;;  %v1379_v38 = vld [vmem:[%s2980_s13] sm:$0xff] }
 0x4ee   : > { %2005 = vmatprep.subr.bf16.mxu1 %v1209_v37 }
 0x4f1   : > { %2006 = vmatpush3.bf16.msra.mxu1 %v1209_v37  ;;  %v1380_v37 = vld [vmem:[%s2980_s13 + $0x8] sm:$0xff] }
 0x4f4   : > { %2008 = vmatmul.mubr.msk.bf16.vlgmr.msra.gmra.mrb[16].mxu1 %vm837_vm6, %v2277_v39  ;;  %v1382_v39 = vld [vmem:[%s2980_s13 + $0x18] sm:$0xff] }
 0x5c7   : > { %v2009_v43 = vpop.f32.mrb[16].mxu1 }
 0x5c8   : > { %v1325_v44 = vadd.f32 %v2009_v43, %v1223_v42  ;;  %v1316_v45 = vpop.f32.mrb[17].mxu1 }
 0x5c9   : > { %v1317_v47 = vadd.f32 %v1316_v45, %v1213_v40  ;;  %v2010_v48 = vpop.f32.mrb[18].mxu1  ;;  %v1381_v40 = vld [vmem:[%s2980_s13 + $0x10] sm:$0xff] }
 0x5ca   : > { %v1349_v49 = vadd.f32 %v1325_v44, %v2656_v29  ;;  %v1328_v50 = vadd.f32 %v2010_v48, %v1228_v46  ;;  %v1319_v51 = vpop.f32.mrb[19].mxu1 }
 0x5cb   : > { %v1347_v52 = vadd.f32 %v1317_v47, %v2662_v31  ;;  %v1320_v53 = vadd.f32 %v1319_v51, %v1218_v41 }
 0x5cc   : > { %v1350_v54 = vadd.f32 %v1328_v50, %v2659_v30  ;;  %v1353_v56 = vmul.f32 %v2650_v24, %v1349_v49 }
 0x5cd   : > { %v1348_v55 = vadd.f32 %v1320_v53, %v2665_v2  ;;  %v1351_v58 = vmul.f32 %v2650_v24, %v1347_v52 }
 0x5ce   : > { %v1354_v57 = vmul.f32 %v2650_v24, %v1350_v54 }
 0x5cf   : > { %v1352_v59 = vmul.f32 %v2650_v24, %v1348_v55 }
 0x5d0   : > { %v2219_v60 = vpack.i.bf16 %v1354_v57, %v1353_v56 }
 0x5d1   : > { %v2214_v61 = vpack.i.bf16 %v1352_v59, %v1351_v58 }
 0x5d2   : > { %2220 = vrot.lane.b32.xlu0 %v2219_v60, %s2404_s18 }
 0x5d3   : > { %2215 = vrot.lane.b32.xlu1 %v2214_v61, %s2404_s18 }
 0x644   : > { %v2221_v29 = vpop.permute.xlu0 %2220 }
 0x645   : > { %v2216_v30 = vpop.permute.xlu1 %2215  ;;  %v2223_v31 = vunpack.i.h.bf16 %v2221_v29  ;;  %v2222_v2 = vunpack.i.l.bf16 %v2221_v29 }
 0x646   : > { %v2218_v62 = vunpack.i.h.bf16 %v2216_v30  ;;  %v2217_v63 = vunpack.i.l.bf16 %v2216_v30 }
 0x647   : > { %v1888_v11 = vpack.c.bf16 %v2223_v31, %v2222_v2  ;;  %v1403_v13 = vsel %vm1399_vm11, 0.0, %v2223_v31  ;;  %v1407_v14 = vsel %vm1399_vm11, %v2223_v31, 0.0  ;;  %v1402_v15 = vsel %vm1399_vm11, 0.0, %v2222_v2 }
 0x648   : > { %v1883_v5 = vpack.c.bf16 %v2218_v62, %v2217_v63  ;;  %v1401_v6 = vsel %vm1399_vm11, 0.0, %v2218_v62  ;;  %v1405_v7 = vsel %vm1399_vm11, %v2218_v62, 0.0  ;;  %v1400_v8 = vsel %vm1399_vm11, 0.0, %v2217_v63 }
 0x649   : > { %v2234_v9 = vpack.i.bf16 %v1405_v7, %v1401_v6  ;;  %v1404_v10 = vsel %vm1399_vm11, %v2217_v63, 0.0  ;;  %v1406_v16 = vsel %vm1399_vm11, %v2222_v2, 0.0  ;;  %v2239_v17 = vpack.i.bf16 %v1407_v14, %v1403_v13  ;;  %v2279_v13 = vld [vmem:[%s2977_s10 + $0x8] sm:$0xff]   ;;  %v2280_v14 = vld [vmem:[%s2977_s10 + $0x10] sm:$0xff]  }
 0x64a   : > { %2015 = vmatprep.subr.msk.bf16.mxu0 %vm2785_vm13, %v1883_v5  ;;  %v2224_v12 = vpack.i.bf16 %v1404_v10, %v1400_v8  ;;  %v2229_v18 = vpack.i.bf16 %v1406_v16, %v1402_v15  ;;  %v2281_v15 = vld [vmem:[%s2977_s10 + $0x18] sm:$0xff]   ;;  %v2282_v16 = vld [vmem:[%s2975_s8 + $0x10] sm:$0xff]  }
 0x64b   : > { %2235 = vrot.lane.b32.xlu0 %v2234_v9, %s2403_s21  ;;  %2016 = vmatpush3.bf16.msk.msra.mxu0 %vm2785_vm13, %v1883_v5 }
 0x64c   : > { %2225 = vrot.lane.b32.xlu1 %v2224_v12, %s2403_s21  ;;  %2017 = vmatprep.subr.msk.bf16.mxu0 %vm2785_vm13, %v1888_v11 }
 0x64d   : > { %2011 = vmatprep.mubr.msk.bf16.mxu1 %vm837_vm6, %v2282_v16 }
 0x64f   : > { %2240 = vrot.lane.b32.xlu0 %v2239_v17, %s2403_s21  ;;  %2018 = vmatpush3.bf16.msk.msra.mxu0 %vm2785_vm13, %v1888_v11 }
 0x650   : > { %2230 = vrot.lane.b32.xlu1 %v2229_v18, %s2403_s21 }
 0x653   : > { %2255 = vrot.lane.b32.xlu0 %v2234_v9, %s2405_s22 }
 0x654   : > { %2245 = vrot.lane.b32.xlu1 %v2224_v12, %s2405_s22 }
 0x657   : > { %2260 = vrot.lane.b32.xlu0 %v2239_v17, %s2405_s22  ;;  %v2283_v17 = vld [vmem:[%s2975_s8 + $0x18] sm:$0xff]  }
 0x658   : > { %2250 = vrot.lane.b32.xlu1 %v2229_v18, %s2405_s22  ;;  %2012 = vmatmul.mubr.msk.bf16.gmra.mrb[4].mxu1 %vm837_vm6, %v2283_v17  ;;  %v2284_v18 = vld [vmem:[%s2979_s12] sm:$0xff]   ;;  %s469_s22 = sand.u32 1, %s2388_s30  }
 0x659   : > { %2039 = vmatprep.mubr.msk.bf16.mxu1 %vm837_vm6, %v2284_v18  ;;  %s1820_s19 = sshll.u32 %s469_s22, 5  ;;  %s2926_s17 = scalar_lea.sflag [#allocation3], %s469_s22 }
 0x65a   : > { %s471_s26 = scalar_lea.vmem [#allocation2], %s1820_s19  ;;  %s2340_s19 = scalar_lea.vmem %s2339_s0, 1024 }
 0x65b   : > { %1478 = vperm.xlu0 %2162, %v1368_v20   ;;  %s1745_s27 = sshll.u32 %s471_s26, 4  ;;  %s2915_s27 = int_to_ptr.vmem [resolvable:$true] %s1745_s27 }
 0x65c   : > { %1473 = vperm.xlu1 %2163, %v1367_v21   ;;  %s2334_s18 = scalar_lea.vmem %s2915_s27, 512  ;;  %p2341_p0 = scmp.lt.s32.totalorder %s2915_s27, %s2339_s0 }
 0x65d   : > { %p2335_p11 = scmp.ne.s32.totalorder %s2915_s27, %s2334_s18  ;;  %p2342_p1 = scmp.lt.s32.totalorder %s2340_s19, %s2334_s18 }
 0x65f   : > { %1488 = vperm.xlu0 %2162, %v1370_v22   ;;  %p2336_p12 = pnand %p2335_p11, %p2522_p5  ;;  %p2343_p2 = por %p2342_p1, %p2341_p0 }
 0x660   : > { %1483 = vperm.xlu1 %2163, %v1369_v23  }
 0x661   : > { %p2337_p13 = pneg %p2336_p12 }
 0x663   : > { %1498 = vperm.xlu0 %2162, %v1372_v25   ;;  %p2344_p3 = pnand %p2343_p2, %p2337_p13 }
 0x664   : > { %1493 = vperm.xlu1 %2163, %v1371_v26  }
 0x667   : > { %1508 = vperm.xlu0 %2162, %v1374_v27  }
 0x668   : > { %1503 = vperm.xlu1 %2163, %v1373_v28  }
 0x66b   : > { %804 = vperm.xlu0 %2162, %v521_v0  }
 0x66c   : > { %799 = vperm.xlu1 %2163, %v520_v4  }
 0x66f   : > { %814 = vperm.xlu0 %2162, %v523_v1  }
 0x670   : > { %809 = vperm.xlu1 %2163, %v522_v32  }
 0x673   : > { %1237 = vperm.xlu0 %2162, %v956_v33  }
 0x674   : > { %1232 = vperm.xlu1 %2163, %v955_v34  }
 0x677   : > { %1247 = vperm.xlu0 %2162, %v958_v35  }
 0x678   : > { %1242 = vperm.xlu1 %2163, %v957_v36  }
 0x67b   : > { %1641 = vperm.xlu0 %2162, %v1380_v37  }
 0x67c   : > { %1636 = vperm.xlu1 %2163, %v1379_v38  }
 0x67f   : > { %1651 = vperm.xlu0 %2162, %v1382_v39  }
 0x680   : > { %1646 = vperm.xlu1 %2163, %v1381_v40  }
 0x6bd   : > { %v2236_v41 = vpop.permute.xlu0 %2235 }
 0x6be   : > { %v2238_v42 = vunpack.i.h.bf16 %v2236_v41  ;;  %v2237_v43 = vunpack.i.l.bf16 %v2236_v41  ;;  %v2226_v44 = vpop.permute.xlu1 %2225 }
 0x6bf   : > { %v2228_v45 = vunpack.i.h.bf16 %v2226_v44  ;;  %v2227_v46 = vunpack.i.l.bf16 %v2226_v44 }
 0x6c0   : > { %v1433_v47 = vsel %vm1032_vm10, %v2237_v43, %v2238_v42 }
 0x6c1   : > { %v2241_v48 = vpop.permute.xlu0 %2240  ;;  %v1432_v49 = vsel %vm1032_vm10, %v2227_v46, %v2228_v45 }
 0x6c2   : > { %v2243_v50 = vunpack.i.h.bf16 %v2241_v48  ;;  %v2242_v51 = vunpack.i.l.bf16 %v2241_v48  ;;  %v2231_v52 = vpop.permute.xlu1 %2230  ;;  %v1467_v53 = vpack.c.bf16 %v1433_v47, %v1432_v49 }
 0x6c3   : > { %v2233_v54 = vunpack.i.h.bf16 %v2231_v52  ;;  %v2232_v55 = vunpack.i.l.bf16 %v2231_v52 }
 0x6c4   : > { %2019 = vmatprep.subr.bf16.mxu0 %v1467_v53  ;;  %v1435_v56 = vsel %vm1032_vm10, %v2242_v51, %v2243_v50 }
 0x6c5   : > { %2020 = vmatpush3.bf16.msra.mxu0 %v1467_v53  ;;  %v2256_v57 = vpop.permute.xlu0 %2255  ;;  %v1434_v58 = vsel %vm1032_vm10, %v2232_v55, %v2233_v54 }
 0x6c6   : > { %v2258_v59 = vunpack.i.h.bf16 %v2256_v57  ;;  %v2257_v60 = vunpack.i.l.bf16 %v2256_v57  ;;  %v2246_v61 = vpop.permute.xlu1 %2245  ;;  %v1468_v29 = vpack.c.bf16 %v1435_v56, %v1434_v58 }
 0x6c7   : > { %v2248_v30 = vunpack.i.h.bf16 %v2246_v61  ;;  %v2247_v31 = vunpack.i.l.bf16 %v2246_v61 }
 0x6c8   : > { %2021 = vmatprep.subr.bf16.mxu0 %v1468_v29  ;;  %v1458_v2 = vsel %vm1456_vm14, %v2257_v60, %v2258_v59 }
 0x6c9   : > { %2022 = vmatpush3.bf16.msra.mxu0 %v1468_v29  ;;  %v2261_v62 = vpop.permute.xlu0 %2260  ;;  %v1457_v63 = vsel %vm1456_vm14, %v2247_v31, %v2248_v30 }
 0x6ca   : > { %v2263_v3 = vunpack.i.h.bf16 %v2261_v62  ;;  %v2262_v5 = vunpack.i.l.bf16 %v2261_v62  ;;  %v2251_v6 = vpop.permute.xlu1 %2250  ;;  %v1469_v7 = vpack.c.bf16 %v1458_v2, %v1457_v63 }
 0x6cb   : > { %v2253_v8 = vunpack.i.h.bf16 %v2251_v6  ;;  %v2252_v9 = vunpack.i.l.bf16 %v2251_v6  ;;  %v2285_v6 = vld [vmem:[%s2979_s12 + $0x8] sm:$0xff]  }
 0x6cc   : > { %2023 = vmatprep.subr.bf16.mxu0 %v1469_v7  ;;  %v1460_v10 = vsel %vm1456_vm14, %v2262_v5, %v2263_v3 }
 0x6cd   : > { %2024 = vmatpush3.bf16.msra.mxu0 %v1469_v7  ;;  %v1459_v11 = vsel %vm1456_vm14, %v2252_v9, %v2253_v8 }
 0x6ce   : > { %v1470_v12 = vpack.c.bf16 %v1460_v10, %v1459_v11 }
 0x6d0   : > { %2025 = vmatprep.subr.bf16.mxu0 %v1470_v12 }
 0x6d1   : > { %2026 = vmatpush3.bf16.msra.mxu0 %v1470_v12 }
 0x6d4   : > { %2028 = vmatmul.mubr.msk.bf16.vlgmr.msra.gmra.mrb[8].mxu0 %vm673_vm3, %v2279_v13 }
 0x6d5   : > { %2031 = vmatprep.mubr.msk.bf16.mxu0 %vm673_vm3, %v2280_v14 }
 0x6da   : > { %v1479_v20 = vpop.permute.xlu0 %1478 }
 0x6db   : > { %v1474_v19 = vpop.permute.xlu1 %1473 }
 0x6dc   : > { %2032 = vmatmul.mubr.msk.bf16.gmra.mrb[12].mxu0 %vm673_vm3, %v2281_v15 }
 0x6de   : > { %v1489_v22 = vpop.permute.xlu0 %1488 }
 0x6df   : > { %v1484_v21 = vpop.permute.xlu1 %1483 }
 0x6e2   : > { %v1499_v33 = vpop.permute.xlu0 %1498 }
 0x6e3   : > { %v1494_v27 = vpop.permute.xlu1 %1493 }
 0x6e6   : > { %v1509_v42 = vpop.permute.xlu0 %1508 }
 0x6e7   : > { %v1504_v38 = vpop.permute.xlu1 %1503 }
 0x6ea   : > { %v805_v8 = vpop.permute.xlu0 %804 }
 0x6eb   : > { %v800_v7 = vpop.permute.xlu1 %799 }
 0x6ee   : > { %v815_v10 = vpop.permute.xlu0 %814 }
 0x6ef   : > { %v810_v9 = vpop.permute.xlu1 %809 }
 0x6f2   : > { %v1238_v12 = vpop.permute.xlu0 %1237 }
 0x6f3   : > { %v1233_v11 = vpop.permute.xlu1 %1232 }
 0x6f6   : > { %v1248_v14 = vpop.permute.xlu0 %1247 }
 0x6f7   : > { %v1243_v13 = vpop.permute.xlu1 %1242 }
 0x6f8   : > { %v2043_v18 = vadd.f32 %v1243_v13, %v810_v9 }
 0x6fa   : > { %v1642_v16 = vpop.permute.xlu0 %1641 }
 0x6fb   : > { %v1637_v15 = vpop.permute.xlu1 %1636 }
 0x6ff   : > { %v1647_v17 = vpop.permute.xlu1 %1646 }
 0x7a7   : > { %v2029_v23 = vpop.f32.mrb[8].mxu0 }
 0x7a8   : > { %v1586_v25 = vadd.f32 %v2029_v23, %v1484_v21  ;;  %v1577_v26 = vpop.f32.mrb[9].mxu0  ;;  %v2049_v21 = vadd.f32 %v1248_v14, %v815_v10  ;;  %v2052_v23 = vadd.f32 %v1238_v12, %v805_v8 }
 0x7a9   : > { %v1578_v28 = vadd.f32 %v1577_v26, %v1474_v19  ;;  %v2030_v0 = vpop.f32.mrb[10].mxu0  ;;  %v2046_v19 = vadd.f32 %v1233_v11, %v800_v7 }
 0x7aa   : > { %v1610_v4 = vmul.f32 0.5, %v1586_v25  ;;  %v1589_v1 = vadd.f32 %v2030_v0, %v1489_v22  ;;  %v1580_v32 = vpop.f32.mrb[11].mxu0  ;;  %v2044_v22 = vadd.f32 %v2043_v18, %v1647_v17 }
 0x7ab   : > { %v1608_v34 = vmul.f32 0.5, %v1578_v28  ;;  %v1581_v35 = vadd.f32 %v1580_v32, %v1479_v20  ;;  %v1652_v20 = vpop.permute.xlu0 %1651  ;;  %v2047_v25 = vadd.f32 %v2046_v19, %v1637_v15 }
 0x7ac   : > { %2318 = vtanh.f32 %v1610_v4  ;;  %v1611_v36 = vmul.f32 0.5, %v1589_v1  ;;  %v2053_v4 = vadd.f32 %v2052_v23, %v1642_v16 }
 0x7ad   : > { %2320 = vtanh.f32 %v1608_v34  ;;  %v1609_v37 = vmul.f32 0.5, %v1581_v35 }
 0x7ae   : > { %2322 = vtanh.f32 %v1611_v36 }
 0x7af   : > { %2324 = vtanh.f32 %v1609_v37  ;;  %v2033_v39 = vpop.f32.mrb[12].mxu0 }
 0x7b0   : > { %v1602_v40 = vadd.f32 %v2033_v39, %v1504_v38  ;;  %v1593_v41 = vpop.f32.mrb[13].mxu0 }
 0x7b1   : > { %v1594_v43 = vadd.f32 %v1593_v41, %v1494_v27  ;;  %v2034_v44 = vpop.f32.mrb[14].mxu0  ;;  %v2050_v27 = vadd.f32 %v2049_v21, %v1652_v20 }
 0x7b2   : > { %2326 = vtanh.f32 %v1602_v40  ;;  %v1605_v45 = vadd.f32 %v2034_v44, %v1509_v42  ;;  %v1596_v46 = vpop.f32.mrb[15].mxu0 }
 0x7b3   : > { %2328 = vtanh.f32 %v1594_v43  ;;  %v1597_v47 = vadd.f32 %v1596_v46, %v1499_v33 }
 0x7b4   : > { %2330 = vtanh.f32 %v1605_v45 }
 0x7b5   : > { %2332 = vtanh.f32 %v1597_v47 }
 0x7b6   : > { %v2319_v48 = vpop.eup %2318 }
 0x7b7   : > { %v2321_v49 = vpop.eup %2320  ;;  %v1618_v50 = vadd.f32 1.0, %v2319_v48 }
 0x7b8   : > { %v2323_v51 = vpop.eup %2322  ;;  %v1616_v52 = vadd.f32 1.0, %v2321_v49 }
 0x7b9   : > { %v2325_v53 = vpop.eup %2324  ;;  %v1619_v54 = vadd.f32 1.0, %v2323_v51  ;;  %v1622_v56 = vmul.f32 0.5, %v1618_v50 }
 0x7ba   : > { %v1617_v55 = vadd.f32 1.0, %v2325_v53  ;;  %v1620_v58 = vmul.f32 0.5, %v1616_v52 }
 0x7bb   : > { %v1623_v60 = vmul.f32 0.5, %v1619_v54 }
 0x7bc   : > { %v2327_v57 = vpop.eup %2326  ;;  %v1621_v30 = vmul.f32 0.5, %v1617_v55 }
 0x7bd   : > { %v2329_v59 = vpop.eup %2328  ;;  %v1630_v61 = vmul.f32 %v2327_v57, %v1622_v56 }
 0x7be   : > { %v2331_v29 = vpop.eup %2330  ;;  %v1628_v31 = vmul.f32 %v2329_v59, %v1620_v58 }
 0x7bf   : > { %v2333_v2 = vpop.eup %2332  ;;  %v1631_v62 = vmul.f32 %v2331_v29, %v1623_v60 }
 0x7c0   : > { %v1629_v63 = vmul.f32 %v2333_v2, %v1621_v30 }
 0x7c1   : > { %v1633_v3 = vpack.c.bf16 %v1631_v62, %v1630_v61 }
 0x7c2   : > { %v1632_v5 = vpack.c.bf16 %v1629_v63, %v1628_v31 }
 0x7c4   : > { %2035 = vmatprep.subr.bf16.mxu1 %v1632_v5 }
 0x7c5   : > { %2036 = vmatpush3.bf16.msra.mxu1 %v1632_v5 }
 0x7c6   : > { %2037 = vmatprep.subr.bf16.mxu1 %v1633_v3 }
 0x7c9   : > { %2038 = vmatpush3.bf16.msra.mxu1 %v1633_v3 }
 0x7cc   : > { %2040 = vmatmul.mubr.msk.bf16.vlgmr.msra.gmra.mrb[4].mxu1 %vm837_vm6, %v2285_v6 }
 0x89f   : > { %v2041_v26 = vpop.f32.mrb[4].mxu1 }
 0x8a0   : > { %v2045_v28 = vadd.f32 %v2044_v22, %v2041_v26  ;;  %v1704_v0 = vpop.f32.mrb[5].mxu1 }
 0x8a1   : > { %v2048_v1 = vadd.f32 %v2047_v25, %v1704_v0  ;;  %v2042_v32 = vpop.f32.mrb[6].mxu1 }
 0x8a2   : > { %v1725_v33 = vmul.f32 %v2045_v28, %v2650_v24  ;;  %v2051_v34 = vadd.f32 %v2050_v27, %v2042_v32  ;;  %v1707_v35 = vpop.f32.mrb[7].mxu1 }
 0x8a3   : > { %v1723_v36 = vmul.f32 %v2048_v1, %v2650_v24  ;;  %v2054_v37 = vadd.f32 %v2053_v4, %v1707_v35 }
 0x8a4   : > { %1729 = vst [vmem:[%s471_s26 + $0x10] sm:$0xff] %v1725_v33  ;;  %v1726_v38 = vmul.f32 %v2051_v34, %v2650_v24 }
 0x8a5   : > { %1727 = vst [vmem:[%s471_s26] sm:$0xff] %v1723_v36  ;;  %v1724_v39 = vmul.f32 %v2054_v37, %v2650_v24 }
 0x8a6   : > { %1730 = vst [vmem:[%s471_s26 + $0x18] sm:$0xff] %v1726_v38 }
 0x8a7   : > { %1728 = vst [vmem:[%s471_s26 + $0x8] sm:$0xff] %v1724_v39 }
 0x8a8   : > { %2347 = shalt.err (!%p2344_p3)
}
 0x8a9   : > { %s2348_s22 = scalar_lea.hbm %s2922_s28, 512  ;;  %s2352_s21 = scalar_lea.hbm %s2981_s14, 1024 }
 0x8aa   : > { %p2349_p4 = scmp.ne.s32.totalorder %s2922_s28, %s2348_s22  ;;  %p2353_p9 = scmp.lt.u32.totalorder %s2922_s28, %s2981_s14 }
 0x8ab   : > { %p2354_p10 = scmp.lt.u32.totalorder %s2352_s21, %s2348_s22  ;;  %p2356_p12 = scmp.lt.u32.totalorder %s2348_s22, %s2922_s28 }
 0x8ac   : > { %p2350_p7 = pnand %p2349_p4, %p2522_p5 }
 0x8ad   : > { %p2355_p11 = por %p2354_p10, %p2353_p9 }
 0x8ae   : > { %p2351_p8 = pneg %p2350_p7 }
 0x8af   : > { %p2357_p13 = por %p2356_p12, %p2355_p11 }
 0x8b1   : > { %p2358_p0 = pnand %p2357_p13, %p2351_p8 }
 0x8b3   : > { %2361 = shalt.err (!%p2358_p0)
}
 0x8b4   : > { %s2407_s18 = smov 128   ;;  %s2408_s0 = smov 8  }
 0x8b5   : > { %2063 = dma.vmem_to_hbm [thread:$0]  (%p2522_p5), %s2915_s27, 512, %s2922_s28, %s2926_s17, %s2407_s18, %s2407_s18, %s2408_s0  }
 0x8b6 PF: > { %p2069_p1 = scmp.ge.s32.totalorder %s2396_s16, 2  ;;  %s1760_s19 = sand.u32 1, %s2384_s29  }
 0x8b7   : > { %s1761_s22 = scalar_lea.sflag [#allocation3], %s1760_s19 }
 0x8b8   : > { %p2066_p2 = pnand %p2069_p1, %p2526_p6 }
 0x8ba   : > { %2379 = dma.done.wait (!%p2066_p2), %s1761_s22, 512  }
 0x8bb   : > { %2381 = vsyncadd (!%p2066_p2), %s1761_s22, 4294966784  ;;  %s3001_s16 = sld [smem:[#allocation6_spill]]  ;;  %s3002_s26 = sld [smem:[#allocation5_spill]] }
 0x8bc   : > { %s3003_s15 = sld [smem:[#allocation7_spill]]  ;;  %s3004_s29 = smov %s2388_s30 }
 0x8c1   : > { %p24_p3 = scmp.ge.s32.totalorder %s3001_s16, 4   ;;  %s3005_s30 = smov %s3002_s26 }
 0x8c3   :  { %26 = sbr.rel (!%p24_p3) target bundleno = 5 (0x5), region = 114 }
 0x8ca   :  { %1766 = vsyncpa [#allocation3], 1 }
 0x8cb   :  { %1768 = vsyncpa [#allocation3 + $0x1], 1 }

</bundles_post_ra>
